<compile_context>
chip_gen: v7x
topology: tpu7x:2x2x1
jax: 0.10.0
libtpu: 0.0.40
codegen_flags: <defaults>
</compile_context>

<pallas_src>
import math

import numpy as np
import jax
import jax.numpy as jnp
from jax.experimental import pallas as pl
from jax.experimental.pallas import tpu as pltpu  # noqa: F401  (TPU backend)

# ----------------------------- config ---------------------------------------
B = 2            # batch
C_IN = 3         # RGB pixel channels
IMG = 16         # input spatial size (H = W = IMG)
PATCH = 4        # patch size -> token grid 4x4
HP = WP = IMG // PATCH
N_TOK = HP * WP              # patch tokens
T = N_TOK + 1                # +1 CLS token
T_PAD = 24                   # tokens padded to a multiple of 8 sublanes
D = 32                       # hidden size
NH = 4                       # attention heads
DH = D // NH                 # head dim
MLP = 4 * D                  # MLP intermediate
LAYERS = 2                   # transformer layers
NUM_LABELS = 1               # segmentation classes (kernel assumes == 1)
LN_EPS = 1e-6                # dinov2 layer_norm_eps
PP = C_IN * PATCH * PATCH    # flattened patch pixels
NEG_INF = -1e30

assert NUM_LABELS == 1, "classifier fold below assumes a single label channel"


# --------------------------- fused Pallas kernel -----------------------------
def _dinov2_fused_kernel(patches_ref, prefix_ref, patch_w_ref,
                         wq_ref, wk_ref, wv_ref, wo_ref,
                         fc1_w_ref, fc1_b_ref, fc2_w_ref,
                         vecs_ref, hmask_ref, attn_bias_ref,
                         ln_f_ref, cls_wt_ref, sel_ref, resize_ref, cls_b_ref,
                         out_ref):
    f32 = jnp.float32

    def layer_norm(x, g, b):
        mean = jnp.mean(x, axis=-1, keepdims=True)
        xc = x - mean
        var = jnp.mean(xc * xc, axis=-1, keepdims=True)
        return xc * jax.lax.rsqrt(var + LN_EPS) * g + b

    # ---- patch embedding + CLS token + positional embedding ----------------
    # All images are folded along sublanes: rows = B * T_PAD.  `prefix` holds
    # (cls_token + pos[0]) / (patch_b + pos[k]) / zeros per image block;
    # `patches` has zeros in the CLS slot and padded tail.
    x = jnp.dot(patches_ref[...], patch_w_ref[...],
                preferred_element_type=f32) + prefix_ref[...]       # (R, D)

    attn_bias = attn_bias_ref[...]     # (R, R): 0 same-image valid key, -1e30 else
    hmask = hmask_ref[...]             # (NH, D) 0/1 per-head channel masks

    # ---- transformer encoder (all layers, fully VMEM resident) -------------
    for l in range(LAYERS):                       # static, unrolled
        vec = vecs_ref[l]                         # (9, D) packed per-layer vectors
        ln1_g, ln1_b = vec[0:1], vec[1:2]
        q_b, k_b, v_b, o_b = vec[2:3], vec[3:4], vec[4:5], vec[5:6]
        ln2_g, ln2_b, fc2_b = vec[6:7], vec[7:8], vec[8:9]

        h = layer_norm(x, ln1_g, ln1_b)
        # separate full-width projections (no lane slicing of a packed qkv)
        q = jnp.dot(h, wq_ref[l], preferred_element_type=f32) + q_b   # scale folded
        k = jnp.dot(h, wk_ref[l], preferred_element_type=f32) + k_b
        v = jnp.dot(h, wv_ref[l], preferred_element_type=f32) + v_b

        ctx = None
        for hh in range(NH):                      # static head loop, no lane slices
            m_h = hmask[hh:hh + 1, :]             # (1, D) channel mask for head hh
            # (q*m_h) @ k^T contracts full D; masked channels contribute 0,
            # so this equals Q_h @ K_h^T exactly.
            s = jax.lax.dot_general(q * m_h, k, (((1,), (1,)), ((), ())),
                                    preferred_element_type=f32) + attn_bias
            s = s - jnp.max(s, axis=-1, keepdims=True)
            p = jnp.exp(s)
            p = p * pl.reciprocal(jnp.sum(p, axis=-1, keepdims=True), approx=True)
            # p @ (v*m_h) lands only in head hh's channels; the sum over heads
            # reproduces the concatenated multi-head context with no concat.
            part = jnp.dot(p, v * m_h, preferred_element_type=f32)
            ctx = part if ctx is None else ctx + part

        # LayerScale-1 is folded into wo / o_b
        x = x + jnp.dot(ctx, wo_ref[l], preferred_element_type=f32) + o_b

        h2 = layer_norm(x, ln2_g, ln2_b)
        m = jnp.dot(h2, fc1_w_ref[l], preferred_element_type=f32) + fc1_b_ref[l]
        m = 0.5 * m * (1.0 + jax.lax.erf(m * 0.7071067811865476))   # exact GELU
        # LayerScale-2 is folded into fc2_w / fc2_b
        x = x + jnp.dot(m, fc2_w_ref[l], preferred_element_type=f32) + fc2_b

    ln_f = ln_f_ref[...]
    x = layer_norm(x, ln_f[0:1], ln_f[1:2])       # final LN

    # ---- classifier (1x1 conv) + bilinear resize + sigmoid ------------------
    # per-row logits for every token row of every image: (NUM_LABELS=1, R)
    logit_all = jax.lax.dot_general(cls_wt_ref[...], x,
                                    (((1,), (1,)), ((), ())),
                                    preferred_element_type=f32)
    # select each image's rows (NUM_LABELS == 1 -> plain broadcast multiply)
    m_rows = sel_ref[...] * logit_all                                # (B, R)
    # pre-padded resize operator: zero rows for CLS / padded tokens, so no
    # unaligned lane slice is needed; output is a lane-dense (B, 256) slab.
    up = jnp.dot(m_rows, resize_ref[...],
                 preferred_element_type=f32) + cls_b_ref[...]        # (B, H*W)
    out_ref[...] = jax.nn.sigmoid(up)


# --------------------------- helpers ------------------------------------------
def _bilinear_matrix(out_size, in_size):
    """Row-stochastic matrix reproducing torch bilinear, align_corners=False."""
    scale = in_size / out_size
    i = np.arange(out_size)
    src = np.clip((i + 0.5) * scale - 0.5, 0.0, None)
    x0 = np.minimum(np.floor(src).astype(np.int64), in_size - 1)
    x1 = np.minimum(x0 + 1, in_size - 1)
    lam = (src - x0).astype(np.float32)
    W = np.zeros((out_size, in_size), dtype=np.float32)
    np.add.at(W, (i, x0), 1.0 - lam)
    np.add.at(W, (i, x1), lam)
    return W


def init_params(key):
    keys = iter(jax.random.split(key, 64))

    def nrm(shape, std=0.02):
        return (std * jax.random.normal(next(keys), shape)).astype(jnp.float32)

    params = {
        "patch_w": nrm((PP, D)),                  # conv(kernel=stride=patch) == matmul
        "patch_b": jnp.zeros((D,), jnp.float32),
        "cls_token": nrm((1, 1, D)),
        "pos_embed": nrm((1, T, D)),
        "ln_f_g": jnp.ones((D,), jnp.float32),
        "ln_f_b": jnp.zeros((D,), jnp.float32),
        "cls_w": nrm((D, NUM_LABELS)),            # 1x1 conv == matmul over channels
        "cls_b": jnp.zeros((NUM_LABELS,), jnp.float32),
        "layers": [],
    }
    for _ in range(LAYERS):
        params["layers"].append({
            "ln1_g": jnp.ones((D,), jnp.float32), "ln1_b": jnp.zeros((D,), jnp.float32),
            "q_w": nrm((D, D)), "q_b": jnp.zeros((D,), jnp.float32),
            "k_w": nrm((D, D)), "k_b": jnp.zeros((D,), jnp.float32),
            "v_w": nrm((D, D)), "v_b": jnp.zeros((D,), jnp.float32),
            "o_w": nrm((D, D)), "o_b": jnp.zeros((D,), jnp.float32),
            "ls1": jnp.ones((D,), jnp.float32),   # Dinov2LayerScale init = 1.0
            "ln2_g": jnp.ones((D,), jnp.float32), "ln2_b": jnp.zeros((D,), jnp.float32),
            "fc1_w": nrm((D, MLP)), "fc1_b": jnp.zeros((MLP,), jnp.float32),
            "fc2_w": nrm((MLP, D)), "fc2_b": jnp.zeros((D,), jnp.float32),
            "ls2": jnp.ones((D,), jnp.float32),
        })
    return params


def forward(pixel_values, params):
    Bm, Cm, Hm, Wm = pixel_values.shape
    R = Bm * T_PAD               # all images folded along sublanes
    HW = Hm * Wm

    # ---- patch extraction + batch fold (cheap XLA reshape/transpose/pad) ----
    patches = pixel_values.reshape(Bm, Cm, HP, PATCH, WP, PATCH)
    patches = patches.transpose(0, 2, 4, 1, 3, 5).reshape(Bm, N_TOK, PP)
    patches = jnp.pad(patches, ((0, 0), (1, T_PAD - 1 - N_TOK), (0, 0)))
    patches = patches.reshape(R, PP)                                 # (48, 48)

    # ---- fold cls_token, pos_embed and patch bias into one additive prefix --
    cls_row = params["cls_token"].reshape(1, D) + params["pos_embed"][0, 0:1, :]
    tok_rows = params["pos_embed"][0, 1:, :] + params["patch_b"][None, :]
    prefix_one = jnp.concatenate(
        [cls_row, tok_rows, jnp.zeros((T_PAD - T, D), jnp.float32)], axis=0)
    prefix = jnp.tile(prefix_one, (Bm, 1))                           # (48, 32)

    # ---- per-layer weights: fold softmax scale + LayerScale into weights ----
    scale = 1.0 / math.sqrt(DH)
    L = params["layers"]
    wq = jnp.stack([l["q_w"] * scale for l in L])                    # (LAYERS, D, D)
    wk = jnp.stack([l["k_w"] for l in L])
    wv = jnp.stack([l["v_w"] for l in L])
    wo = jnp.stack([l["o_w"] * l["ls1"][None, :] for l in L])        # ls1 folded
    fc1_w = jnp.stack([l["fc1_w"] for l in L])                       # (LAYERS, D, MLP)
    fc1_b = jnp.stack([l["fc1_b"] for l in L])[:, None, :]           # (LAYERS, 1, MLP)
    fc2_w = jnp.stack([l["fc2_w"] * l["ls2"][None, :] for l in L])   # ls2 folded
    vecs = jnp.stack([jnp.stack([l["ln1_g"], l["ln1_b"],
                                 l["q_b"] * scale, l["k_b"], l["v_b"],
                                 l["o_b"] * l["ls1"],
                                 l["ln2_g"], l["ln2_b"],
                                 l["fc2_b"] * l["ls2"]]) for l in L])  # (LAYERS, 9, D)
    ln_f = jnp.stack([params["ln_f_g"], params["ln_f_b"]])           # (2, D)
    cls_wt = params["cls_w"].T                                       # (1, D)
    cls_b_rows = jnp.tile(params["cls_b"].reshape(NUM_LABELS, 1), (Bm, 1))  # (B, 1)

    # ---- static (numpy) constants baked as small weights ---------------------
    hmask = np.zeros((NH, D), np.float32)
    for h in range(NH):
        hmask[h, h * DH:(h + 1) * DH] = 1.0

    img_id = np.arange(R) // T_PAD
    tok_id = np.arange(R) % T_PAD
    valid_key = tok_id < T
    attn_bias = np.where((img_id[:, None] == img_id[None, :]) & valid_key[None, :],
                         0.0, NEG_INF).astype(np.float32)            # (R, R)
    sel = (img_id[None, :] == np.arange(Bm)[:, None]).astype(np.float32)  # (B, R)

    # fused bilinear-resize operator, pre-padded so the classifier needs no slice:
    # rows b*T_PAD+1+k carry resize row k; CLS/pad rows are zero.
    wh = _bilinear_matrix(Hm, HP)
    ww = _bilinear_matrix(Wm, WP)
    resize = np.einsum("yi,xj->ijyx", wh, ww).reshape(N_TOK, HW).astype(np.float32)
    resize_pad = np.zeros((R, HW), np.float32)
    for b in range(Bm):
        resize_pad[b * T_PAD + 1: b * T_PAD + 1 + N_TOK, :] = resize

    args = (patches, prefix, params["patch_w"], wq, wk, wv, wo,
            fc1_w, fc1_b, fc2_w, vecs,
            jnp.asarray(hmask), jnp.asarray(attn_bias),
            ln_f, cls_wt, jnp.asarray(sel), jnp.asarray(resize_pad), cls_b_rows)

    # ---- advisory cost estimate so XLA overlaps the surrounding glue ops ----
    flops = 2 * R * PP * D
    flops += LAYERS * (4 * 2 * R * D * D                 # q,k,v,o projections
                       + NH * (2 * R * D * R + 2 * R * R * D)   # scores + context
                       + 2 * 2 * R * D * MLP)            # MLP
    flops += 2 * NUM_LABELS * R * D + 2 * Bm * NUM_LABELS * R * HW
    transcendentals = LAYERS * (NH * R * R + R * MLP) + Bm * NUM_LABELS * HW
    bytes_accessed = sum(int(np.prod(a.shape)) * 4 for a in args) \
        + Bm * NUM_LABELS * HW * 4

    # Single kernel invocation: no grid, no pipeline, every operand fully
    # VMEM-resident (total footprint << 1 MiB on all generations, incl. v7x).
    out = pl.pallas_call(
        _dinov2_fused_kernel,
        out_shape=jax.ShapeDtypeStruct((Bm * NUM_LABELS, HW), jnp.float32),
        cost_estimate=pl.CostEstimate(flops=int(flops),
                                      transcendentals=int(transcendentals),
                                      bytes_accessed=int(bytes_accessed)),
    )(*args)

    return out.reshape(Bm, NUM_LABELS, Hm, Wm)


if __name__ == "__main__":
    key = jax.random.PRNGKey(0)
    kp, kx = jax.random.split(key)
    params = init_params(kp)
    pixel_values = jax.random.normal(kx, (B, C_IN, IMG, IMG), dtype=jnp.float32)

    fwd = jax.jit(forward)
    out = jax.block_until_ready(fwd(pixel_values, params))

    assert out.shape == (B, NUM_LABELS, IMG, IMG), out.shape
    assert bool(jnp.all(jnp.isfinite(out)))
    assert bool(jnp.all((out >= 0.0) & (out <= 1.0)))   # sigmoid range
    print("KERNEL_OK")
</pallas_src>

<mosaic_0001>
module attributes {stable_mosaic.version = 11 : i64} {
  func.func @_dinov2_fused_kernel(%arg0: memref<48x48xf32, #tpu.memory_space<vmem>>, %arg1: memref<48x32xf32, #tpu.memory_space<vmem>>, %arg2: memref<48x32xf32, #tpu.memory_space<vmem>>, %arg3: memref<2x32x32xf32, #tpu.memory_space<vmem>>, %arg4: memref<2x32x32xf32, #tpu.memory_space<vmem>>, %arg5: memref<2x32x32xf32, #tpu.memory_space<vmem>>, %arg6: memref<2x32x32xf32, #tpu.memory_space<vmem>>, %arg7: memref<2x32x128xf32, #tpu.memory_space<vmem>>, %arg8: memref<2x1x128xf32, #tpu.memory_space<vmem>>, %arg9: memref<2x128x32xf32, #tpu.memory_space<vmem>>, %arg10: memref<2x9x32xf32, #tpu.memory_space<vmem>>, %arg11: memref<4x32xf32, #tpu.memory_space<vmem>>, %arg12: memref<48x48xf32, #tpu.memory_space<vmem>>, %arg13: memref<2x32xf32, #tpu.memory_space<vmem>>, %arg14: memref<1x32xf32, #tpu.memory_space<vmem>>, %arg15: memref<2x48xf32, #tpu.memory_space<vmem>>, %arg16: memref<48x256xf32, #tpu.memory_space<vmem>>, %arg17: memref<2x1xf32, #tpu.memory_space<vmem>>, %arg18: memref<2x256xf32, #tpu.memory_space<vmem>>) attributes {dimension_semantics = [], scalar_prefetch = 0 : i64, scratch_operands = 0 : i64, tpu.core_type = #tpu.core_type<tc>} {
    %c0 = arith.constant 0 : index
    %c0_0 = arith.constant 0 : index
    %0 = vector.load %arg0[%c0, %c0_0] : memref<48x48xf32, #tpu.memory_space<vmem>>, vector<48x48xf32>
    %c0_1 = arith.constant 0 : index
    %c0_2 = arith.constant 0 : index
    %1 = vector.load %arg2[%c0_1, %c0_2] : memref<48x32xf32, #tpu.memory_space<vmem>>, vector<48x32xf32>
    %cst = arith.constant dense<0.000000e+00> : vector<48x32xf32>
    %2 = tpu.matmul %0, %1, %cst {dimension_numbers = #tpu.dot_dimension_numbers<[1], [0], [0], [1], [0, 0, 1, 1], [], []>} : vector<48x48xf32>, vector<48x32xf32>, vector<48x32xf32> -> vector<48x32xf32>
    %c0_3 = arith.constant 0 : index
    %c0_4 = arith.constant 0 : index
    %3 = vector.load %arg1[%c0_3, %c0_4] : memref<48x32xf32, #tpu.memory_space<vmem>>, vector<48x32xf32>
    %4 = arith.addf %2, %3 : vector<48x32xf32>
    %c0_5 = arith.constant 0 : index
    %c0_6 = arith.constant 0 : index
    %5 = vector.load %arg12[%c0_5, %c0_6] : memref<48x48xf32, #tpu.memory_space<vmem>>, vector<48x48xf32>
    %c0_7 = arith.constant 0 : index
    %c0_8 = arith.constant 0 : index
    %6 = vector.load %arg11[%c0_7, %c0_8] : memref<4x32xf32, #tpu.memory_space<vmem>>, vector<4x32xf32>
    %c0_9 = arith.constant 0 : index
    %c0_10 = arith.constant 0 : index
    %c0_11 = arith.constant 0 : index
    %7 = vector.load %arg10[%c0_9, %c0_10, %c0_11] : memref<2x9x32xf32, #tpu.memory_space<vmem>>, vector<1x9x32xf32>
    %8 = vector.shape_cast %7 : vector<1x9x32xf32> to vector<9x32xf32>
    %9 = vector.extract_strided_slice %8 {offsets = [0, 0], sizes = [1, 32], strides = [1, 1]} : vector<9x32xf32> to vector<1x32xf32>
    %10 = vector.extract_strided_slice %8 {offsets = [1, 0], sizes = [1, 32], strides = [1, 1]} : vector<9x32xf32> to vector<1x32xf32>
    %11 = vector.extract_strided_slice %8 {offsets = [2, 0], sizes = [1, 32], strides = [1, 1]} : vector<9x32xf32> to vector<1x32xf32>
    %12 = vector.extract_strided_slice %8 {offsets = [3, 0], sizes = [1, 32], strides = [1, 1]} : vector<9x32xf32> to vector<1x32xf32>
    %13 = vector.extract_strided_slice %8 {offsets = [4, 0], sizes = [1, 32], strides = [1, 1]} : vector<9x32xf32> to vector<1x32xf32>
    %14 = vector.extract_strided_slice %8 {offsets = [5, 0], sizes = [1, 32], strides = [1, 1]} : vector<9x32xf32> to vector<1x32xf32>
    %15 = vector.extract_strided_slice %8 {offsets = [6, 0], sizes = [1, 32], strides = [1, 1]} : vector<9x32xf32> to vector<1x32xf32>
    %16 = vector.extract_strided_slice %8 {offsets = [7, 0], sizes = [1, 32], strides = [1, 1]} : vector<9x32xf32> to vector<1x32xf32>
    %17 = vector.extract_strided_slice %8 {offsets = [8, 0], sizes = [1, 32], strides = [1, 1]} : vector<9x32xf32> to vector<1x32xf32>
    %cst_12 = arith.constant dense<0.000000e+00> : vector<48xf32>
    %18 = vector.multi_reduction <add>, %4, %cst_12 [1] : vector<48x32xf32> to vector<48xf32>
    %19 = vector.shape_cast %18 : vector<48xf32> to vector<48x1xf32>
    %cst_13 = arith.constant 3.200000e+01 : f32
    %20 = vector.broadcast %cst_13 : f32 to vector<48x1xf32>
    %21 = arith.divf %19, %20 : vector<48x1xf32>
    %22 = vector.broadcast %21 : vector<48x1xf32> to vector<48x32xf32>
    %23 = arith.subf %4, %22 : vector<48x32xf32>
    %24 = arith.mulf %23, %23 : vector<48x32xf32>
    %cst_14 = arith.constant dense<0.000000e+00> : vector<48xf32>
    %25 = vector.multi_reduction <add>, %24, %cst_14 [1] : vector<48x32xf32> to vector<48xf32>
    %26 = vector.shape_cast %25 : vector<48xf32> to vector<48x1xf32>
    %cst_15 = arith.constant 3.200000e+01 : f32
    %27 = vector.broadcast %cst_15 : f32 to vector<48x1xf32>
    %28 = arith.divf %26, %27 : vector<48x1xf32>
    %cst_16 = arith.constant 9.99999997E-7 : f32
    %29 = vector.broadcast %cst_16 : f32 to vector<48x1xf32>
    %30 = arith.addf %28, %29 : vector<48x1xf32>
    %31 = math.rsqrt %30 : vector<48x1xf32>
    %32 = vector.broadcast %31 : vector<48x1xf32> to vector<48x32xf32>
    %33 = arith.mulf %23, %32 : vector<48x32xf32>
    %34 = vector.broadcast %9 : vector<1x32xf32> to vector<48x32xf32>
    %35 = arith.mulf %33, %34 : vector<48x32xf32>
    %36 = vector.broadcast %10 : vector<1x32xf32> to vector<48x32xf32>
    %37 = arith.addf %35, %36 : vector<48x32xf32>
    %c0_17 = arith.constant 0 : index
    %c0_18 = arith.constant 0 : index
    %c0_19 = arith.constant 0 : index
    %38 = vector.load %arg3[%c0_17, %c0_18, %c0_19] : memref<2x32x32xf32, #tpu.memory_space<vmem>>, vector<1x32x32xf32>
    %39 = vector.shape_cast %38 : vector<1x32x32xf32> to vector<32x32xf32>
    %cst_20 = arith.constant dense<0.000000e+00> : vector<48x32xf32>
    %40 = tpu.matmul %37, %39, %cst_20 {dimension_numbers = #tpu.dot_dimension_numbers<[1], [0], [0], [1], [0, 0, 1, 1], [], []>} : vector<48x32xf32>, vector<32x32xf32>, vector<48x32xf32> -> vector<48x32xf32>
    %41 = vector.broadcast %11 : vector<1x32xf32> to vector<48x32xf32>
    %42 = arith.addf %40, %41 : vector<48x32xf32>
    %c0_21 = arith.constant 0 : index
    %c0_22 = arith.constant 0 : index
    %c0_23 = arith.constant 0 : index
    %43 = vector.load %arg4[%c0_21, %c0_22, %c0_23] : memref<2x32x32xf32, #tpu.memory_space<vmem>>, vector<1x32x32xf32>
    %44 = vector.shape_cast %43 : vector<1x32x32xf32> to vector<32x32xf32>
    %cst_24 = arith.constant dense<0.000000e+00> : vector<48x32xf32>
    %45 = tpu.matmul %37, %44, %cst_24 {dimension_numbers = #tpu.dot_dimension_numbers<[1], [0], [0], [1], [0, 0, 1, 1], [], []>} : vector<48x32xf32>, vector<32x32xf32>, vector<48x32xf32> -> vector<48x32xf32>
    %46 = vector.broadcast %12 : vector<1x32xf32> to vector<48x32xf32>
    %47 = arith.addf %45, %46 : vector<48x32xf32>
    %c0_25 = arith.constant 0 : index
    %c0_26 = arith.constant 0 : index
    %c0_27 = arith.constant 0 : index
    %48 = vector.load %arg5[%c0_25, %c0_26, %c0_27] : memref<2x32x32xf32, #tpu.memory_space<vmem>>, vector<1x32x32xf32>
    %49 = vector.shape_cast %48 : vector<1x32x32xf32> to vector<32x32xf32>
    %cst_28 = arith.constant dense<0.000000e+00> : vector<48x32xf32>
    %50 = tpu.matmul %37, %49, %cst_28 {dimension_numbers = #tpu.dot_dimension_numbers<[1], [0], [0], [1], [0, 0, 1, 1], [], []>} : vector<48x32xf32>, vector<32x32xf32>, vector<48x32xf32> -> vector<48x32xf32>
    %51 = vector.broadcast %13 : vector<1x32xf32> to vector<48x32xf32>
    %52 = arith.addf %50, %51 : vector<48x32xf32>
    %53 = vector.extract_strided_slice %6 {offsets = [0, 0], sizes = [1, 32], strides = [1, 1]} : vector<4x32xf32> to vector<1x32xf32>
    %54 = vector.broadcast %53 : vector<1x32xf32> to vector<48x32xf32>
    %55 = arith.mulf %42, %54 : vector<48x32xf32>
    %cst_29 = arith.constant dense<0.000000e+00> : vector<48x48xf32>
    %56 = tpu.matmul %55, %47, %cst_29 {dimension_numbers = #tpu.dot_dimension_numbers<[1], [1], [0], [0], [0, 0, 1, 0], [], []>} : vector<48x32xf32>, vector<48x32xf32>, vector<48x48xf32> -> vector<48x48xf32>
    %57 = arith.addf %56, %5 : vector<48x48xf32>
    %cst_30 = arith.constant dense<0xFF800000> : vector<48xf32>
    %58 = vector.multi_reduction <maximumf>, %57, %cst_30 [1] : vector<48x48xf32> to vector<48xf32>
    %59 = vector.shape_cast %58 : vector<48xf32> to vector<48x1xf32>
    %60 = vector.broadcast %59 : vector<48x1xf32> to vector<48x48xf32>
    %61 = arith.subf %57, %60 : vector<48x48xf32>
    %62 = math.exp %61 : vector<48x48xf32>
    %cst_31 = arith.constant dense<0.000000e+00> : vector<48xf32>
    %63 = vector.multi_reduction <add>, %62, %cst_31 [1] : vector<48x48xf32> to vector<48xf32>
    %64 = vector.shape_cast %63 : vector<48xf32> to vector<48x1xf32>
    %65 = tpu.reciprocal %64 {approx = true} : vector<48x1xf32> -> vector<48x1xf32>
    %66 = vector.broadcast %65 : vector<48x1xf32> to vector<48x48xf32>
    %67 = arith.mulf %62, %66 : vector<48x48xf32>
    %68 = vector.broadcast %53 : vector<1x32xf32> to vector<48x32xf32>
    %69 = arith.mulf %52, %68 : vector<48x32xf32>
    %cst_32 = arith.constant dense<0.000000e+00> : vector<48x32xf32>
    %70 = tpu.matmul %67, %69, %cst_32 {dimension_numbers = #tpu.dot_dimension_numbers<[1], [0], [0], [1], [0, 0, 1, 1], [], []>} : vector<48x48xf32>, vector<48x32xf32>, vector<48x32xf32> -> vector<48x32xf32>
    %71 = vector.extract_strided_slice %6 {offsets = [1, 0], sizes = [1, 32], strides = [1, 1]} : vector<4x32xf32> to vector<1x32xf32>
    %72 = vector.broadcast %71 : vector<1x32xf32> to vector<48x32xf32>
    %73 = arith.mulf %42, %72 : vector<48x32xf32>
    %cst_33 = arith.constant dense<0.000000e+00> : vector<48x48xf32>
    %74 = tpu.matmul %73, %47, %cst_33 {dimension_numbers = #tpu.dot_dimension_numbers<[1], [1], [0], [0], [0, 0, 1, 0], [], []>} : vector<48x32xf32>, vector<48x32xf32>, vector<48x48xf32> -> vector<48x48xf32>
    %75 = arith.addf %74, %5 : vector<48x48xf32>
    %cst_34 = arith.constant dense<0xFF800000> : vector<48xf32>
    %76 = vector.multi_reduction <maximumf>, %75, %cst_34 [1] : vector<48x48xf32> to vector<48xf32>
    %77 = vector.shape_cast %76 : vector<48xf32> to vector<48x1xf32>
    %78 = vector.broadcast %77 : vector<48x1xf32> to vector<48x48xf32>
    %79 = arith.subf %75, %78 : vector<48x48xf32>
    %80 = math.exp %79 : vector<48x48xf32>
    %cst_35 = arith.constant dense<0.000000e+00> : vector<48xf32>
    %81 = vector.multi_reduction <add>, %80, %cst_35 [1] : vector<48x48xf32> to vector<48xf32>
    %82 = vector.shape_cast %81 : vector<48xf32> to vector<48x1xf32>
    %83 = tpu.reciprocal %82 {approx = true} : vector<48x1xf32> -> vector<48x1xf32>
    %84 = vector.broadcast %83 : vector<48x1xf32> to vector<48x48xf32>
    %85 = arith.mulf %80, %84 : vector<48x48xf32>
    %86 = vector.broadcast %71 : vector<1x32xf32> to vector<48x32xf32>
    %87 = arith.mulf %52, %86 : vector<48x32xf32>
    %cst_36 = arith.constant dense<0.000000e+00> : vector<48x32xf32>
    %88 = tpu.matmul %85, %87, %cst_36 {dimension_numbers = #tpu.dot_dimension_numbers<[1], [0], [0], [1], [0, 0, 1, 1], [], []>} : vector<48x48xf32>, vector<48x32xf32>, vector<48x32xf32> -> vector<48x32xf32>
    %89 = arith.addf %70, %88 : vector<48x32xf32>
    %90 = vector.extract_strided_slice %6 {offsets = [2, 0], sizes = [1, 32], strides = [1, 1]} : vector<4x32xf32> to vector<1x32xf32>
    %91 = vector.broadcast %90 : vector<1x32xf32> to vector<48x32xf32>
    %92 = arith.mulf %42, %91 : vector<48x32xf32>
    %cst_37 = arith.constant dense<0.000000e+00> : vector<48x48xf32>
    %93 = tpu.matmul %92, %47, %cst_37 {dimension_numbers = #tpu.dot_dimension_numbers<[1], [1], [0], [0], [0, 0, 1, 0], [], []>} : vector<48x32xf32>, vector<48x32xf32>, vector<48x48xf32> -> vector<48x48xf32>
    %94 = arith.addf %93, %5 : vector<48x48xf32>
    %cst_38 = arith.constant dense<0xFF800000> : vector<48xf32>
    %95 = vector.multi_reduction <maximumf>, %94, %cst_38 [1] : vector<48x48xf32> to vector<48xf32>
    %96 = vector.shape_cast %95 : vector<48xf32> to vector<48x1xf32>
    %97 = vector.broadcast %96 : vector<48x1xf32> to vector<48x48xf32>
    %98 = arith.subf %94, %97 : vector<48x48xf32>
    %99 = math.exp %98 : vector<48x48xf32>
    %cst_39 = arith.constant dense<0.000000e+00> : vector<48xf32>
    %100 = vector.multi_reduction <add>, %99, %cst_39 [1] : vector<48x48xf32> to vector<48xf32>
    %101 = vector.shape_cast %100 : vector<48xf32> to vector<48x1xf32>
    %102 = tpu.reciprocal %101 {approx = true} : vector<48x1xf32> -> vector<48x1xf32>
    %103 = vector.broadcast %102 : vector<48x1xf32> to vector<48x48xf32>
    %104 = arith.mulf %99, %103 : vector<48x48xf32>
    %105 = vector.broadcast %90 : vector<1x32xf32> to vector<48x32xf32>
    %106 = arith.mulf %52, %105 : vector<48x32xf32>
    %cst_40 = arith.constant dense<0.000000e+00> : vector<48x32xf32>
    %107 = tpu.matmul %104, %106, %cst_40 {dimension_numbers = #tpu.dot_dimension_numbers<[1], [0], [0], [1], [0, 0, 1, 1], [], []>} : vector<48x48xf32>, vector<48x32xf32>, vector<48x32xf32> -> vector<48x32xf32>
    %108 = arith.addf %89, %107 : vector<48x32xf32>
    %109 = vector.extract_strided_slice %6 {offsets = [3, 0], sizes = [1, 32], strides = [1, 1]} : vector<4x32xf32> to vector<1x32xf32>
    %110 = vector.broadcast %109 : vector<1x32xf32> to vector<48x32xf32>
    %111 = arith.mulf %42, %110 : vector<48x32xf32>
    %cst_41 = arith.constant dense<0.000000e+00> : vector<48x48xf32>
    %112 = tpu.matmul %111, %47, %cst_41 {dimension_numbers = #tpu.dot_dimension_numbers<[1], [1], [0], [0], [0, 0, 1, 0], [], []>} : vector<48x32xf32>, vector<48x32xf32>, vector<48x48xf32> -> vector<48x48xf32>
    %113 = arith.addf %112, %5 : vector<48x48xf32>
    %cst_42 = arith.constant dense<0xFF800000> : vector<48xf32>
    %114 = vector.multi_reduction <maximumf>, %113, %cst_42 [1] : vector<48x48xf32> to vector<48xf32>
    %115 = vector.shape_cast %114 : vector<48xf32> to vector<48x1xf32>
    %116 = vector.broadcast %115 : vector<48x1xf32> to vector<48x48xf32>
    %117 = arith.subf %113, %116 : vector<48x48xf32>
    %118 = math.exp %117 : vector<48x48xf32>
    %cst_43 = arith.constant dense<0.000000e+00> : vector<48xf32>
    %119 = vector.multi_reduction <add>, %118, %cst_43 [1] : vector<48x48xf32> to vector<48xf32>
    %120 = vector.shape_cast %119 : vector<48xf32> to vector<48x1xf32>
    %121 = tpu.reciprocal %120 {approx = true} : vector<48x1xf32> -> vector<48x1xf32>
    %122 = vector.broadcast %121 : vector<48x1xf32> to vector<48x48xf32>
    %123 = arith.mulf %118, %122 : vector<48x48xf32>
    %124 = vector.broadcast %109 : vector<1x32xf32> to vector<48x32xf32>
    %125 = arith.mulf %52, %124 : vector<48x32xf32>
    %cst_44 = arith.constant dense<0.000000e+00> : vector<48x32xf32>
    %126 = tpu.matmul %123, %125, %cst_44 {dimension_numbers = #tpu.dot_dimension_numbers<[1], [0], [0], [1], [0, 0, 1, 1], [], []>} : vector<48x48xf32>, vector<48x32xf32>, vector<48x32xf32> -> vector<48x32xf32>
    %127 = arith.addf %108, %126 : vector<48x32xf32>
    %c0_45 = arith.constant 0 : index
    %c0_46 = arith.constant 0 : index
    %c0_47 = arith.constant 0 : index
    %128 = vector.load %arg6[%c0_45, %c0_46, %c0_47] : memref<2x32x32xf32, #tpu.memory_space<vmem>>, vector<1x32x32xf32>
    %129 = vector.shape_cast %128 : vector<1x32x32xf32> to vector<32x32xf32>
    %cst_48 = arith.constant dense<0.000000e+00> : vector<48x32xf32>
    %130 = tpu.matmul %127, %129, %cst_48 {dimension_numbers = #tpu.dot_dimension_numbers<[1], [0], [0], [1], [0, 0, 1, 1], [], []>} : vector<48x32xf32>, vector<32x32xf32>, vector<48x32xf32> -> vector<48x32xf32>
    %131 = arith.addf %4, %130 : vector<48x32xf32>
    %132 = vector.broadcast %14 : vector<1x32xf32> to vector<48x32xf32>
    %133 = arith.addf %131, %132 : vector<48x32xf32>
    %cst_49 = arith.constant dense<0.000000e+00> : vector<48xf32>
    %134 = vector.multi_reduction <add>, %133, %cst_49 [1] : vector<48x32xf32> to vector<48xf32>
    %135 = vector.shape_cast %134 : vector<48xf32> to vector<48x1xf32>
    %cst_50 = arith.constant 3.200000e+01 : f32
    %136 = vector.broadcast %cst_50 : f32 to vector<48x1xf32>
    %137 = arith.divf %135, %136 : vector<48x1xf32>
    %138 = vector.broadcast %137 : vector<48x1xf32> to vector<48x32xf32>
    %139 = arith.subf %133, %138 : vector<48x32xf32>
    %140 = arith.mulf %139, %139 : vector<48x32xf32>
    %cst_51 = arith.constant dense<0.000000e+00> : vector<48xf32>
    %141 = vector.multi_reduction <add>, %140, %cst_51 [1] : vector<48x32xf32> to vector<48xf32>
    %142 = vector.shape_cast %141 : vector<48xf32> to vector<48x1xf32>
    %cst_52 = arith.constant 3.200000e+01 : f32
    %143 = vector.broadcast %cst_52 : f32 to vector<48x1xf32>
    %144 = arith.divf %142, %143 : vector<48x1xf32>
    %cst_53 = arith.constant 9.99999997E-7 : f32
    %145 = vector.broadcast %cst_53 : f32 to vector<48x1xf32>
    %146 = arith.addf %144, %145 : vector<48x1xf32>
    %147 = math.rsqrt %146 : vector<48x1xf32>
    %148 = vector.broadcast %147 : vector<48x1xf32> to vector<48x32xf32>
    %149 = arith.mulf %139, %148 : vector<48x32xf32>
    %150 = vector.broadcast %15 : vector<1x32xf32> to vector<48x32xf32>
    %151 = arith.mulf %149, %150 : vector<48x32xf32>
    %152 = vector.broadcast %16 : vector<1x32xf32> to vector<48x32xf32>
    %153 = arith.addf %151, %152 : vector<48x32xf32>
    %c0_54 = arith.constant 0 : index
    %c0_55 = arith.constant 0 : index
    %c0_56 = arith.constant 0 : index
    %154 = vector.load %arg7[%c0_54, %c0_55, %c0_56] : memref<2x32x128xf32, #tpu.memory_space<vmem>>, vector<1x32x128xf32>
    %155 = vector.shape_cast %154 : vector<1x32x128xf32> to vector<32x128xf32>
    %cst_57 = arith.constant dense<0.000000e+00> : vector<48x128xf32>
    %156 = tpu.matmul %153, %155, %cst_57 {dimension_numbers = #tpu.dot_dimension_numbers<[1], [0], [0], [1], [0, 0, 1, 1], [], []>} : vector<48x32xf32>, vector<32x128xf32>, vector<48x128xf32> -> vector<48x128xf32>
    %c0_58 = arith.constant 0 : index
    %c0_59 = arith.constant 0 : index
    %c0_60 = arith.constant 0 : index
    %157 = vector.load %arg8[%c0_58, %c0_59, %c0_60] : memref<2x1x128xf32, #tpu.memory_space<vmem>>, vector<1x1x128xf32>
    %158 = vector.shape_cast %157 : vector<1x1x128xf32> to vector<1x128xf32>
    %159 = vector.broadcast %158 : vector<1x128xf32> to vector<48x128xf32>
    %160 = arith.addf %156, %159 : vector<48x128xf32>
    %cst_61 = arith.constant 5.000000e-01 : f32
    %161 = vector.broadcast %cst_61 : f32 to vector<48x128xf32>
    %162 = arith.mulf %161, %160 : vector<48x128xf32>
    %cst_62 = arith.constant 0.707106769 : f32
    %163 = vector.broadcast %cst_62 : f32 to vector<48x128xf32>
    %164 = arith.mulf %160, %163 : vector<48x128xf32>
    %165 = math.erf %164 : vector<48x128xf32>
    %cst_63 = arith.constant 1.000000e+00 : f32
    %166 = vector.broadcast %cst_63 : f32 to vector<48x128xf32>
    %167 = arith.addf %166, %165 : vector<48x128xf32>
    %168 = arith.mulf %162, %167 : vector<48x128xf32>
    %c0_64 = arith.constant 0 : index
    %c0_65 = arith.constant 0 : index
    %c0_66 = arith.constant 0 : index
    %169 = vector.load %arg9[%c0_64, %c0_65, %c0_66] : memref<2x128x32xf32, #tpu.memory_space<vmem>>, vector<1x128x32xf32>
    %170 = vector.shape_cast %169 : vector<1x128x32xf32> to vector<128x32xf32>
    %cst_67 = arith.constant dense<0.000000e+00> : vector<48x32xf32>
    %171 = tpu.matmul %168, %170, %cst_67 {dimension_numbers = #tpu.dot_dimension_numbers<[1], [0], [0], [1], [0, 0, 1, 1], [], []>} : vector<48x128xf32>, vector<128x32xf32>, vector<48x32xf32> -> vector<48x32xf32>
    %172 = arith.addf %133, %171 : vector<48x32xf32>
    %173 = vector.broadcast %17 : vector<1x32xf32> to vector<48x32xf32>
    %174 = arith.addf %172, %173 : vector<48x32xf32>
    %c1 = arith.constant 1 : index
    %c0_68 = arith.constant 0 : index
    %c0_69 = arith.constant 0 : index
    %175 = vector.load %arg10[%c1, %c0_68, %c0_69] : memref<2x9x32xf32, #tpu.memory_space<vmem>>, vector<1x9x32xf32>
    %176 = vector.shape_cast %175 : vector<1x9x32xf32> to vector<9x32xf32>
    %177 = vector.extract_strided_slice %176 {offsets = [0, 0], sizes = [1, 32], strides = [1, 1]} : vector<9x32xf32> to vector<1x32xf32>
    %178 = vector.extract_strided_slice %176 {offsets = [1, 0], sizes = [1, 32], strides = [1, 1]} : vector<9x32xf32> to vector<1x32xf32>
    %179 = vector.extract_strided_slice %176 {offsets = [2, 0], sizes = [1, 32], strides = [1, 1]} : vector<9x32xf32> to vector<1x32xf32>
    %180 = vector.extract_strided_slice %176 {offsets = [3, 0], sizes = [1, 32], strides = [1, 1]} : vector<9x32xf32> to vector<1x32xf32>
    %181 = vector.extract_strided_slice %176 {offsets = [4, 0], sizes = [1, 32], strides = [1, 1]} : vector<9x32xf32> to vector<1x32xf32>
    %182 = vector.extract_strided_slice %176 {offsets = [5, 0], sizes = [1, 32], strides = [1, 1]} : vector<9x32xf32> to vector<1x32xf32>
    %183 = vector.extract_strided_slice %176 {offsets = [6, 0], sizes = [1, 32], strides = [1, 1]} : vector<9x32xf32> to vector<1x32xf32>
    %184 = vector.extract_strided_slice %176 {offsets = [7, 0], sizes = [1, 32], strides = [1, 1]} : vector<9x32xf32> to vector<1x32xf32>
    %185 = vector.extract_strided_slice %176 {offsets = [8, 0], sizes = [1, 32], strides = [1, 1]} : vector<9x32xf32> to vector<1x32xf32>
    %cst_70 = arith.constant dense<0.000000e+00> : vector<48xf32>
    %186 = vector.multi_reduction <add>, %174, %cst_70 [1] : vector<48x32xf32> to vector<48xf32>
    %187 = vector.shape_cast %186 : vector<48xf32> to vector<48x1xf32>
    %cst_71 = arith.constant 3.200000e+01 : f32
    %188 = vector.broadcast %cst_71 : f32 to vector<48x1xf32>
    %189 = arith.divf %187, %188 : vector<48x1xf32>
    %190 = vector.broadcast %189 : vector<48x1xf32> to vector<48x32xf32>
    %191 = arith.subf %174, %190 : vector<48x32xf32>
    %192 = arith.mulf %191, %191 : vector<48x32xf32>
    %cst_72 = arith.constant dense<0.000000e+00> : vector<48xf32>
    %193 = vector.multi_reduction <add>, %192, %cst_72 [1] : vector<48x32xf32> to vector<48xf32>
    %194 = vector.shape_cast %193 : vector<48xf32> to vector<48x1xf32>
    %cst_73 = arith.constant 3.200000e+01 : f32
    %195 = vector.broadcast %cst_73 : f32 to vector<48x1xf32>
    %196 = arith.divf %194, %195 : vector<48x1xf32>
    %cst_74 = arith.constant 9.99999997E-7 : f32
    %197 = vector.broadcast %cst_74 : f32 to vector<48x1xf32>
    %198 = arith.addf %196, %197 : vector<48x1xf32>
    %199 = math.rsqrt %198 : vector<48x1xf32>
    %200 = vector.broadcast %199 : vector<48x1xf32> to vector<48x32xf32>
    %201 = arith.mulf %191, %200 : vector<48x32xf32>
    %202 = vector.broadcast %177 : vector<1x32xf32> to vector<48x32xf32>
    %203 = arith.mulf %201, %202 : vector<48x32xf32>
    %204 = vector.broadcast %178 : vector<1x32xf32> to vector<48x32xf32>
    %205 = arith.addf %203, %204 : vector<48x32xf32>
    %c1_75 = arith.constant 1 : index
    %c0_76 = arith.constant 0 : index
    %c0_77 = arith.constant 0 : index
    %206 = vector.load %arg3[%c1_75, %c0_76, %c0_77] : memref<2x32x32xf32, #tpu.memory_space<vmem>>, vector<1x32x32xf32>
    %207 = vector.shape_cast %206 : vector<1x32x32xf32> to vector<32x32xf32>
    %cst_78 = arith.constant dense<0.000000e+00> : vector<48x32xf32>
    %208 = tpu.matmul %205, %207, %cst_78 {dimension_numbers = #tpu.dot_dimension_numbers<[1], [0], [0], [1], [0, 0, 1, 1], [], []>} : vector<48x32xf32>, vector<32x32xf32>, vector<48x32xf32> -> vector<48x32xf32>
    %209 = vector.broadcast %179 : vector<1x32xf32> to vector<48x32xf32>
    %210 = arith.addf %208, %209 : vector<48x32xf32>
    %c1_79 = arith.constant 1 : index
    %c0_80 = arith.constant 0 : index
    %c0_81 = arith.constant 0 : index
    %211 = vector.load %arg4[%c1_79, %c0_80, %c0_81] : memref<2x32x32xf32, #tpu.memory_space<vmem>>, vector<1x32x32xf32>
    %212 = vector.shape_cast %211 : vector<1x32x32xf32> to vector<32x32xf32>
    %cst_82 = arith.constant dense<0.000000e+00> : vector<48x32xf32>
    %213 = tpu.matmul %205, %212, %cst_82 {dimension_numbers = #tpu.dot_dimension_numbers<[1], [0], [0], [1], [0, 0, 1, 1], [], []>} : vector<48x32xf32>, vector<32x32xf32>, vector<48x32xf32> -> vector<48x32xf32>
    %214 = vector.broadcast %180 : vector<1x32xf32> to vector<48x32xf32>
    %215 = arith.addf %213, %214 : vector<48x32xf32>
    %c1_83 = arith.constant 1 : index
    %c0_84 = arith.constant 0 : index
    %c0_85 = arith.constant 0 : index
    %216 = vector.load %arg5[%c1_83, %c0_84, %c0_85] : memref<2x32x32xf32, #tpu.memory_space<vmem>>, vector<1x32x32xf32>
    %217 = vector.shape_cast %216 : vector<1x32x32xf32> to vector<32x32xf32>
    %cst_86 = arith.constant dense<0.000000e+00> : vector<48x32xf32>
    %218 = tpu.matmul %205, %217, %cst_86 {dimension_numbers = #tpu.dot_dimension_numbers<[1], [0], [0], [1], [0, 0, 1, 1], [], []>} : vector<48x32xf32>, vector<32x32xf32>, vector<48x32xf32> -> vector<48x32xf32>
    %219 = vector.broadcast %181 : vector<1x32xf32> to vector<48x32xf32>
    %220 = arith.addf %218, %219 : vector<48x32xf32>
    %221 = vector.extract_strided_slice %6 {offsets = [0, 0], sizes = [1, 32], strides = [1, 1]} : vector<4x32xf32> to vector<1x32xf32>
    %222 = vector.broadcast %221 : vector<1x32xf32> to vector<48x32xf32>
    %223 = arith.mulf %210, %222 : vector<48x32xf32>
    %cst_87 = arith.constant dense<0.000000e+00> : vector<48x48xf32>
    %224 = tpu.matmul %223, %215, %cst_87 {dimension_numbers = #tpu.dot_dimension_numbers<[1], [1], [0], [0], [0, 0, 1, 0], [], []>} : vector<48x32xf32>, vector<48x32xf32>, vector<48x48xf32> -> vector<48x48xf32>
    %225 = arith.addf %224, %5 : vector<48x48xf32>
    %cst_88 = arith.constant dense<0xFF800000> : vector<48xf32>
    %226 = vector.multi_reduction <maximumf>, %225, %cst_88 [1] : vector<48x48xf32> to vector<48xf32>
    %227 = vector.shape_cast %226 : vector<48xf32> to vector<48x1xf32>
    %228 = vector.broadcast %227 : vector<48x1xf32> to vector<48x48xf32>
    %229 = arith.subf %225, %228 : vector<48x48xf32>
    %230 = math.exp %229 : vector<48x48xf32>
    %cst_89 = arith.constant dense<0.000000e+00> : vector<48xf32>
    %231 = vector.multi_reduction <add>, %230, %cst_89 [1] : vector<48x48xf32> to vector<48xf32>
    %232 = vector.shape_cast %231 : vector<48xf32> to vector<48x1xf32>
    %233 = tpu.reciprocal %232 {approx = true} : vector<48x1xf32> -> vector<48x1xf32>
    %234 = vector.broadcast %233 : vector<48x1xf32> to vector<48x48xf32>
    %235 = arith.mulf %230, %234 : vector<48x48xf32>
    %236 = vector.broadcast %221 : vector<1x32xf32> to vector<48x32xf32>
    %237 = arith.mulf %220, %236 : vector<48x32xf32>
    %cst_90 = arith.constant dense<0.000000e+00> : vector<48x32xf32>
    %238 = tpu.matmul %235, %237, %cst_90 {dimension_numbers = #tpu.dot_dimension_numbers<[1], [0], [0], [1], [0, 0, 1, 1], [], []>} : vector<48x48xf32>, vector<48x32xf32>, vector<48x32xf32> -> vector<48x32xf32>
    %239 = vector.extract_strided_slice %6 {offsets = [1, 0], sizes = [1, 32], strides = [1, 1]} : vector<4x32xf32> to vector<1x32xf32>
    %240 = vector.broadcast %239 : vector<1x32xf32> to vector<48x32xf32>
    %241 = arith.mulf %210, %240 : vector<48x32xf32>
    %cst_91 = arith.constant dense<0.000000e+00> : vector<48x48xf32>
    %242 = tpu.matmul %241, %215, %cst_91 {dimension_numbers = #tpu.dot_dimension_numbers<[1], [1], [0], [0], [0, 0, 1, 0], [], []>} : vector<48x32xf32>, vector<48x32xf32>, vector<48x48xf32> -> vector<48x48xf32>
    %243 = arith.addf %242, %5 : vector<48x48xf32>
    %cst_92 = arith.constant dense<0xFF800000> : vector<48xf32>
    %244 = vector.multi_reduction <maximumf>, %243, %cst_92 [1] : vector<48x48xf32> to vector<48xf32>
    %245 = vector.shape_cast %244 : vector<48xf32> to vector<48x1xf32>
    %246 = vector.broadcast %245 : vector<48x1xf32> to vector<48x48xf32>
    %247 = arith.subf %243, %246 : vector<48x48xf32>
    %248 = math.exp %247 : vector<48x48xf32>
    %cst_93 = arith.constant dense<0.000000e+00> : vector<48xf32>
    %249 = vector.multi_reduction <add>, %248, %cst_93 [1] : vector<48x48xf32> to vector<48xf32>
    %250 = vector.shape_cast %249 : vector<48xf32> to vector<48x1xf32>
    %251 = tpu.reciprocal %250 {approx = true} : vector<48x1xf32> -> vector<48x1xf32>
    %252 = vector.broadcast %251 : vector<48x1xf32> to vector<48x48xf32>
    %253 = arith.mulf %248, %252 : vector<48x48xf32>
    %254 = vector.broadcast %239 : vector<1x32xf32> to vector<48x32xf32>
    %255 = arith.mulf %220, %254 : vector<48x32xf32>
    %cst_94 = arith.constant dense<0.000000e+00> : vector<48x32xf32>
    %256 = tpu.matmul %253, %255, %cst_94 {dimension_numbers = #tpu.dot_dimension_numbers<[1], [0], [0], [1], [0, 0, 1, 1], [], []>} : vector<48x48xf32>, vector<48x32xf32>, vector<48x32xf32> -> vector<48x32xf32>
    %257 = arith.addf %238, %256 : vector<48x32xf32>
    %258 = vector.extract_strided_slice %6 {offsets = [2, 0], sizes = [1, 32], strides = [1, 1]} : vector<4x32xf32> to vector<1x32xf32>
    %259 = vector.broadcast %258 : vector<1x32xf32> to vector<48x32xf32>
    %260 = arith.mulf %210, %259 : vector<48x32xf32>
    %cst_95 = arith.constant dense<0.000000e+00> : vector<48x48xf32>
    %261 = tpu.matmul %260, %215, %cst_95 {dimension_numbers = #tpu.dot_dimension_numbers<[1], [1], [0], [0], [0, 0, 1, 0], [], []>} : vector<48x32xf32>, vector<48x32xf32>, vector<48x48xf32> -> vector<48x48xf32>
    %262 = arith.addf %261, %5 : vector<48x48xf32>
    %cst_96 = arith.constant dense<0xFF800000> : vector<48xf32>
    %263 = vector.multi_reduction <maximumf>, %262, %cst_96 [1] : vector<48x48xf32> to vector<48xf32>
    %264 = vector.shape_cast %263 : vector<48xf32> to vector<48x1xf32>
    %265 = vector.broadcast %264 : vector<48x1xf32> to vector<48x48xf32>
    %266 = arith.subf %262, %265 : vector<48x48xf32>
    %267 = math.exp %266 : vector<48x48xf32>
    %cst_97 = arith.constant dense<0.000000e+00> : vector<48xf32>
    %268 = vector.multi_reduction <add>, %267, %cst_97 [1] : vector<48x48xf32> to vector<48xf32>
    %269 = vector.shape_cast %268 : vector<48xf32> to vector<48x1xf32>
    %270 = tpu.reciprocal %269 {approx = true} : vector<48x1xf32> -> vector<48x1xf32>
    %271 = vector.broadcast %270 : vector<48x1xf32> to vector<48x48xf32>
    %272 = arith.mulf %267, %271 : vector<48x48xf32>
    %273 = vector.broadcast %258 : vector<1x32xf32> to vector<48x32xf32>
    %274 = arith.mulf %220, %273 : vector<48x32xf32>
    %cst_98 = arith.constant dense<0.000000e+00> : vector<48x32xf32>
    %275 = tpu.matmul %272, %274, %cst_98 {dimension_numbers = #tpu.dot_dimension_numbers<[1], [0], [0], [1], [0, 0, 1, 1], [], []>} : vector<48x48xf32>, vector<48x32xf32>, vector<48x32xf32> -> vector<48x32xf32>
    %276 = arith.addf %257, %275 : vector<48x32xf32>
    %277 = vector.extract_strided_slice %6 {offsets = [3, 0], sizes = [1, 32], strides = [1, 1]} : vector<4x32xf32> to vector<1x32xf32>
    %278 = vector.broadcast %277 : vector<1x32xf32> to vector<48x32xf32>
    %279 = arith.mulf %210, %278 : vector<48x32xf32>
    %cst_99 = arith.constant dense<0.000000e+00> : vector<48x48xf32>
    %280 = tpu.matmul %279, %215, %cst_99 {dimension_numbers = #tpu.dot_dimension_numbers<[1], [1], [0], [0], [0, 0, 1, 0], [], []>} : vector<48x32xf32>, vector<48x32xf32>, vector<48x48xf32> -> vector<48x48xf32>
    %281 = arith.addf %280, %5 : vector<48x48xf32>
    %cst_100 = arith.constant dense<0xFF800000> : vector<48xf32>
    %282 = vector.multi_reduction <maximumf>, %281, %cst_100 [1] : vector<48x48xf32> to vector<48xf32>
    %283 = vector.shape_cast %282 : vector<48xf32> to vector<48x1xf32>
    %284 = vector.broadcast %283 : vector<48x1xf32> to vector<48x48xf32>
    %285 = arith.subf %281, %284 : vector<48x48xf32>
    %286 = math.exp %285 : vector<48x48xf32>
    %cst_101 = arith.constant dense<0.000000e+00> : vector<48xf32>
    %287 = vector.multi_reduction <add>, %286, %cst_101 [1] : vector<48x48xf32> to vector<48xf32>
    %288 = vector.shape_cast %287 : vector<48xf32> to vector<48x1xf32>
    %289 = tpu.reciprocal %288 {approx = true} : vector<48x1xf32> -> vector<48x1xf32>
    %290 = vector.broadcast %289 : vector<48x1xf32> to vector<48x48xf32>
    %291 = arith.mulf %286, %290 : vector<48x48xf32>
    %292 = vector.broadcast %277 : vector<1x32xf32> to vector<48x32xf32>
    %293 = arith.mulf %220, %292 : vector<48x32xf32>
    %cst_102 = arith.constant dense<0.000000e+00> : vector<48x32xf32>
    %294 = tpu.matmul %291, %293, %cst_102 {dimension_numbers = #tpu.dot_dimension_numbers<[1], [0], [0], [1], [0, 0, 1, 1], [], []>} : vector<48x48xf32>, vector<48x32xf32>, vector<48x32xf32> -> vector<48x32xf32>
    %295 = arith.addf %276, %294 : vector<48x32xf32>
    %c1_103 = arith.constant 1 : index
    %c0_104 = arith.constant 0 : index
    %c0_105 = arith.constant 0 : index
    %296 = vector.load %arg6[%c1_103, %c0_104, %c0_105] : memref<2x32x32xf32, #tpu.memory_space<vmem>>, vector<1x32x32xf32>
    %297 = vector.shape_cast %296 : vector<1x32x32xf32> to vector<32x32xf32>
    %cst_106 = arith.constant dense<0.000000e+00> : vector<48x32xf32>
    %298 = tpu.matmul %295, %297, %cst_106 {dimension_numbers = #tpu.dot_dimension_numbers<[1], [0], [0], [1], [0, 0, 1, 1], [], []>} : vector<48x32xf32>, vector<32x32xf32>, vector<48x32xf32> -> vector<48x32xf32>
    %299 = arith.addf %174, %298 : vector<48x32xf32>
    %300 = vector.broadcast %182 : vector<1x32xf32> to vector<48x32xf32>
    %301 = arith.addf %299, %300 : vector<48x32xf32>
    %cst_107 = arith.constant dense<0.000000e+00> : vector<48xf32>
    %302 = vector.multi_reduction <add>, %301, %cst_107 [1] : vector<48x32xf32> to vector<48xf32>
    %303 = vector.shape_cast %302 : vector<48xf32> to vector<48x1xf32>
    %cst_108 = arith.constant 3.200000e+01 : f32
    %304 = vector.broadcast %cst_108 : f32 to vector<48x1xf32>
    %305 = arith.divf %303, %304 : vector<48x1xf32>
    %306 = vector.broadcast %305 : vector<48x1xf32> to vector<48x32xf32>
    %307 = arith.subf %301, %306 : vector<48x32xf32>
    %308 = arith.mulf %307, %307 : vector<48x32xf32>
    %cst_109 = arith.constant dense<0.000000e+00> : vector<48xf32>
    %309 = vector.multi_reduction <add>, %308, %cst_109 [1] : vector<48x32xf32> to vector<48xf32>
    %310 = vector.shape_cast %309 : vector<48xf32> to vector<48x1xf32>
    %cst_110 = arith.constant 3.200000e+01 : f32
    %311 = vector.broadcast %cst_110 : f32 to vector<48x1xf32>
    %312 = arith.divf %310, %311 : vector<48x1xf32>
    %cst_111 = arith.constant 9.99999997E-7 : f32
    %313 = vector.broadcast %cst_111 : f32 to vector<48x1xf32>
    %314 = arith.addf %312, %313 : vector<48x1xf32>
    %315 = math.rsqrt %314 : vector<48x1xf32>
    %316 = vector.broadcast %315 : vector<48x1xf32> to vector<48x32xf32>
    %317 = arith.mulf %307, %316 : vector<48x32xf32>
    %318 = vector.broadcast %183 : vector<1x32xf32> to vector<48x32xf32>
    %319 = arith.mulf %317, %318 : vector<48x32xf32>
    %320 = vector.broadcast %184 : vector<1x32xf32> to vector<48x32xf32>
    %321 = arith.addf %319, %320 : vector<48x32xf32>
    %c1_112 = arith.constant 1 : index
    %c0_113 = arith.constant 0 : index
    %c0_114 = arith.constant 0 : index
    %322 = vector.load %arg7[%c1_112, %c0_113, %c0_114] : memref<2x32x128xf32, #tpu.memory_space<vmem>>, vector<1x32x128xf32>
    %323 = vector.shape_cast %322 : vector<1x32x128xf32> to vector<32x128xf32>
    %cst_115 = arith.constant dense<0.000000e+00> : vector<48x128xf32>
    %324 = tpu.matmul %321, %323, %cst_115 {dimension_numbers = #tpu.dot_dimension_numbers<[1], [0], [0], [1], [0, 0, 1, 1], [], []>} : vector<48x32xf32>, vector<32x128xf32>, vector<48x128xf32> -> vector<48x128xf32>
    %c1_116 = arith.constant 1 : index
    %c0_117 = arith.constant 0 : index
    %c0_118 = arith.constant 0 : index
    %325 = vector.load %arg8[%c1_116, %c0_117, %c0_118] : memref<2x1x128xf32, #tpu.memory_space<vmem>>, vector<1x1x128xf32>
    %326 = vector.shape_cast %325 : vector<1x1x128xf32> to vector<1x128xf32>
    %327 = vector.broadcast %326 : vector<1x128xf32> to vector<48x128xf32>
    %328 = arith.addf %324, %327 : vector<48x128xf32>
    %cst_119 = arith.constant 5.000000e-01 : f32
    %329 = vector.broadcast %cst_119 : f32 to vector<48x128xf32>
    %330 = arith.mulf %329, %328 : vector<48x128xf32>
    %cst_120 = arith.constant 0.707106769 : f32
    %331 = vector.broadcast %cst_120 : f32 to vector<48x128xf32>
    %332 = arith.mulf %328, %331 : vector<48x128xf32>
    %333 = math.erf %332 : vector<48x128xf32>
    %cst_121 = arith.constant 1.000000e+00 : f32
    %334 = vector.broadcast %cst_121 : f32 to vector<48x128xf32>
    %335 = arith.addf %334, %333 : vector<48x128xf32>
    %336 = arith.mulf %330, %335 : vector<48x128xf32>
    %c1_122 = arith.constant 1 : index
    %c0_123 = arith.constant 0 : index
    %c0_124 = arith.constant 0 : index
    %337 = vector.load %arg9[%c1_122, %c0_123, %c0_124] : memref<2x128x32xf32, #tpu.memory_space<vmem>>, vector<1x128x32xf32>
    %338 = vector.shape_cast %337 : vector<1x128x32xf32> to vector<128x32xf32>
    %cst_125 = arith.constant dense<0.000000e+00> : vector<48x32xf32>
    %339 = tpu.matmul %336, %338, %cst_125 {dimension_numbers = #tpu.dot_dimension_numbers<[1], [0], [0], [1], [0, 0, 1, 1], [], []>} : vector<48x128xf32>, vector<128x32xf32>, vector<48x32xf32> -> vector<48x32xf32>
    %340 = arith.addf %301, %339 : vector<48x32xf32>
    %341 = vector.broadcast %185 : vector<1x32xf32> to vector<48x32xf32>
    %342 = arith.addf %340, %341 : vector<48x32xf32>
    %c0_126 = arith.constant 0 : index
    %c0_127 = arith.constant 0 : index
    %343 = vector.load %arg13[%c0_126, %c0_127] : memref<2x32xf32, #tpu.memory_space<vmem>>, vector<2x32xf32>
    %344 = vector.extract_strided_slice %343 {offsets = [0, 0], sizes = [1, 32], strides = [1, 1]} : vector<2x32xf32> to vector<1x32xf32>
    %345 = vector.extract_strided_slice %343 {offsets = [1, 0], sizes = [1, 32], strides = [1, 1]} : vector<2x32xf32> to vector<1x32xf32>
    %cst_128 = arith.constant dense<0.000000e+00> : vector<48xf32>
    %346 = vector.multi_reduction <add>, %342, %cst_128 [1] : vector<48x32xf32> to vector<48xf32>
    %347 = vector.shape_cast %346 : vector<48xf32> to vector<48x1xf32>
    %cst_129 = arith.constant 3.200000e+01 : f32
    %348 = vector.broadcast %cst_129 : f32 to vector<48x1xf32>
    %349 = arith.divf %347, %348 : vector<48x1xf32>
    %350 = vector.broadcast %349 : vector<48x1xf32> to vector<48x32xf32>
    %351 = arith.subf %342, %350 : vector<48x32xf32>
    %352 = arith.mulf %351, %351 : vector<48x32xf32>
    %cst_130 = arith.constant dense<0.000000e+00> : vector<48xf32>
    %353 = vector.multi_reduction <add>, %352, %cst_130 [1] : vector<48x32xf32> to vector<48xf32>
    %354 = vector.shape_cast %353 : vector<48xf32> to vector<48x1xf32>
    %cst_131 = arith.constant 3.200000e+01 : f32
    %355 = vector.broadcast %cst_131 : f32 to vector<48x1xf32>
    %356 = arith.divf %354, %355 : vector<48x1xf32>
    %cst_132 = arith.constant 9.99999997E-7 : f32
    %357 = vector.broadcast %cst_132 : f32 to vector<48x1xf32>
    %358 = arith.addf %356, %357 : vector<48x1xf32>
    %359 = math.rsqrt %358 : vector<48x1xf32>
    %360 = vector.broadcast %359 : vector<48x1xf32> to vector<48x32xf32>
    %361 = arith.mulf %351, %360 : vector<48x32xf32>
    %362 = vector.broadcast %344 : vector<1x32xf32> to vector<48x32xf32>
    %363 = arith.mulf %361, %362 : vector<48x32xf32>
    %364 = vector.broadcast %345 : vector<1x32xf32> to vector<48x32xf32>
    %365 = arith.addf %363, %364 : vector<48x32xf32>
    %c0_133 = arith.constant 0 : index
    %c0_134 = arith.constant 0 : index
    %366 = vector.load %arg14[%c0_133, %c0_134] : memref<1x32xf32, #tpu.memory_space<vmem>>, vector<1x32xf32>
    %cst_135 = arith.constant dense<0.000000e+00> : vector<1x48xf32>
    %367 = tpu.matmul %366, %365, %cst_135 {dimension_numbers = #tpu.dot_dimension_numbers<[1], [1], [0], [0], [0, 0, 1, 0], [], []>} : vector<1x32xf32>, vector<48x32xf32>, vector<1x48xf32> -> vector<1x48xf32>
    %c0_136 = arith.constant 0 : index
    %c0_137 = arith.constant 0 : index
    %368 = vector.load %arg15[%c0_136, %c0_137] : memref<2x48xf32, #tpu.memory_space<vmem>>, vector<2x48xf32>
    %369 = vector.broadcast %367 : vector<1x48xf32> to vector<2x48xf32>
    %370 = arith.mulf %368, %369 : vector<2x48xf32>
    %c0_138 = arith.constant 0 : index
    %c0_139 = arith.constant 0 : index
    %371 = vector.load %arg16[%c0_138, %c0_139] : memref<48x256xf32, #tpu.memory_space<vmem>>, vector<48x256xf32>
    %cst_140 = arith.constant dense<0.000000e+00> : vector<2x256xf32>
    %372 = tpu.matmul %370, %371, %cst_140 {dimension_numbers = #tpu.dot_dimension_numbers<[1], [0], [0], [1], [0, 0, 1, 1], [], []>} : vector<2x48xf32>, vector<48x256xf32>, vector<2x256xf32> -> vector<2x256xf32>
    %c0_141 = arith.constant 0 : index
    %c0_142 = arith.constant 0 : index
    %373 = vector.load %arg17[%c0_141, %c0_142] : memref<2x1xf32, #tpu.memory_space<vmem>>, vector<2x1xf32>
    %374 = vector.broadcast %373 : vector<2x1xf32> to vector<2x256xf32>
    %375 = arith.addf %372, %374 : vector<2x256xf32>
    %376 = arith.negf %375 : vector<2x256xf32>
    %377 = math.exp %376 : vector<2x256xf32>
    %cst_143 = arith.constant 1.000000e+00 : f32
    %378 = vector.broadcast %cst_143 : f32 to vector<2x256xf32>
    %379 = arith.addf %378, %377 : vector<2x256xf32>
    %380 = arith.divf %378, %379 : vector<2x256xf32>
    %c0_144 = arith.constant 0 : index
    %c0_145 = arith.constant 0 : index
    %381 = vector.load %arg18[%c0_144, %c0_145] : memref<2x256xf32, #tpu.memory_space<vmem>>, vector<2x256xf32>
    tpu.vector_store %arg18[%c0_144, %c0_145], %380 {strides = array<i32>} : memref<2x256xf32, #tpu.memory_space<vmem>>, vector<2x256xf32>,
    return
  }
}

</mosaic_0001>

<bundles_post_ra>
// kernel: forward.1
= control target key start
LH: loop header
LB: loop body
LE: loop exit
PB: predicated region body
PF: predicated region fallthrough
CT: control target
= control target key end

     0   :  { %vm77_vm0 = vcmask 392192   ;;  %vm200_vm1 = vcmask 261120   ;;  %vm6908_vm3 = vmmov 0   ;;  %s8943_s2 = inlined_call_operand.vmem [shape: f32[48,32], index: 2, kind: input, shape index: {}]   ;;  %s8944_s0 = inlined_call_operand.vmem [shape: f32[48,48], index: 0, kind: input, shape index: {}]   ;;  %s8945_s1 = inlined_call_operand.vmem [shape: f32[48,32], index: 1, kind: input, shape index: {}]   ;;  %s8946_s3 = inlined_call_operand.vmem [shape: f32[2,32,32], index: 3, kind: input, shape index: {}]   ;;  %s8947_s5 = inlined_call_operand.vmem [shape: f32[2,32,32], index: 5, kind: input, shape index: {}]   ;;  %s8948_s4 = inlined_call_operand.vmem [shape: f32[2,32,32], index: 4, kind: input, shape index: {}]   ;;  %s8949_s10 = inlined_call_operand.vmem [shape: f32[2,9,32], index: 10, kind: input, shape index: {}]   ;;  %s8950_s11 = inlined_call_operand.vmem [shape: f32[4,32], index: 11, kind: input, shape index: {}]   ;;  %s8951_s12 = inlined_call_operand.vmem [shape: f32[48,48], index: 12, kind: input, shape index: {}]   ;;  %s8952_s6 = inlined_call_operand.vmem [shape: f32[2,32,32], index: 6, kind: input, shape index: {}]   ;;  %s8953_s7 = inlined_call_operand.vmem [shape: f32[2,32,128], index: 7, kind: input, shape index: {}]   ;;  %s8954_s9 = inlined_call_operand.vmem [shape: f32[2,128,32], index: 9, kind: input, shape index: {}]   ;;  %s8955_s8 = inlined_call_operand.vmem [shape: f32[2,1,128], index: 8, kind: input, shape index: {}]   ;;  %s8956_s13 = inlined_call_operand.vmem [shape: f32[2,32], index: 13, kind: input, shape index: {}]   ;;  %s8957_s16 = inlined_call_operand.vmem [shape: f32[48,256], index: 16, kind: input, shape index: {}]   ;;  %s8958_s14 = inlined_call_operand.vmem [shape: f32[1,32], index: 14, kind: input, shape index: {}]   ;;  %s8959_s17 = inlined_call_operand.vmem [shape: f32[2,1], index: 17, kind: input, shape index: {}]   ;;  %s8960_s15 = inlined_call_operand.vmem [shape: f32[2,48], index: 15, kind: input, shape index: {}]   ;;  %s8961_s18 = inlined_call_operand.vmem [shape: f32[2,256], index: 18, kind: output, shape index: {}]  }
   0x1   :  { %8965 = sst [smem:[#allocation2_spill]] %s8943_s2  ;;  %vm7276_vm2 = vmpackc.low %vm200_vm1, %vm200_vm1 }
   0x2   :  { %8966 = sst [smem:[#allocation3_spill]] %s8944_s0  ;;  %s8968_s29 = sld [smem:[#allocation2_spill]] }
   0x3   :  { %8967 = sst [smem:[#allocation4_spill]] %s8945_s1  ;;  %s8969_s27 = sld [smem:[#allocation3_spill]] }
   0x4   :  { %s8970_s25 = sld [smem:[#allocation4_spill]] }
   0x8   :  { %v65_v0 = vld [vmem:[%s8968_s29] sm:$0xff]  ;;  %v66_v1 = vld [vmem:[%s8968_s29 + $0x8] sm:$0xff]  ;;  %v67_v2 = vld [vmem:[%s8968_s29 + $0x10] sm:$0xff] }
   0x9   :  { %v6154_v3 = vpack.c.bf16 %v66_v1, %v65_v0  ;;  %v68_v4 = vld [vmem:[%s8968_s29 + $0x18] sm:$0xff]  ;;  %v69_v6 = vld [vmem:[%s8968_s29 + $0x20] sm:$0xff]  ;;  %v70_v7 = vld [vmem:[%s8968_s29 + $0x28] sm:$0xff] }
   0xa   :  { %v6158_v5 = vpack.c.bf16 %v68_v4, %v67_v2  ;;  %v59_v8 = vld [vmem:[%s8969_s27] sm:$0xff]  ;;  %v6162_v9 = vpack.c.bf16 %v70_v7, %v69_v6  ;;  %v60_v10 = vld [vmem:[%s8969_s27 + $0x8] sm:$0xff]  ;;  %v61_v11 = vld [vmem:[%s8969_s27 + $0x10] sm:$0xff] }
   0xb   :  { %6155 = vmatprep.subr.bf16.mxu0 %v6154_v3  ;;  %5542 = vmatprep.mubr.msk.f32.mxu0 %vm77_vm0, %v59_v8  ;;  %v62_v12 = vld [vmem:[%s8969_s27 + $0x18] sm:$0xff]  ;;  %v63_v13 = vld [vmem:[%s8969_s27 + $0x20] sm:$0xff]  ;;  %v64_v14 = vld [vmem:[%s8969_s27 + $0x28] sm:$0xff] }
   0xc   :  { %6157 = vmatpush3.bf16.msra.mxu0 %v6154_v3  ;;  %v71_v15 = vld [vmem:[%s8970_s25] sm:$0xff]  ;;  %v72_v17 = vld [vmem:[%s8970_s25 + $0x8] sm:$0xff]  ;;  %v73_v20 = vld [vmem:[%s8970_s25 + $0x10] sm:$0xff] }
   0xd   :  { %6159 = vmatprep.subr.bf16.mxu0 %v6158_v5  ;;  %v74_v24 = vld [vmem:[%s8970_s25 + $0x18] sm:$0xff]  ;;  %v75_v27 = vld [vmem:[%s8970_s25 + $0x20] sm:$0xff]  ;;  %v76_v32 = vld [vmem:[%s8970_s25 + $0x28] sm:$0xff] }
   0xe   :  { %v301_v6 = vld [vmem:[%s8946_s3 + $0x8] sm:$0xff]  ;;  %v524_v7 = vld [vmem:[%s8947_s5] sm:$0xff] }
  0x10   :  { %6161 = vmatpush3.bf16.msra.mxu0 %v6158_v5  ;;  %v300_v5 = vld [vmem:[%s8946_s3] sm:$0xff] }
  0x11   :  { %6163 = vmatprep.subr.bf16.mxu0 %v6162_v9  ;;  %v6166_v8 = vpack.c.bf16 %v301_v6, %v300_v5 }
  0x13   :  { %6167 = vmatprep.subr.bf16.mxu1 %v6166_v8 }
  0x14   :  { %6165 = vmatpush3.bf16.msra.mxu0 %v6162_v9  ;;  %v525_v9 = vld [vmem:[%s8947_s5 + $0x8] sm:$0xff]  ;;  %6169 = vmatpush3.bf16.msra.mxu1 %v6166_v8 }
  0x17   :  { %5543 = vmatmul.mubr.msk.f32.vlgmr.msra.gmra.mrb[0].mxu0 %vm77_vm0, %v60_v10  ;;  %v302_v10 = vld [vmem:[%s8946_s3 + $0x10] sm:$0xff] }
  0x18   :  { %5545 = vmatprep.mubr.msk.f32.mxu0 %vm77_vm0, %v61_v11  ;;  %v303_v11 = vld [vmem:[%s8946_s3 + $0x18] sm:$0xff] }
  0x1b   :  { %5546 = vmatmul.mubr.msk.f32.gmra.mrb[2].mxu0 %vm77_vm0, %v62_v12  ;;  %v6182_v12 = vpack.c.bf16 %v525_v9, %v524_v7 }
  0x1c   :  { %5548 = vmatprep.mubr.msk.f32.mxu0 %vm77_vm0, %v63_v13  ;;  %v6170_v13 = vpack.c.bf16 %v303_v11, %v302_v10 }
  0x1d   :  { %6183 = vmatprep.subr.bf16.mxu0 %v6182_v12 }
  0x1e   :  { %6185 = vmatpush3.bf16.msra.mxu0 %v6182_v12  ;;  %6171 = vmatprep.subr.bf16.mxu1 %v6170_v13 }
  0x1f   :  { %5549 = vmatmul.mubr.msk.f32.gmra.mrb[4].mxu0 %vm77_vm0, %v64_v14  ;;  %v526_v14 = vld [vmem:[%s8947_s5 + $0x10] sm:$0xff]  ;;  %6173 = vmatpush3.bf16.msra.mxu1 %v6170_v13 }
  0xea   :  { %v5544_v16 = vpop.f32.mrb[0].mxu0 }
  0xeb   :  { %v162_v18 = vpop.f32.mrb[1].mxu0  ;;  %v7059_v21 = vadd.f32 %v5544_v16, %v72_v17  ;;  %v421_v17 = vld [vmem:[%s8948_s4] sm:$0xff] }
  0xec   :  { %v7054_v19 = vadd.f32 %v162_v18, %v71_v15  ;;  %v527_v15 = vld [vmem:[%s8947_s5 + $0x18] sm:$0xff]  ;;  %v422_v18 = vld [vmem:[%s8948_s4 + $0x8] sm:$0xff] }
  0xed   :  { %v204_v31 = vsel %vm200_vm1, %v7059_v21, 0.0  ;;  %v6186_v16 = vpack.c.bf16 %v527_v15, %v526_v14 }
  0xee   :  { %v5547_v22 = vpop.f32.mrb[2].mxu0  ;;  %v201_v23 = vsel %vm200_vm1, %v7054_v19, 0.0 }
  0xef   :  { %v172_v25 = vpop.f32.mrb[3].mxu0  ;;  %202 = vadd.xlane.f32.xlu0 %v201_v23  ;;  %v7071_v28 = vadd.f32 %v5547_v22, %v74_v24  ;;  %6187 = vmatprep.subr.bf16.mxu0 %v6186_v16  ;;  %v280_v24 = vlaneseq }
  0xf0   :  { %v7066_v26 = vadd.f32 %v172_v25, %v73_v20  ;;  %v6174_v20 = vpack.c.bf16 %v422_v18, %v421_v17  ;;  %6189 = vmatpush3.bf16.msra.mxu0 %v6186_v16  ;;  %v197_v16 = vld [vmem:[%s8950_s11] sm:$0xf] }
  0xf1   :  { %v210_v36 = vsel %vm200_vm1, %v7071_v28, 0.0 }
  0xf2   :  { %v5550_v29 = vpop.f32.mrb[4].mxu0  ;;  %v207_v30 = vsel %vm200_vm1, %v7066_v26, 0.0  ;;  %6175 = vmatprep.subr.bf16.mxu1 %v6174_v20 }
  0xf3   :  { %v182_v33 = vpop.f32.mrb[5].mxu0  ;;  %208 = vadd.xlane.f32.xlu1 %v207_v30  ;;  %205 = vadd.xlane.f32.xlu0 %v204_v31  ;;  %v7082_v35 = vadd.f32 %v5550_v29, %v76_v32  ;;  %v7156_v32 = vshrl.u32 %v280_v24, 7 }
  0xf4   :  { %v7080_v34 = vadd.f32 %v182_v33, %v75_v27 }
  0xf5   :  { %v216_v38 = vsel %vm200_vm1, %v7082_v35, 0.0  ;;  %v7205_v15 = vsub.s32 2, %v7156_v32 }
  0xf6   :  { %v213_v37 = vsel %vm200_vm1, %v7080_v34, 0.0 }
  0xf7   :  { %211 = vadd.xlane.f32.xlu1 %v210_v36  ;;  %214 = vadd.xlane.f32.xlu0 %v213_v37 }
  0xfb   :  { %217 = vadd.xlane.f32.xlu1 %v216_v38 }
 0x17c   :  { %v203_v39 = vpop.xlane.xlu0 %202 }
 0x17d   :  { %v220_v40 = vmul.f32 0.03125, %v203_v39 }
 0x17f   :  { %v7091_v41 = vsub.f32 %v7054_v19, %v220_v40 }
 0x180   :  { %v209_v42 = vpop.xlane.xlu1 %208  ;;  %v206_v43 = vpop.xlane.xlu0 %205 }
 0x181   :  { %v222_v44 = vmul.f32 0.03125, %v209_v42  ;;  %v221_v45 = vmul.f32 0.03125, %v206_v43  ;;  %v232_v46 = vmul.f32 %v7091_v41, %v7091_v41  ;;  %v7159_v42 = vsub.s32 0, %v7156_v32 }
 0x183   :  { %v7096_v47 = vsub.f32 %v7066_v26, %v222_v44  ;;  %v7099_v48 = vsub.f32 %v7059_v21, %v221_v45  ;;  %v238_v49 = vsel %vm200_vm1, %v232_v46, 0.0  ;;  %v7164_v45 = vld [vmem:[%s8949_s10] sm:$0xff] }
 0x184   :  { %v212_v50 = vpop.xlane.xlu1 %211  ;;  %239 = vadd.xlane.f32.xlu0 %v238_v49  ;;  %v215_v51 = vpop.xlane.xlu0 %214  ;;  %v7167_v49 = vsub.s32 1, %v7156_v32  ;;  %v7215_v18 = vrot.slane %v7164_v45, %v7205_v15 }
 0x185   :  { %v223_v52 = vmul.f32 0.03125, %v212_v50  ;;  %v224_v53 = vmul.f32 0.03125, %v215_v51  ;;  %v234_v54 = vmul.f32 %v7096_v47, %v7096_v47  ;;  %v233_v55 = vmul.f32 %v7099_v48, %v7099_v48 }
 0x186   :  { %v283_v51 = vrot.slane %v7164_v45, %v7159_v42 }
 0x187   :  { %v7107_v56 = vsub.f32 %v7071_v28, %v223_v52  ;;  %v7110_v57 = vsub.f32 %v7080_v34, %v224_v53  ;;  %v244_v58 = vsel %vm200_vm1, %v234_v54, 0.0  ;;  %v241_v59 = vsel %vm200_vm1, %v233_v55, 0.0 }
 0x188   :  { %v218_v60 = vpop.xlane.xlu1 %217  ;;  %245 = vadd.xlane.f32.xlu0 %v244_v58  ;;  %242 = vadd.xlane.f32.xlu1 %v241_v59  ;;  %v293_v55 = vrot.slane %v7164_v45, %v7167_v49 }
 0x189   :  { %v225_v61 = vmul.f32 0.03125, %v218_v60  ;;  %v235_v62 = vmul.f32 %v7107_v56, %v7107_v56  ;;  %v236_v63 = vmul.f32 %v7110_v57, %v7110_v57 }
 0x18b   :  { %v7119_v0 = vsub.f32 %v7082_v35, %v225_v61  ;;  %v247_v1 = vsel %vm200_vm1, %v235_v62, 0.0  ;;  %v250_v2 = vsel %vm200_vm1, %v236_v63, 0.0 }
 0x18c   :  { %248 = vadd.xlane.f32.xlu1 %v247_v1  ;;  %251 = vadd.xlane.f32.xlu0 %v250_v2  ;;  %v423_v1 = vld [vmem:[%s8948_s4 + $0x10] sm:$0xff] }
 0x18d   :  { %v237_v3 = vmul.f32 %v7119_v0, %v7119_v0 }
 0x18f   :  { %v253_v4 = vsel %vm200_vm1, %v237_v3, 0.0 }
 0x190   :  { %254 = vadd.xlane.f32.xlu1 %v253_v4 }
 0x211   :  { %v240_v22 = vpop.xlane.xlu0 %239 }
 0x212   :  { %v256_v23 = vmul.f32 0.03125, %v240_v22  ;;  %v7220_v22 = vrot.slane %v197_v16, %v7159_v42 }
 0x214   :  { %v262_v25 = vadd.f32 1e-06, %v256_v23  ;;  %v7223_v23 = vrot.slane %v197_v16, %v7167_v49 }
 0x215   :  { %v243_v27 = vpop.xlane.xlu1 %242  ;;  %v246_v29 = vpop.xlane.xlu0 %245 }
 0x216   :  { %6615 = vrsqrt.f32 %v262_v25  ;;  %v257_v30 = vmul.f32 0.03125, %v243_v27  ;;  %v258_v31 = vmul.f32 0.03125, %v246_v29 }
 0x218   :  { %v263_v33 = vadd.f32 1e-06, %v257_v30  ;;  %v264_v36 = vadd.f32 1e-06, %v258_v31 }
 0x219   :  { %v249_v37 = vpop.xlane.xlu1 %248  ;;  %v252_v38 = vpop.xlane.xlu0 %251 }
 0x21a   :  { %6617 = vrsqrt.f32 %v263_v33  ;;  %v259_v39 = vmul.f32 0.03125, %v249_v37  ;;  %v260_v40 = vmul.f32 0.03125, %v252_v38 }
 0x21b   :  { %6619 = vrsqrt.f32 %v264_v36 }
 0x21c   :  { %v265_v43 = vadd.f32 1e-06, %v259_v39  ;;  %v266_v44 = vadd.f32 1e-06, %v260_v40 }
 0x21d   :  { %v255_v46 = vpop.xlane.xlu1 %254 }
 0x21e   :  { %6621 = vrsqrt.f32 %v265_v43  ;;  %v261_v50 = vmul.f32 0.03125, %v255_v46 }
 0x21f   :  { %6623 = vrsqrt.f32 %v266_v44 }
 0x220   :  { %v6616_v52 = vpop.eup %6615  ;;  %v267_v53 = vadd.f32 1e-06, %v261_v50 }
 0x221   :  { %v274_v54 = vmul.f32 %v6616_v52, %v7091_v41  ;;  %v424_v41 = vld [vmem:[%s8948_s4 + $0x18] sm:$0xff] }
 0x222   :  { %6625 = vrsqrt.f32 %v267_v53  ;;  %v7247_v53 = vsub.s32 3, %v7156_v32 }
 0x223   :  { %v284_v58 = vmul.f32 %v283_v51, %v274_v54 }
 0x224   :  { %v6618_v59 = vpop.eup %6617 }
 0x225   :  { %v6620_v60 = vpop.eup %6619  ;;  %v294_v61 = vadd.f32 %v293_v55, %v284_v58  ;;  %v275_v62 = vmul.f32 %v6618_v59, %v7099_v48 }
 0x226   :  { %v276_v63 = vmul.f32 %v6620_v60, %v7096_v47  ;;  %v6178_v47 = vpack.c.bf16 %v424_v41, %v423_v1  ;;  %v428_v1 = vrot.slane %v7164_v45, %v7247_v53 }
 0x227   :  { %5559 = vmatprep.mubr.msk.f32.mxu1 %vm200_vm1, %v294_v61  ;;  %5593 = vmatprep.mubr.msk.f32.mxu0 %vm200_vm1, %v294_v61  ;;  %v285_v2 = vmul.f32 %v283_v51, %v275_v62 }
 0x228   :  { %v6622_v3 = vpop.eup %6621  ;;  %v286_v4 = vmul.f32 %v283_v51, %v276_v63 }
 0x229   :  { %v6624_v5 = vpop.eup %6623  ;;  %v295_v6 = vadd.f32 %v293_v55, %v285_v2  ;;  %v277_v48 = vmul.f32 %v6622_v3, %v7107_v56 }
 0x22a   :  { %v296_v7 = vadd.f32 %v293_v55, %v286_v4  ;;  %v278_v8 = vmul.f32 %v6624_v5, %v7110_v57  ;;  %v7264_v4 = vrot.slane %v197_v16, %v7205_v15 }
 0x22b   :  { %5560 = vmatmul.mubr.msk.f32.vlgmr.msra.gmra.mrb[0].mxu1 %vm200_vm1, %v295_v6  ;;  %5594 = vmatmul.mubr.msk.f32.vlgmr.msra.gmra.mrb[6].mxu0 %vm200_vm1, %v295_v6  ;;  %v287_v9 = vmul.f32 %v283_v51, %v277_v48 }
 0x22c   :  { %v6626_v10 = vpop.eup %6625  ;;  %6177 = vmatpush3.bf16.msra.mxu1 %v6174_v20  ;;  %5562 = vmatprep.mubr.msk.f32.mxu1 %vm200_vm1, %v296_v7  ;;  %v288_v11 = vmul.f32 %v283_v51, %v278_v8  ;;  %v7269_v8 = vrot.slane %v197_v16, %v7247_v53 }
 0x22d   :  { %5596 = vmatprep.mubr.msk.f32.mxu0 %vm200_vm1, %v296_v7  ;;  %v297_v12 = vadd.f32 %v293_v55, %v287_v9  ;;  %6179 = vmatprep.subr.bf16.mxu1 %v6178_v47  ;;  %v279_v56 = vmul.f32 %v6626_v10, %v7119_v0  ;;  %v530_v0 = vsub.s32 4, %v7156_v32 }
 0x22e   :  { %v298_v13 = vadd.f32 %v293_v55, %v288_v11  ;;  %v4693_v11 = vld [vmem:[%s8958_s14] sm:$0x1] }
 0x22f   :  { %5563 = vmatmul.mubr.msk.f32.gmra.mrb[2].mxu1 %vm200_vm1, %v297_v12  ;;  %5597 = vmatmul.mubr.msk.f32.gmra.mrb[8].mxu0 %vm200_vm1, %v297_v12  ;;  %v289_v57 = vmul.f32 %v283_v51, %v279_v56  ;;  %v531_v17 = vrot.slane %v7164_v45, %v530_v0 }
 0x230   :  { %5565 = vmatprep.mubr.msk.f32.mxu1 %vm200_vm1, %v298_v13  ;;  %5599 = vmatprep.mubr.msk.f32.mxu0 %vm200_vm1, %v298_v13 }
 0x231   :  { %6181 = vmatpush3.bf16.msra.mxu1 %v6178_v47  ;;  %v299_v14 = vadd.f32 %v293_v55, %v289_v57 }
 0x233   :  { %5566 = vmatmul.mubr.msk.f32.gmra.mrb[4].mxu1 %vm200_vm1, %v299_v14  ;;  %5600 = vmatmul.mubr.msk.f32.gmra.mrb[10].mxu0 %vm200_vm1, %v299_v14 }
 0x234   :  { %5576 = vmatprep.mubr.msk.f32.mxu1 %vm200_vm1, %v294_v61 }
 0x237   :  { %5577 = vmatmul.mubr.msk.f32.vlgmr.msra.gmra.mrb[6].mxu1 %vm200_vm1, %v295_v6 }
 0x238   :  { %5579 = vmatprep.mubr.msk.f32.mxu1 %vm200_vm1, %v296_v7 }
 0x23b   :  { %5580 = vmatmul.mubr.msk.f32.gmra.mrb[8].mxu1 %vm200_vm1, %v297_v12 }
 0x23c   :  { %5582 = vmatprep.mubr.msk.f32.mxu1 %vm200_vm1, %v298_v13 }
 0x23f   :  { %5583 = vmatmul.mubr.msk.f32.gmra.mrb[10].mxu1 %vm200_vm1, %v299_v14 }
 0x2fe   :  { %v7217_v20 = vpop.f32.mrb[0].mxu1  ;;  %v5595_v24 = vpop.f32.mrb[6].mxu0 }
 0x2ff   :  { %v7225_v25 = vadd.f32 %v5595_v24, %v531_v17  ;;  %v392_v27 = vpop.f32.mrb[1].mxu1  ;;  %v598_v29 = vpop.f32.mrb[7].mxu0 }
 0x300   :  { %v7228_v30 = vadd.f32 %v392_v27, %v7215_v18  ;;  %v599_v31 = vadd.f32 %v598_v29, %v531_v17 }
 0x301   :  { %v1030_v40 = vmul.f32 %v7223_v23, %v7225_v25  ;;  %v835_v55 = vmul.f32 %v7220_v22, %v7225_v25 }
 0x302   :  { %v7230_v33 = vpop.f32.mrb[2].mxu1  ;;  %v5598_v36 = vpop.f32.mrb[8].mxu0  ;;  %v631_v37 = vmul.f32 %v7220_v22, %v7228_v30  ;;  %v844_v38 = vmul.f32 %v7223_v23, %v7228_v30  ;;  %v1029_v39 = vmul.f32 %v7223_v23, %v599_v31  ;;  %v834_v50 = vmul.f32 %v7220_v22, %v599_v31 }
 0x303   :  { %v614_v43 = vadd.f32 %v5598_v36, %v531_v17  ;;  %v7239_v44 = vpop.f32.mrb[3].mxu1  ;;  %v608_v46 = vpop.f32.mrb[9].mxu0  ;;  %v1450_v57 = vmul.f32 %v7264_v4, %v599_v31 }
 0x304   :  { %v609_v51 = vadd.f32 %v608_v46, %v531_v17  ;;  %5614 = vmatprep.mubr.msk.f32.mxu1 %vm200_vm1, %v631_v37  ;;  %5635 = vmatprep.mubr.msk.f32.mxu0 %vm200_vm1, %v844_v38  ;;  %v7244_v52 = vpack.c.bf16 %v1030_v40, %v1029_v39  ;;  %v7259_v41 = vpack.c.bf16 %v835_v55, %v834_v50 }
 0x305   :  { %v1032_v54 = vmul.f32 %v7223_v23, %v614_v43  ;;  %v837_v12 = vmul.f32 %v7220_v22, %v614_v43  ;;  %v1453_v27 = vmul.f32 %v7264_v4, %v614_v43  ;;  %v1764_v55 = vmul.f32 %v7269_v8, %v599_v31 }
 0x306   :  { %v7252_v58 = vpop.f32.mrb[4].mxu1  ;;  %v5601_v59 = vpop.f32.mrb[10].mxu0  ;;  %v1031_v60 = vmul.f32 %v7223_v23, %v609_v51  ;;  %v836_v10 = vmul.f32 %v7220_v22, %v609_v51  ;;  %v1452_v24 = vmul.f32 %v7264_v4, %v609_v51 }
 0x307   :  { %v624_v61 = vadd.f32 %v5601_v59, %v531_v17  ;;  %v7255_v62 = vpop.f32.mrb[5].mxu1  ;;  %v618_v63 = vpop.f32.mrb[11].mxu0  ;;  %v1765_v59 = vmul.f32 %v7269_v8, %v7225_v25 }
 0x308   :  { %v619_v2 = vadd.f32 %v618_v63, %v531_v17  ;;  %v7261_v3 = vpack.c.bf16 %v1032_v54, %v1031_v60  ;;  %v1451_v17 = vmul.f32 %v7264_v4, %v7225_v25  ;;  %v7290_v37 = vpack.c.bf16 %v837_v12, %v836_v10 }
 0x309   :  { %v1034_v5 = vmul.f32 %v7223_v23, %v624_v61  ;;  %v839_v13 = vmul.f32 %v7220_v22, %v624_v61  ;;  %v7303_v50 = vpack.c.bf16 %v1453_v27, %v1452_v24  ;;  %v1455_v54 = vmul.f32 %v7264_v4, %v624_v61 }
 0x30a   :  { %v5578_v6 = vpop.f32.mrb[6].mxu1  ;;  %v1033_v48 = vmul.f32 %v7223_v23, %v619_v2  ;;  %v838_v56 = vmul.f32 %v7220_v22, %v619_v2  ;;  %v1454_v39 = vmul.f32 %v7264_v4, %v619_v2  ;;  %v7301_v46 = vpack.c.bf16 %v1451_v17, %v1450_v57 }
 0x30b   :  { %v501_v47 = vadd.f32 %v5578_v6, %v428_v1  ;;  %v495_v7 = vpop.f32.mrb[7].mxu1  ;;  %v1767_v6 = vmul.f32 %v7269_v8, %v614_v43  ;;  %v7322_v10 = vpack.c.bf16 %v1765_v59, %v1764_v55  ;;  %v1769_v31 = vmul.f32 %v7269_v8, %v624_v61  ;;  %v7457_v59 = vld [vmem:[%s8951_s12 + $0x8] sm:$0xff] }
 0x30c   :  { %v496_v9 = vadd.f32 %v495_v7, %v428_v1  ;;  %v7271_v45 = vpack.c.bf16 %v1034_v5, %v1033_v48  ;;  %v7292_v38 = vpack.c.bf16 %v839_v13, %v838_v56  ;;  %v1766_v5 = vmul.f32 %v7269_v8, %v609_v51 }
 0x30d   :  { %v1768_v48 = vmul.f32 %v7269_v8, %v619_v2  ;;  %v398_v61 = vadd.f32 %v7217_v20, %v7215_v18  ;;  %v408_v13 = vadd.f32 %v7230_v33, %v7215_v18  ;;  %v413_v57 = vadd.f32 %v7255_v62, %v7215_v18 }
 0x30e   :  { %v7284_v14 = vpack.c.bf16 %v501_v47, %v496_v9  ;;  %v5581_v16 = vpop.f32.mrb[8].mxu1  ;;  %v7320_v9 = vpack.c.bf16 %v1455_v54, %v1454_v39  ;;  %v7331_v25 = vpack.c.bf16 %v1767_v6, %v1766_v5  ;;  %v1265_v24 = vmul.f32 %v7264_v4, %v7228_v30 }
 0x30f   :  { %v511_v29 = vadd.f32 %v5581_v16, %v428_v1  ;;  %v505_v36 = vpop.f32.mrb[9].mxu1  ;;  %v7333_v43 = vpack.c.bf16 %v1769_v31, %v1768_v48  ;;  %v632_v2 = vmul.f32 %v7220_v22, %v398_v61  ;;  %v845_v56 = vmul.f32 %v7223_v23, %v398_v61  ;;  %v7473_v31 = vld [vmem:[%s8951_s12 + $0x18] sm:$0xff] }
 0x310   :  { %v506_v40 = vadd.f32 %v505_v36, %v428_v1  ;;  %6192 = vmatprep.subr.msk.bf16.mxu1 %vm7276_vm2, %v7284_v14  ;;  %6210 = vmatprep.subr.msk.bf16.mxu0 %vm7276_vm2, %v7284_v14  ;;  %v634_v33 = vmul.f32 %v7220_v22, %v408_v13  ;;  %v847_v62 = vmul.f32 %v7223_v23, %v408_v13 }
 0x311   :  { %6195 = vmatpush3.bf16.xpose.msk.msra.mxu1 %vm7276_vm2, %v7284_v14  ;;  %6213 = vmatpush3.bf16.xpose.msk.msra.mxu0 %vm7276_vm2, %v7284_v14  ;;  %v635_v17 = vmul.f32 %v7220_v22, %v413_v57  ;;  %v1268_v27 = vmul.f32 %v7264_v4, %v408_v13  ;;  %v1579_v39 = vmul.f32 %v7269_v8, %v7228_v30 }
 0x312   :  { %v7315_v60 = vpack.c.bf16 %v511_v29, %v506_v40  ;;  %v5584_v63 = vpop.f32.mrb[10].mxu1  ;;  %v1269_v29 = vmul.f32 %v7264_v4, %v413_v57  ;;  %v1582_v40 = vmul.f32 %v7269_v8, %v408_v13  ;;  %v1583_v54 = vmul.f32 %v7269_v8, %v413_v57 }
 0x313   :  { %v521_v47 = vadd.f32 %v5584_v63, %v428_v1  ;;  %v515_v7 = vpop.f32.mrb[11].mxu1 }
 0x314   :  { %v516_v12 = vadd.f32 %v515_v7, %v428_v1  ;;  %6198 = vmatprep.subr.msk.bf16.mxu1 %vm7276_vm2, %v7315_v60  ;;  %6216 = vmatprep.subr.msk.bf16.mxu0 %vm7276_vm2, %v7315_v60  ;;  %v403_v1 = vadd.f32 %v7239_v44, %v7215_v18  ;;  %v418_v44 = vadd.f32 %v7252_v58, %v7215_v18 }
 0x315   :  { %v848_v18 = vmul.f32 %v7223_v23, %v413_v57 }
 0x316   :  { %v7335_v51 = vpack.c.bf16 %v521_v47, %v516_v12  ;;  %v633_v20 = vmul.f32 %v7220_v22, %v403_v1  ;;  %v846_v16 = vmul.f32 %v7223_v23, %v403_v1  ;;  %v849_v58 = vmul.f32 %v7223_v23, %v418_v44 }
 0x317   :  { %v1270_v36 = vmul.f32 %v7264_v4, %v418_v44  ;;  %v1581_v30 = vmul.f32 %v7269_v8, %v403_v1  ;;  %v1584_v55 = vmul.f32 %v7269_v8, %v418_v44 }
 0x319   :  { %6201 = vmatpush3.bf16.xpose.msk.msra.mxu1 %vm7276_vm2, %v7315_v60  ;;  %6219 = vmatpush3.bf16.xpose.msk.msra.mxu0 %vm7276_vm2, %v7315_v60 }
 0x31a   :  { %6204 = vmatprep.subr.msk.bf16.mxu1 %vm7276_vm2, %v7335_v51  ;;  %6222 = vmatprep.subr.msk.bf16.mxu0 %vm7276_vm2, %v7335_v51 }
 0x321   :  { %6207 = vmatpush3.bf16.xpose.msk.msra.mxu1 %vm7276_vm2, %v7335_v51  ;;  %6225 = vmatpush3.bf16.xpose.msk.msra.mxu0 %vm7276_vm2, %v7335_v51 }
 0x322   :  { %6227 = vmatprep.subr.bf16.mxu1 %v7244_v52  ;;  %6252 = vmatprep.subr.msk.bf16.mxu0 %vm7276_vm2, %v7284_v14 }
 0x328   :  { %5615 = vmatmul.mubr.msk.f32.vlgmr.msra.gmra.mrb[12].mxu1 %vm200_vm1, %v632_v2  ;;  %5636 = vmatmul.mubr.msk.f32.vlgmr.msra.gmra.mrb[12].mxu0 %vm200_vm1, %v845_v56 }
 0x329   :  { %5617 = vmatprep.mubr.msk.f32.mxu1 %vm200_vm1, %v633_v20  ;;  %5638 = vmatprep.mubr.msk.f32.mxu0 %vm200_vm1, %v846_v16  ;;  %v7493_v16 = vld [vmem:[%s8951_s12 + $0x28] sm:$0xff] }
 0x32a   :  { %6229 = vmatpush3.bf16.msra.mxu1 %v7244_v52  ;;  %6255 = vmatpush3.bf16.xpose.msk.msra.mxu0 %vm7276_vm2, %v7284_v14  ;;  %v636_v52 = vmul.f32 %v7220_v22, %v418_v44 }
 0x32b   :  { %6231 = vmatprep.subr.bf16.mxu1 %v7261_v3  ;;  %6258 = vmatprep.subr.msk.bf16.mxu0 %vm7276_vm2, %v7315_v60 }
 0x32c   :  { %5618 = vmatmul.mubr.msk.f32.gmra.mrb[14].mxu1 %vm200_vm1, %v634_v33  ;;  %5639 = vmatmul.mubr.msk.f32.gmra.mrb[14].mxu0 %vm200_vm1, %v847_v62  ;;  %v7500_v33 = vld [vmem:[%s8951_s12 + $0x20] sm:$0xff] }
 0x32d   :  { %5620 = vmatprep.mubr.msk.f32.mxu1 %vm200_vm1, %v635_v17  ;;  %5641 = vmatprep.mubr.msk.f32.mxu0 %vm200_vm1, %v848_v18 }
 0x32e   :  { %6233 = vmatpush3.bf16.msra.mxu1 %v7261_v3  ;;  %v1266_v3 = vmul.f32 %v7264_v4, %v398_v61 }
 0x32f   :  { %6235 = vmatprep.subr.bf16.mxu1 %v7271_v45 }
 0x330   :  { %5621 = vmatmul.mubr.msk.f32.gmra.mrb[16].mxu1 %vm200_vm1, %v636_v52  ;;  %5642 = vmatmul.mubr.msk.f32.gmra.mrb[16].mxu0 %vm200_vm1, %v849_v58 }
 0x331   :  { %5698 = vmatprep.mubr.msk.f32.mxu0 %vm200_vm1, %v1265_v24 }
 0x332   :  { %6237 = vmatpush3.bf16.msra.mxu1 %v7271_v45  ;;  %6261 = vmatpush3.bf16.xpose.msk.msra.mxu0 %vm7276_vm2, %v7315_v60  ;;  %v1267_v45 = vmul.f32 %v7264_v4, %v403_v1 }
 0x333   :  { %6239 = vmatprep.subr.bf16.mxu1 %v7259_v41  ;;  %6264 = vmatprep.subr.msk.bf16.mxu0 %vm7276_vm2, %v7335_v51 }
 0x33a   :  { %6267 = vmatpush3.bf16.xpose.msk.msra.mxu0 %vm7276_vm2, %v7335_v51 }
 0x33b   :  { %6282 = vmatprep.subr.msk.bf16.mxu0 %vm7276_vm2, %v7284_v14 }
 0x341   :  { %5699 = vmatmul.mubr.msk.f32.vlgmr.msra.gmra.mrb[18].mxu0 %vm200_vm1, %v1266_v3 }
 0x342   :  { %5701 = vmatprep.mubr.msk.f32.mxu0 %vm200_vm1, %v1267_v45  ;;  %6285 = vmatpush3.bf16.xpose.msk.msra.mxu0 %vm7276_vm2, %v7284_v14  ;;  %v1580_v14 = vmul.f32 %v7269_v8, %v398_v61 }
 0x343   :  { %6288 = vmatprep.subr.msk.bf16.mxu0 %vm7276_vm2, %v7315_v60 }
 0x345   :  { %5702 = vmatmul.mubr.msk.f32.gmra.mrb[20].mxu0 %vm200_vm1, %v1268_v27 }
 0x346   :  { %5704 = vmatprep.mubr.msk.f32.mxu0 %vm200_vm1, %v1269_v29 }
 0x349   :  { %5705 = vmatmul.mubr.msk.f32.gmra.mrb[22].mxu0 %vm200_vm1, %v1270_v36 }
 0x34a   :  { %6291 = vmatpush3.bf16.xpose.msk.msra.mxu0 %vm7276_vm2, %v7315_v60  ;;  %5740 = vmatprep.mubr.msk.f32.mxu0 %vm200_vm1, %v1579_v39  ;;  %v7462_v60 = vld [vmem:[%s8951_s12] sm:$0xff] }
 0x34b   :  { %6294 = vmatprep.subr.msk.bf16.mxu0 %vm7276_vm2, %v7335_v51 }
 0x352   :  { %6297 = vmatpush3.bf16.xpose.msk.msra.mxu0 %vm7276_vm2, %v7335_v51  ;;  %v7480_v51 = vld [vmem:[%s8951_s12 + $0x10] sm:$0xff] }
 0x359   :  { %5741 = vmatmul.mubr.msk.f32.vlgmr.msra.gmra.mrb[24].mxu0 %vm200_vm1, %v1580_v14 }
 0x35a   :  { %5743 = vmatprep.mubr.msk.f32.mxu0 %vm200_vm1, %v1581_v30 }
 0x35d   :  { %5744 = vmatmul.mubr.msk.f32.gmra.mrb[26].mxu0 %vm200_vm1, %v1582_v40 }
 0x35e   :  { %5746 = vmatprep.mubr.msk.f32.mxu0 %vm200_vm1, %v1583_v54 }
 0x361   :  { %5747 = vmatmul.mubr.msk.f32.gmra.mrb[28].mxu0 %vm200_vm1, %v1584_v55 }
 0x3fb   :  { %v5616_v63 = vpop.f32.mrb[12].mxu1  ;;  %v5637_v5 = vpop.f32.mrb[12].mxu0 }
 0x3fc   :  { %v7465_v6 = vadd.f32 %v5637_v5, %v7457_v59  ;;  %v739_v48 = vpop.f32.mrb[13].mxu1  ;;  %v934_v47 = vpop.f32.mrb[13].mxu0  ;;  %v7511_v45 = vadd.f32 %v5616_v63, %v7457_v59 }
 0x3fd   :  { %v7468_v7 = vadd.f32 %v934_v47, %v7462_v60  ;;  %v7516_v29 = vadd.f32 %v739_v48, %v7462_v60 }
 0x3fe   :  { %v966_v12 = vsel %vm77_vm0, %v7465_v6, -inf  ;;  %v771_v14 = vsel %vm77_vm0, %v7511_v45, -inf }
 0x3ff   :  { %967 = vmax.xlane.f32.xlu1 %v966_v12  ;;  %v5619_v61 = vpop.f32.mrb[14].mxu1  ;;  %v5640_v1 = vpop.f32.mrb[14].mxu0  ;;  %v963_v2 = vsel %vm77_vm0, %v7468_v7, -inf  ;;  %v768_v40 = vsel %vm77_vm0, %v7516_v29, -inf }
 0x400   :  { %v7485_v56 = vadd.f32 %v5640_v1, %v7473_v31  ;;  %v944_v13 = vpop.f32.mrb[15].mxu0  ;;  %964 = vmax.xlane.f32.xlu0 %v963_v2  ;;  %v749_v57 = vpop.f32.mrb[15].mxu1  ;;  %v7521_v39 = vadd.f32 %v5619_v61, %v7473_v31 }
 0x401   :  { %v7488_v20 = vadd.f32 %v944_v13, %v7480_v51  ;;  %v7526_v30 = vadd.f32 %v749_v57, %v7480_v51 }
 0x402   :  { %v972_v44 = vsel %vm77_vm0, %v7485_v56, -inf  ;;  %v777_v55 = vsel %vm77_vm0, %v7521_v39, -inf }
 0x403   :  { %973 = vmax.xlane.f32.xlu1 %v972_v44  ;;  %v5622_v62 = vpop.f32.mrb[16].mxu1  ;;  %v5643_v17 = vpop.f32.mrb[16].mxu0  ;;  %v969_v18 = vsel %vm77_vm0, %v7488_v20, -inf  ;;  %v774_v5 = vsel %vm77_vm0, %v7526_v30, -inf }
 0x404   :  { %v7505_v52 = vadd.f32 %v5643_v17, %v7493_v16  ;;  %970 = vmax.xlane.f32.xlu0 %v969_v18  ;;  %v759_v58 = vpop.f32.mrb[17].mxu1  ;;  %v954_v24 = vpop.f32.mrb[17].mxu0  ;;  %v7531_v54 = vadd.f32 %v5622_v62, %v7493_v16 }
 0x405   :  { %v7508_v3 = vadd.f32 %v954_v24, %v7500_v33  ;;  %v7536_v63 = vadd.f32 %v759_v58, %v7500_v33 }
 0x406   :  { %v978_v27 = vsel %vm77_vm0, %v7505_v52, -inf  ;;  %v783_v48 = vsel %vm77_vm0, %v7531_v54, -inf }
 0x407   :  { %979 = vmax.xlane.f32.xlu1 %v978_v27  ;;  %v975_v36 = vsel %vm77_vm0, %v7508_v3, -inf  ;;  %v780_v47 = vsel %vm77_vm0, %v7536_v63, -inf }
 0x408   :  { %976 = vmax.xlane.f32.xlu0 %v975_v36 }
 0x40b   :  { %772 = vmax.xlane.f32.xlu1 %v771_v14 }
 0x40c   :  { %769 = vmax.xlane.f32.xlu0 %v768_v40 }
 0x40f   :  { %778 = vmax.xlane.f32.xlu1 %v777_v55 }
 0x410   :  { %775 = vmax.xlane.f32.xlu0 %v774_v5 }
 0x413   :  { %784 = vmax.xlane.f32.xlu1 %v783_v48 }
 0x414   :  { %v5700_v12 = vpop.f32.mrb[18].mxu0  ;;  %781 = vmax.xlane.f32.xlu0 %v780_v47 }
 0x415   :  { %v7545_v61 = vadd.f32 %v5700_v12, %v7457_v59  ;;  %v1355_v1 = vpop.f32.mrb[19].mxu0 }
 0x416   :  { %v7548_v2 = vadd.f32 %v1355_v1, %v7462_v60 }
 0x417   :  { %v1387_v13 = vsel %vm77_vm0, %v7545_v61, -inf }
 0x418   :  { %v5703_v57 = vpop.f32.mrb[20].mxu0  ;;  %1388 = vmax.xlane.f32.xlu1 %v1387_v13  ;;  %v1384_v44 = vsel %vm77_vm0, %v7548_v2, -inf }
 0x419   :  { %v7555_v62 = vadd.f32 %v5703_v57, %v7473_v31  ;;  %v1365_v17 = vpop.f32.mrb[21].mxu0  ;;  %1385 = vmax.xlane.f32.xlu0 %v1384_v44 }
 0x41a   :  { %v7558_v18 = vadd.f32 %v1365_v17, %v7480_v51 }
 0x41b   :  { %v1393_v58 = vsel %vm77_vm0, %v7555_v62, -inf }
 0x41c   :  { %v5706_v24 = vpop.f32.mrb[22].mxu0  ;;  %1394 = vmax.xlane.f32.xlu1 %v1393_v58  ;;  %v1390_v27 = vsel %vm77_vm0, %v7558_v18, -inf }
 0x41d   :  { %v7565_v36 = vadd.f32 %v5706_v24, %v7493_v16  ;;  %v1375_v14 = vpop.f32.mrb[23].mxu0  ;;  %1391 = vmax.xlane.f32.xlu0 %v1390_v27 }
 0x41e   :  { %v7568_v40 = vadd.f32 %v1375_v14, %v7500_v33 }
 0x41f   :  { %v1399_v55 = vsel %vm77_vm0, %v7565_v36, -inf }
 0x420   :  { %1400 = vmax.xlane.f32.xlu1 %v1399_v55  ;;  %v1396_v5 = vsel %vm77_vm0, %v7568_v40, -inf }
 0x421   :  { %1397 = vmax.xlane.f32.xlu0 %v1396_v5 }
 0x42c   :  { %v5742_v48 = vpop.f32.mrb[24].mxu0 }
 0x42d   :  { %v7575_v47 = vadd.f32 %v5742_v48, %v7457_v59  ;;  %v1669_v12 = vpop.f32.mrb[25].mxu0 }
 0x42e   :  { %v7578_v1 = vadd.f32 %v1669_v12, %v7462_v60 }
 0x42f   :  { %v1701_v13 = vsel %vm77_vm0, %v7575_v47, -inf }
 0x430   :  { %v5745_v57 = vpop.f32.mrb[26].mxu0  ;;  %1702 = vmax.xlane.f32.xlu1 %v1701_v13  ;;  %v1698_v44 = vsel %vm77_vm0, %v7578_v1, -inf }
 0x431   :  { %v7585_v17 = vadd.f32 %v5745_v57, %v7473_v31  ;;  %v1679_v58 = vpop.f32.mrb[27].mxu0  ;;  %1699 = vmax.xlane.f32.xlu0 %v1698_v44 }
 0x432   :  { %v7588_v59 = vadd.f32 %v1679_v58, %v7480_v51 }
 0x433   :  { %v1707_v60 = vsel %vm77_vm0, %v7585_v17, -inf }
 0x434   :  { %v5748_v24 = vpop.f32.mrb[28].mxu0  ;;  %1708 = vmax.xlane.f32.xlu1 %v1707_v60  ;;  %v1704_v27 = vsel %vm77_vm0, %v7588_v59, -inf }
 0x435   :  { %v7595_v14 = vadd.f32 %v5748_v24, %v7493_v16  ;;  %v1689_v55 = vpop.f32.mrb[29].mxu0  ;;  %1705 = vmax.xlane.f32.xlu0 %v1704_v27 }
 0x436   :  { %v7598_v31 = vadd.f32 %v1689_v55, %v7500_v33 }
 0x437   :  { %v1713_v51 = vsel %vm77_vm0, %v7595_v14, -inf }
 0x438   :  { %1714 = vmax.xlane.f32.xlu1 %v1713_v51  ;;  %v1710_v5 = vsel %vm77_vm0, %v7598_v31, -inf }
 0x439   :  { %1711 = vmax.xlane.f32.xlu0 %v1710_v5 }
 0x48c   :  { %v968_v48 = vpop.xlane.xlu1 %967 }
 0x48d   :  { %v982_v12 = vsub.f32 %v7465_v6, %v968_v48  ;;  %v965_v13 = vpop.xlane.xlu0 %964 }
 0x48e   :  { %v981_v16 = vsub.f32 %v7468_v7, %v965_v13 }
 0x48f   :  { %v989_v57 = vmul.f32 1.442695, %v982_v12 }
 0x490   :  { %v987_v44 = vmul.f32 1.442695, %v981_v16  ;;  %v974_v58 = vpop.xlane.xlu1 %973 }
 0x491   :  { %6627 = vpow2.f32 %v989_v57  ;;  %v984_v33 = vsub.f32 %v7485_v56, %v974_v58  ;;  %v971_v60 = vpop.xlane.xlu0 %970 }
 0x492   :  { %6629 = vpow2.f32 %v987_v44  ;;  %v983_v24 = vsub.f32 %v7488_v20, %v971_v60 }
 0x493   :  { %v993_v27 = vmul.f32 1.442695, %v984_v33 }
 0x494   :  { %v991_v55 = vmul.f32 1.442695, %v983_v24  ;;  %v980_v51 = vpop.xlane.xlu1 %979 }
 0x495   :  { %6631 = vpow2.f32 %v993_v27  ;;  %v986_v5 = vsub.f32 %v7505_v52, %v980_v51  ;;  %v977_v6 = vpop.xlane.xlu0 %976 }
 0x496   :  { %6633 = vpow2.f32 %v991_v55  ;;  %v985_v7 = vsub.f32 %v7508_v3, %v977_v6 }
 0x497   :  { %v997_v48 = vmul.f32 1.442695, %v986_v5 }
 0x498   :  { %v995_v12 = vmul.f32 1.442695, %v985_v7  ;;  %v773_v13 = vpop.xlane.xlu1 %772 }
 0x499   :  { %6635 = vpow2.f32 %v997_v48  ;;  %v787_v56 = vsub.f32 %v7511_v45, %v773_v13  ;;  %v770_v16 = vpop.xlane.xlu0 %769 }
 0x49a   :  { %6637 = vpow2.f32 %v995_v12  ;;  %v786_v20 = vsub.f32 %v7516_v29, %v770_v16 }
 0x49b   :  { %v7612_v57 = vpop.eup %6627  ;;  %v794_v44 = vmul.f32 1.442695, %v787_v56 }
 0x49c   :  { %v7614_v58 = vpop.eup %6629  ;;  %v792_v52 = vmul.f32 1.442695, %v786_v20  ;;  %v779_v33 = vpop.xlane.xlu1 %778  ;;  %v1002_v3 = vsel %vm77_vm0, %v7612_v57, 0.0 }
 0x49d   :  { %6639 = vpow2.f32 %v794_v44  ;;  %v789_v60 = vsub.f32 %v7521_v39, %v779_v33  ;;  %v776_v24 = vpop.xlane.xlu0 %775  ;;  %1003 = vadd.xlane.f32.xlu1 %v1002_v3  ;;  %v999_v45 = vsel %vm77_vm0, %v7614_v58, 0.0 }
 0x49e   :  { %6641 = vpow2.f32 %v792_v52  ;;  %v788_v29 = vsub.f32 %v7526_v30, %v776_v24  ;;  %1000 = vadd.xlane.f32.xlu0 %v999_v45 }
 0x49f   :  { %v7622_v27 = vpop.eup %6631  ;;  %v798_v55 = vmul.f32 1.442695, %v789_v60 }
 0x4a0   :  { %v7624_v51 = vpop.eup %6633  ;;  %v796_v5 = vmul.f32 1.442695, %v788_v29  ;;  %v785_v6 = vpop.xlane.xlu1 %784  ;;  %v1008_v7 = vsel %vm77_vm0, %v7622_v27, 0.0 }
 0x4a1   :  { %6643 = vpow2.f32 %v798_v55  ;;  %v791_v39 = vsub.f32 %v7531_v54, %v785_v6  ;;  %1009 = vadd.xlane.f32.xlu1 %v1008_v7  ;;  %v782_v48 = vpop.xlane.xlu0 %781  ;;  %v1005_v12 = vsel %vm77_vm0, %v7624_v51, 0.0 }
 0x4a2   :  { %6645 = vpow2.f32 %v796_v5  ;;  %v790_v30 = vsub.f32 %v7536_v63, %v782_v48  ;;  %1006 = vadd.xlane.f32.xlu0 %v1005_v12 }
 0x4a3   :  { %v7632_v13 = vpop.eup %6635  ;;  %v802_v56 = vmul.f32 1.442695, %v791_v39 }
 0x4a4   :  { %v7634_v16 = vpop.eup %6637  ;;  %v800_v20 = vmul.f32 1.442695, %v790_v30  ;;  %v1014_v44 = vsel %vm77_vm0, %v7632_v13, 0.0 }
 0x4a5   :  { %6647 = vpow2.f32 %v802_v56  ;;  %v1389_v54 = vpop.xlane.xlu1 %1388  ;;  %1015 = vadd.xlane.f32.xlu1 %v1014_v44  ;;  %v1011_v52 = vsel %vm77_vm0, %v7634_v16, 0.0 }
 0x4a6   :  { %6649 = vpow2.f32 %v800_v20  ;;  %v1403_v33 = vsub.f32 %v7545_v61, %v1389_v54  ;;  %v1386_v63 = vpop.xlane.xlu0 %1385  ;;  %1012 = vadd.xlane.f32.xlu0 %v1011_v52 }
 0x4a7   :  { %v7641_v3 = vpop.eup %6639  ;;  %v1402_v60 = vsub.f32 %v7548_v2, %v1386_v63 }
 0x4a8   :  { %v7644_v24 = vpop.eup %6641  ;;  %v1410_v45 = vmul.f32 1.442695, %v1403_v33  ;;  %v807_v29 = vsel %vm77_vm0, %v7641_v3, 0.0 }
 0x4a9   :  { %v1408_v55 = vmul.f32 1.442695, %v1402_v60  ;;  %v1395_v5 = vpop.xlane.xlu1 %1394  ;;  %808 = vadd.xlane.f32.xlu1 %v807_v29  ;;  %v804_v6 = vsel %vm77_vm0, %v7644_v24, 0.0 }
 0x4aa   :  { %6651 = vpow2.f32 %v1410_v45  ;;  %v1405_v61 = vsub.f32 %v7555_v62, %v1395_v5  ;;  %v1392_v7 = vpop.xlane.xlu0 %1391  ;;  %805 = vadd.xlane.f32.xlu0 %v804_v6 }
 0x4ab   :  { %v7651_v39 = vpop.eup %6643  ;;  %6653 = vpow2.f32 %v1408_v55  ;;  %v1404_v2 = vsub.f32 %v7558_v18, %v1392_v7 }
 0x4ac   :  { %v7654_v48 = vpop.eup %6645  ;;  %v1414_v12 = vmul.f32 1.442695, %v1405_v61  ;;  %v813_v30 = vsel %vm77_vm0, %v7651_v39, 0.0 }
 0x4ad   :  { %v1412_v56 = vmul.f32 1.442695, %v1404_v2  ;;  %v1401_v20 = vpop.xlane.xlu1 %1400  ;;  %814 = vadd.xlane.f32.xlu1 %v813_v30  ;;  %v810_v44 = vsel %vm77_vm0, %v7654_v48, 0.0 }
 0x4ae   :  { %6655 = vpow2.f32 %v1414_v12  ;;  %v1407_v62 = vsub.f32 %v7565_v36, %v1401_v20  ;;  %v1398_v54 = vpop.xlane.xlu0 %1397  ;;  %811 = vadd.xlane.f32.xlu0 %v810_v44 }
 0x4af   :  { %v7661_v52 = vpop.eup %6647  ;;  %6657 = vpow2.f32 %v1412_v56  ;;  %v1406_v18 = vsub.f32 %v7568_v40, %v1398_v54 }
 0x4b0   :  { %v7664_v33 = vpop.eup %6649  ;;  %v1418_v63 = vmul.f32 1.442695, %v1407_v62  ;;  %v819_v60 = vsel %vm77_vm0, %v7661_v52, 0.0 }
 0x4b1   :  { %v1416_v45 = vmul.f32 1.442695, %v1406_v18  ;;  %820 = vadd.xlane.f32.xlu1 %v819_v60  ;;  %v816_v29 = vsel %vm77_vm0, %v7664_v33, 0.0 }
 0x4b2   :  { %6659 = vpow2.f32 %v1418_v63  ;;  %817 = vadd.xlane.f32.xlu0 %v816_v29 }
 0x4b3   :  { %6661 = vpow2.f32 %v1416_v45 }
 0x4b4   :  { %v7670_v36 = vpop.eup %6651 }
 0x4b5   :  { %v7672_v55 = vpop.eup %6653  ;;  %v1423_v40 = vsel %vm77_vm0, %v7670_v36, 0.0 }
 0x4b6   :  { %1424 = vadd.xlane.f32.xlu1 %v1423_v40  ;;  %v1420_v5 = vsel %vm77_vm0, %v7672_v55, 0.0 }
 0x4b7   :  { %1421 = vadd.xlane.f32.xlu0 %v1420_v5 }
 0x4b8   :  { %v7678_v6 = vpop.eup %6655 }
 0x4b9   :  { %v7680_v61 = vpop.eup %6657  ;;  %v1429_v7 = vsel %vm77_vm0, %v7678_v6, 0.0 }
 0x4ba   :  { %1430 = vadd.xlane.f32.xlu1 %v1429_v7  ;;  %v1426_v2 = vsel %vm77_vm0, %v7680_v61, 0.0 }
 0x4bb   :  { %1427 = vadd.xlane.f32.xlu0 %v1426_v2 }
 0x4bc   :  { %v7686_v12 = vpop.eup %6659 }
 0x4bd   :  { %v7688_v30 = vpop.eup %6661  ;;  %v1703_v56 = vpop.xlane.xlu1 %1702  ;;  %v1435_v20 = vsel %vm77_vm0, %v7686_v12, 0.0 }
 0x4be   :  { %v1717_v44 = vsub.f32 %v7575_v47, %v1703_v56  ;;  %1436 = vadd.xlane.f32.xlu1 %v1435_v20  ;;  %v1700_v62 = vpop.xlane.xlu0 %1699  ;;  %v1432_v54 = vsel %vm77_vm0, %v7688_v30, 0.0 }
 0x4bf   :  { %v1716_v18 = vsub.f32 %v7578_v1, %v1700_v62  ;;  %1433 = vadd.xlane.f32.xlu0 %v1432_v54 }
 0x4c0   :  { %v1724_v63 = vmul.f32 1.442695, %v1717_v44 }
 0x4c1   :  { %v1722_v60 = vmul.f32 1.442695, %v1716_v18  ;;  %v1709_v45 = vpop.xlane.xlu1 %1708 }
 0x4c2   :  { %6663 = vpow2.f32 %v1724_v63  ;;  %v1719_v29 = vsub.f32 %v7585_v17, %v1709_v45  ;;  %v1706_v40 = vpop.xlane.xlu0 %1705 }
 0x4c3   :  { %6665 = vpow2.f32 %v1722_v60  ;;  %v1718_v5 = vsub.f32 %v7588_v59, %v1706_v40 }
 0x4c4   :  { %v1728_v7 = vmul.f32 1.442695, %v1719_v29 }
 0x4c5   :  { %v1726_v47 = vmul.f32 1.442695, %v1718_v5  ;;  %v1715_v2 = vpop.xlane.xlu1 %1714 }
 0x4c6   :  { %6667 = vpow2.f32 %v1728_v7  ;;  %v1721_v56 = vsub.f32 %v7595_v14, %v1715_v2  ;;  %v1712_v20 = vpop.xlane.xlu0 %1711 }
 0x4c7   :  { %6669 = vpow2.f32 %v1726_v47  ;;  %v1720_v1 = vsub.f32 %v7598_v31, %v1712_v20 }
 0x4c8   :  { %v1732_v44 = vmul.f32 1.442695, %v1721_v56 }
 0x4c9   :  { %v1730_v62 = vmul.f32 1.442695, %v1720_v1 }
 0x4ca   :  { %6671 = vpow2.f32 %v1732_v44 }
 0x4cb   :  { %6673 = vpow2.f32 %v1730_v62 }
 0x4cc   :  { %v7700_v54 = vpop.eup %6663 }
 0x4cd   :  { %v7702_v17 = vpop.eup %6665  ;;  %v1737_v59 = vsel %vm77_vm0, %v7700_v54, 0.0 }
 0x4ce   :  { %1738 = vadd.xlane.f32.xlu1 %v1737_v59  ;;  %v1734_v18 = vsel %vm77_vm0, %v7702_v17, 0.0 }
 0x4cf   :  { %1735 = vadd.xlane.f32.xlu0 %v1734_v18 }
 0x4d0   :  { %v7708_v14 = vpop.eup %6667 }
 0x4d1   :  { %v7710_v63 = vpop.eup %6669  ;;  %v1743_v31 = vsel %vm77_vm0, %v7708_v14, 0.0 }
 0x4d2   :  { %1744 = vadd.xlane.f32.xlu1 %v1743_v31  ;;  %v1740_v60 = vsel %vm77_vm0, %v7710_v63, 0.0 }
 0x4d3   :  { %1741 = vadd.xlane.f32.xlu0 %v1740_v60 }
 0x4d4   :  { %v7716_v45 = vpop.eup %6671 }
 0x4d5   :  { %v7718_v29 = vpop.eup %6673  ;;  %v1749_v40 = vsel %vm77_vm0, %v7716_v45, 0.0 }
 0x4d6   :  { %1750 = vadd.xlane.f32.xlu1 %v1749_v40  ;;  %v1746_v5 = vsel %vm77_vm0, %v7718_v29, 0.0 }
 0x4d7   :  { %1747 = vadd.xlane.f32.xlu0 %v1746_v5 }
 0x52a   :  { %v1004_v7 = vpop.xlane.xlu1 %1003 }
 0x52b   :  { %6675 = vrcp.f32 %v1004_v7  ;;  %v1001_v47 = vpop.xlane.xlu0 %1000 }
 0x52c   :  { %6677 = vrcp.f32 %v1001_v47 }
 0x52e   :  { %v1010_v2 = vpop.xlane.xlu1 %1009 }
 0x52f   :  { %6679 = vrcp.f32 %v1010_v2  ;;  %v1007_v56 = vpop.xlane.xlu0 %1006 }
 0x530   :  { %6681 = vrcp.f32 %v1007_v56 }
 0x532   :  { %v1016_v20 = vpop.xlane.xlu1 %1015 }
 0x533   :  { %6683 = vrcp.f32 %v1016_v20  ;;  %v1013_v1 = vpop.xlane.xlu0 %1012 }
 0x534   :  { %6685 = vrcp.f32 %v1013_v1 }
 0x535   :  { %v6676_v44 = vpop.eup %6675 }
 0x536   :  { %v6678_v62 = vpop.eup %6677  ;;  %v809_v59 = vpop.xlane.xlu1 %808  ;;  %v1024_v60 = vmul.f32 %v6676_v44, %v7612_v57 }
 0x537   :  { %6687 = vrcp.f32 %v809_v59  ;;  %v806_v18 = vpop.xlane.xlu0 %805  ;;  %v1023_v31 = vmul.f32 %v6678_v62, %v7614_v58 }
 0x538   :  { %6689 = vrcp.f32 %v806_v18 }
 0x539   :  { %v6680_v40 = vpop.eup %6679  ;;  %5656 = vmatprep.mubr.msk.f32.mxu1 %vm77_vm0, %v1023_v31 }
 0x53a   :  { %v6682_v5 = vpop.eup %6681  ;;  %v815_v7 = vpop.xlane.xlu1 %814  ;;  %5657 = vmatmul.mubr.msk.f32.vlgmr.msra.gmra.mrb[18].mxu1 %vm77_vm0, %v1024_v60  ;;  %v1026_v58 = vmul.f32 %v6680_v40, %v7622_v27 }
 0x53b   :  { %6691 = vrcp.f32 %v815_v7  ;;  %6241 = vmatpush3.bf16.msra.mxu1 %v7259_v41  ;;  %v812_v47 = vpop.xlane.xlu0 %811  ;;  %v1025_v2 = vmul.f32 %v6682_v5, %v7624_v51 }
 0x53c   :  { %6243 = vmatprep.subr.bf16.mxu1 %v7290_v37  ;;  %6693 = vrcp.f32 %v812_v47 }
 0x53d   :  { %v6684_v57 = vpop.eup %6683  ;;  %5659 = vmatprep.mubr.msk.f32.mxu1 %vm77_vm0, %v1025_v2 }
 0x53e   :  { %v6686_v56 = vpop.eup %6685  ;;  %v821_v20 = vpop.xlane.xlu1 %820  ;;  %5660 = vmatmul.mubr.msk.f32.gmra.mrb[20].mxu1 %vm77_vm0, %v1026_v58  ;;  %v1028_v51 = vmul.f32 %v6684_v57, %v7632_v13 }
 0x53f   :  { %6695 = vrcp.f32 %v821_v20  ;;  %6245 = vmatpush3.bf16.msra.mxu1 %v7290_v37  ;;  %v818_v1 = vpop.xlane.xlu0 %817  ;;  %v1027_v41 = vmul.f32 %v6686_v56, %v7634_v16 }
 0x540   :  { %6247 = vmatprep.subr.bf16.mxu1 %v7292_v38  ;;  %6697 = vrcp.f32 %v818_v1 }
 0x541   :  { %v6688_v44 = vpop.eup %6687  ;;  %5662 = vmatprep.mubr.msk.f32.mxu1 %vm77_vm0, %v1027_v41 }
 0x542   :  { %v6690_v27 = vpop.eup %6689  ;;  %5663 = vmatmul.mubr.msk.f32.gmra.mrb[22].mxu1 %vm77_vm0, %v1028_v51  ;;  %v829_v37 = vmul.f32 %v6688_v44, %v7641_v3  ;;  %v1891_v44 = vld [vmem:[%s8952_s6 + $0x10] sm:$0xff] }
 0x543   :  { %v1425_v62 = vpop.xlane.xlu1 %1424  ;;  %6249 = vmatpush3.bf16.msra.mxu1 %v7292_v38  ;;  %v828_v59 = vmul.f32 %v6690_v27, %v7644_v24 }
 0x544   :  { %6699 = vrcp.f32 %v1425_v62  ;;  %6269 = vmatprep.subr.bf16.mxu1 %v7301_v46  ;;  %v1422_v16 = vpop.xlane.xlu0 %1421 }
 0x545   :  { %v6692_v18 = vpop.eup %6691  ;;  %6701 = vrcp.f32 %v1422_v16  ;;  %5677 = vmatprep.mubr.msk.f32.mxu1 %vm77_vm0, %v828_v59 }
 0x546   :  { %v6694_v13 = vpop.eup %6693  ;;  %5678 = vmatmul.mubr.msk.f32.vlgmr.msra.gmra.mrb[18].mxu1 %vm77_vm0, %v829_v37  ;;  %v831_v24 = vmul.f32 %v6692_v18, %v7651_v39 }
 0x547   :  { %v1431_v31 = vpop.xlane.xlu1 %1430  ;;  %6271 = vmatpush3.bf16.msra.mxu1 %v7301_v46  ;;  %v830_v38 = vmul.f32 %v6694_v13, %v7654_v48 }
 0x548   :  { %6703 = vrcp.f32 %v1431_v31  ;;  %6273 = vmatprep.subr.bf16.mxu1 %v7303_v50  ;;  %v1428_v3 = vpop.xlane.xlu0 %1427 }
 0x549   :  { %v6696_v60 = vpop.eup %6695  ;;  %6705 = vrcp.f32 %v1428_v3  ;;  %5680 = vmatprep.mubr.msk.f32.mxu1 %vm77_vm0, %v830_v38 }
 0x54a   :  { %v6698_v40 = vpop.eup %6697  ;;  %5681 = vmatmul.mubr.msk.f32.gmra.mrb[20].mxu1 %vm77_vm0, %v831_v24  ;;  %v833_v7 = vmul.f32 %v6696_v60, %v7661_v52 }
 0x54b   :  { %v1437_v5 = vpop.xlane.xlu1 %1436  ;;  %6275 = vmatpush3.bf16.msra.mxu1 %v7303_v50  ;;  %v832_v46 = vmul.f32 %v6698_v40, %v7664_v33 }
 0x54c   :  { %6707 = vrcp.f32 %v1437_v5  ;;  %6277 = vmatprep.subr.bf16.mxu1 %v7320_v9  ;;  %v1434_v48 = vpop.xlane.xlu0 %1433  ;;  %v7811_v5 = vld [vmem:[%s8949_s10] sm:$0xff] }
 0x54d   :  { %6709 = vrcp.f32 %v1434_v48  ;;  %5683 = vmatprep.mubr.msk.f32.mxu1 %vm77_vm0, %v832_v46 }
 0x54e   :  { %v6700_v39 = vpop.eup %6699  ;;  %5684 = vmatmul.mubr.msk.f32.gmra.mrb[22].mxu1 %vm77_vm0, %v833_v7 }
 0x54f   :  { %v6702_v47 = vpop.eup %6701  ;;  %6279 = vmatpush3.bf16.msra.mxu1 %v7320_v9  ;;  %v1445_v33 = vmul.f32 %v6700_v39, %v7670_v36  ;;  %v1889_v36 = vld [vmem:[%s8952_s6] sm:$0xff] }
 0x550   :  { %6299 = vmatprep.subr.bf16.mxu1 %v7322_v10  ;;  %v1444_v50 = vmul.f32 %v6702_v47, %v7672_v55  ;;  %v1890_v55 = vld [vmem:[%s8952_s6 + $0x8] sm:$0xff] }
 0x552   :  { %v6704_v2 = vpop.eup %6703  ;;  %5719 = vmatprep.mubr.msk.f32.mxu1 %vm77_vm0, %v1444_v50 }
 0x553   :  { %v6706_v58 = vpop.eup %6705  ;;  %5720 = vmatmul.mubr.msk.f32.vlgmr.msra.gmra.mrb[18].mxu1 %vm77_vm0, %v1445_v33  ;;  %v1447_v9 = vmul.f32 %v6704_v2, %v7678_v6 }
 0x554   :  { %6301 = vmatpush3.bf16.msra.mxu1 %v7322_v10  ;;  %v1446_v52 = vmul.f32 %v6706_v58, %v7680_v61  ;;  %v6310_v61 = vpack.c.bf16 %v1890_v55, %v1889_v36 }
 0x555   :  { %6303 = vmatprep.subr.bf16.mxu1 %v7331_v25 }
 0x556   :  { %v6708_v57 = vpop.eup %6707  ;;  %5722 = vmatprep.mubr.msk.f32.mxu1 %vm77_vm0, %v1446_v52 }
 0x557   :  { %v6710_v56 = vpop.eup %6709  ;;  %5723 = vmatmul.mubr.msk.f32.gmra.mrb[20].mxu1 %vm77_vm0, %v1447_v9  ;;  %v1449_v6 = vmul.f32 %v6708_v57, %v7686_v12 }
 0x558   :  { %6305 = vmatpush3.bf16.msra.mxu1 %v7331_v25  ;;  %v1448_v10 = vmul.f32 %v6710_v56, %v7688_v30 }
 0x559   :  { %6307 = vmatprep.subr.bf16.mxu1 %v7333_v43 }
 0x55a   :  { %5725 = vmatprep.mubr.msk.f32.mxu1 %vm77_vm0, %v1448_v10 }
 0x55b   :  { %v1739_v20 = vpop.xlane.xlu1 %1738  ;;  %5726 = vmatmul.mubr.msk.f32.gmra.mrb[22].mxu1 %vm77_vm0, %v1449_v6 }
 0x55c   :  { %6711 = vrcp.f32 %v1739_v20  ;;  %6309 = vmatpush3.bf16.msra.mxu1 %v7333_v43  ;;  %v1736_v1 = vpop.xlane.xlu0 %1735  ;;  %v1892_v43 = vld [vmem:[%s8952_s6 + $0x18] sm:$0xff] }
 0x55d   :  { %6713 = vrcp.f32 %v1736_v1  ;;  %6311 = vmatprep.subr.bf16.mxu1 %v6310_v61  ;;  %v6314_v37 = vpack.c.bf16 %v1892_v43, %v1891_v44 }
 0x55f   :  { %v1745_v41 = vpop.xlane.xlu1 %1744 }
 0x560   :  { %6715 = vrcp.f32 %v1745_v41  ;;  %v1742_v25 = vpop.xlane.xlu0 %1741 }
 0x561   :  { %6717 = vrcp.f32 %v1742_v25 }
 0x563   :  { %v1751_v30 = vpop.xlane.xlu1 %1750 }
 0x564   :  { %6719 = vrcp.f32 %v1751_v30  ;;  %v1748_v51 = vpop.xlane.xlu0 %1747 }
 0x565   :  { %6721 = vrcp.f32 %v1748_v51 }
 0x566   :  { %v6712_v12 = vpop.eup %6711 }
 0x567   :  { %v6714_v27 = vpop.eup %6713  ;;  %v1759_v59 = vmul.f32 %v6712_v12, %v7700_v54 }
 0x568   :  { %v1758_v62 = vmul.f32 %v6714_v27, %v7702_v17 }
 0x56a   :  { %v6716_v16 = vpop.eup %6715  ;;  %5761 = vmatprep.mubr.msk.f32.mxu1 %vm77_vm0, %v1758_v62 }
 0x56b   :  { %v6718_v18 = vpop.eup %6717  ;;  %5762 = vmatmul.mubr.msk.f32.vlgmr.msra.gmra.mrb[18].mxu1 %vm77_vm0, %v1759_v59  ;;  %v1761_v31 = vmul.f32 %v6716_v16, %v7708_v14 }
 0x56c   :  { %v1760_v13 = vmul.f32 %v6718_v18, %v7710_v63  ;;  %6313 = vmatpush3.bf16.msra.mxu1 %v6310_v61 }
 0x56d   :  { %6315 = vmatprep.subr.bf16.mxu1 %v6314_v37 }
 0x56e   :  { %v6720_v38 = vpop.eup %6719  ;;  %5764 = vmatprep.mubr.msk.f32.mxu1 %vm77_vm0, %v1760_v13 }
 0x56f   :  { %v6722_v3 = vpop.eup %6721  ;;  %5765 = vmatmul.mubr.msk.f32.gmra.mrb[20].mxu1 %vm77_vm0, %v1761_v31  ;;  %v1763_v17 = vmul.f32 %v6720_v38, %v7716_v45  ;;  %v2014_v45 = vsub.s32 5, %v7156_v32 }
 0x570   :  { %v1762_v54 = vmul.f32 %v6722_v3, %v7718_v29  ;;  %6317 = vmatpush3.bf16.msra.mxu1 %v6314_v37 }
 0x571   :  { %v2015_v46 = vrot.slane %v7811_v5, %v2014_v45 }
 0x572   :  { %5767 = vmatprep.mubr.msk.f32.mxu1 %vm77_vm0, %v1762_v54 }
 0x573   :  { %5768 = vmatmul.mubr.msk.f32.gmra.mrb[22].mxu1 %vm77_vm0, %v1763_v17 }
 0x63e   :  { %v5763_v63 = vpop.f32.mrb[18].mxu1 }
 0x63f   :  { %v1854_v24 = vpop.f32.mrb[19].mxu1 }
 0x640   :  { %5778 = vmatprep.mubr.msk.f32.mxu1 %vm200_vm1, %v1854_v24 }
 0x641   :  { %5779 = vmatmul.mubr.msk.f32.vlgmr.msra.gmra.mrb[24].mxu1 %vm200_vm1, %v5763_v63 }
 0x642   :  { %v5766_v14 = vpop.f32.mrb[20].mxu1 }
 0x643   :  { %v1864_v60 = vpop.f32.mrb[21].mxu1 }
 0x644   :  { %5781 = vmatprep.mubr.msk.f32.mxu1 %vm200_vm1, %v1864_v60 }
 0x645   :  { %5782 = vmatmul.mubr.msk.f32.gmra.mrb[26].mxu1 %vm200_vm1, %v5766_v14 }
 0x646   :  { %v5769_v29 = vpop.f32.mrb[22].mxu1 }
 0x647   :  { %v1874_v40 = vpop.f32.mrb[23].mxu1 }
 0x648   :  { %5784 = vmatprep.mubr.msk.f32.mxu1 %vm200_vm1, %v1874_v40 }
 0x649   :  { %5785 = vmatmul.mubr.msk.f32.gmra.mrb[28].mxu1 %vm200_vm1, %v5769_v29 }
 0x714   :  { %v5780_v48 = vpop.f32.mrb[24].mxu1 }
 0x715   :  { %v2007_v7 = vadd.f32 %v5780_v48, %v7059_v21  ;;  %v1977_v39 = vpop.f32.mrb[25].mxu1 }
 0x716   :  { %v2006_v47 = vadd.f32 %v1977_v39, %v7054_v19 }
 0x717   :  { %v7818_v50 = vadd.f32 %v2015_v46, %v2007_v7 }
 0x718   :  { %v7820_v33 = vadd.f32 %v2015_v46, %v2006_v47  ;;  %v5783_v2 = vpop.f32.mrb[26].mxu1  ;;  %v2120_v47 = vld [vmem:[%s8953_s7] sm:$0xff] }
 0x719   :  { %v2009_v58 = vadd.f32 %v5783_v2, %v7071_v28  ;;  %v1987_v52 = vpop.f32.mrb[27].mxu1  ;;  %v2025_v9 = vsel %vm200_vm1, %v7818_v50, 0.0  ;;  %v2121_v2 = vld [vmem:[%s8953_s7 + $0x8] sm:$0xff] }
 0x71a   :  { %v2008_v57 = vadd.f32 %v1987_v52, %v7066_v26  ;;  %2026 = vadd.xlane.f32.xlu1 %v2025_v9  ;;  %v2022_v21 = vsel %vm200_vm1, %v7820_v33, 0.0  ;;  %v6318_v52 = vpack.c.bf16 %v2121_v2, %v2120_v47  ;;  %v2123_v9 = vld [vmem:[%s8953_s7 + $0x18] sm:$0xff] }
 0x71b   :  { %v7828_v36 = vadd.f32 %v2015_v46, %v2009_v58  ;;  %2023 = vadd.xlane.f32.xlu0 %v2022_v21  ;;  %v2122_v58 = vld [vmem:[%s8953_s7 + $0x10] sm:$0xff]  ;;  %v2274_v21 = vld [vmem:[%s8954_s9] sm:$0xff] }
 0x71c   :  { %v7830_v19 = vadd.f32 %v2015_v46, %v2008_v57  ;;  %v5786_v55 = vpop.f32.mrb[28].mxu1  ;;  %v6322_v57 = vpack.c.bf16 %v2123_v9, %v2122_v58  ;;  %6319 = vmatprep.subr.bf16.mxu0 %v6318_v52 }
 0x71d   :  { %v2011_v56 = vadd.f32 %v5786_v55, %v7082_v35  ;;  %v1997_v10 = vpop.f32.mrb[29].mxu1  ;;  %v2031_v28 = vsel %vm200_vm1, %v7828_v36, 0.0  ;;  %6321 = vmatpush3.bf16.msra.mxu0 %v6318_v52  ;;  %v2275_v55 = vld [vmem:[%s8954_s9 + $0x8] sm:$0xff] }
 0x71e   :  { %v2010_v6 = vadd.f32 %v1997_v10, %v7080_v34  ;;  %2032 = vadd.xlane.f32.xlu1 %v2031_v28  ;;  %v2028_v26 = vsel %vm200_vm1, %v7830_v19, 0.0  ;;  %6323 = vmatprep.subr.bf16.mxu0 %v6322_v57  ;;  %v6326_v10 = vpack.c.bf16 %v2275_v55, %v2274_v21  ;;  %v2277_v28 = vld [vmem:[%s8954_s9 + $0x18] sm:$0xff] }
 0x71f   :  { %v7838_v61 = vadd.f32 %v2015_v46, %v2011_v56  ;;  %2029 = vadd.xlane.f32.xlu0 %v2028_v26  ;;  %v2276_v56 = vld [vmem:[%s8954_s9 + $0x10] sm:$0xff]  ;;  %v2278_v26 = vld [vmem:[%s8954_s9 + $0x20] sm:$0xff] }
 0x720   :  { %v7840_v20 = vadd.f32 %v2015_v46, %v2010_v6  ;;  %v6330_v6 = vpack.c.bf16 %v2277_v28, %v2276_v56  ;;  %6327 = vmatprep.subr.bf16.mxu1 %v6326_v10 }
 0x721   :  { %v2037_v1 = vsel %vm200_vm1, %v7838_v61, 0.0  ;;  %6325 = vmatpush3.bf16.msra.mxu0 %v6322_v57  ;;  %6329 = vmatpush3.bf16.msra.mxu1 %v6326_v10 }
 0x722   :  { %2038 = vadd.xlane.f32.xlu1 %v2037_v1  ;;  %v2034_v35 = vsel %vm200_vm1, %v7840_v20, 0.0  ;;  %v2279_v1 = vld [vmem:[%s8954_s9 + $0x28] sm:$0xff]  ;;  %6331 = vmatprep.subr.bf16.mxu1 %v6330_v6 }
 0x723   :  { %2035 = vadd.xlane.f32.xlu0 %v2034_v35  ;;  %v6334_v35 = vpack.c.bf16 %v2279_v1, %v2278_v26 }
 0x725   :  { %6333 = vmatpush3.bf16.msra.mxu1 %v6330_v6 }
 0x726   :  { %6335 = vmatprep.subr.bf16.mxu1 %v6334_v35 }
 0x729   :  { %6337 = vmatpush3.bf16.msra.mxu1 %v6334_v35 }
 0x7a7   :  { %v2027_v41 = vpop.xlane.xlu1 %2026 }
 0x7a8   :  { %v2041_v25 = vmul.f32 0.03125, %v2027_v41  ;;  %v2024_v34 = vpop.xlane.xlu0 %2023 }
 0x7a9   :  { %v2040_v30 = vmul.f32 0.03125, %v2024_v34 }
 0x7aa   :  { %v7847_v51 = vsub.f32 %v7818_v50, %v2041_v25 }
 0x7ab   :  { %v7850_v12 = vsub.f32 %v7820_v33, %v2040_v30  ;;  %v2033_v44 = vpop.xlane.xlu1 %2032 }
 0x7ac   :  { %v2043_v43 = vmul.f32 0.03125, %v2033_v44  ;;  %v2030_v27 = vpop.xlane.xlu0 %2029  ;;  %v2053_v62 = vmul.f32 %v7847_v51, %v7847_v51 }
 0x7ad   :  { %v2042_v59 = vmul.f32 0.03125, %v2030_v27  ;;  %v2052_v37 = vmul.f32 %v7850_v12, %v7850_v12 }
 0x7ae   :  { %v7857_v16 = vsub.f32 %v7828_v36, %v2043_v43  ;;  %v2061_v18 = vsel %vm200_vm1, %v2053_v62, 0.0 }
 0x7af   :  { %v7861_v13 = vsub.f32 %v7830_v19, %v2042_v59  ;;  %2062 = vadd.xlane.f32.xlu1 %v2061_v18  ;;  %v2039_v31 = vpop.xlane.xlu1 %2038  ;;  %v2058_v38 = vsel %vm200_vm1, %v2052_v37, 0.0 }
 0x7b0   :  { %v2045_v3 = vmul.f32 0.03125, %v2039_v31  ;;  %2059 = vadd.xlane.f32.xlu0 %v2058_v38  ;;  %v2036_v54 = vpop.xlane.xlu0 %2035  ;;  %v2055_v17 = vmul.f32 %v7857_v16, %v7857_v16 }
 0x7b1   :  { %v2044_v63 = vmul.f32 0.03125, %v2036_v54  ;;  %v2054_v24 = vmul.f32 %v7861_v13, %v7861_v13 }
 0x7b2   :  { %v7869_v14 = vsub.f32 %v7838_v61, %v2045_v3  ;;  %v2067_v60 = vsel %vm200_vm1, %v2055_v17, 0.0  ;;  %v2102_v17 = vsub.s32 6, %v7156_v32 }
 0x7b3   :  { %v7873_v29 = vsub.f32 %v7840_v20, %v2044_v63  ;;  %2068 = vadd.xlane.f32.xlu1 %v2067_v60  ;;  %v2064_v40 = vsel %vm200_vm1, %v2054_v24, 0.0 }
 0x7b4   :  { %2065 = vadd.xlane.f32.xlu0 %v2064_v40  ;;  %v2057_v46 = vmul.f32 %v7869_v14, %v7869_v14  ;;  %v2112_v40 = vsub.s32 7, %v7156_v32 }
 0x7b5   :  { %v2056_v48 = vmul.f32 %v7873_v29, %v7873_v29 }
 0x7b6   :  { %v2073_v7 = vsel %vm200_vm1, %v2057_v46, 0.0  ;;  %v2103_v46 = vrot.slane %v7811_v5, %v2102_v17  ;;  %v2113_v47 = vrot.slane %v7811_v5, %v2112_v40 }
 0x7b7   :  { %2074 = vadd.xlane.f32.xlu1 %v2073_v7  ;;  %v2070_v39 = vsel %vm200_vm1, %v2056_v48, 0.0 }
 0x7b8   :  { %2071 = vadd.xlane.f32.xlu0 %v2070_v39 }
 0x83c   :  { %v2063_v41 = vpop.xlane.xlu1 %2062 }
 0x83d   :  { %v2077_v25 = vmul.f32 0.03125, %v2063_v41  ;;  %v2060_v34 = vpop.xlane.xlu0 %2059 }
 0x83e   :  { %v2076_v30 = vmul.f32 0.03125, %v2060_v34 }
 0x83f   :  { %v2083_v44 = vadd.f32 1e-06, %v2077_v25 }
 0x840   :  { %v2082_v43 = vadd.f32 1e-06, %v2076_v30  ;;  %v2069_v27 = vpop.xlane.xlu1 %2068  ;;  %v2282_v30 = vld [vmem:[%s8954_s9 + $0x40] sm:$0xff] }
 0x841   :  { %6723 = vrsqrt.f32 %v2083_v44  ;;  %v2079_v62 = vmul.f32 0.03125, %v2069_v27  ;;  %v2066_v59 = vpop.xlane.xlu0 %2065  ;;  %v2283_v44 = vld [vmem:[%s8954_s9 + $0x48] sm:$0xff]  ;;  %v2284_v27 = vld [vmem:[%s8954_s9 + $0x50] sm:$0xff] }
 0x842   :  { %6725 = vrsqrt.f32 %v2082_v43  ;;  %v2078_v37 = vmul.f32 0.03125, %v2066_v59  ;;  %v6342_v43 = vpack.c.bf16 %v2283_v44, %v2282_v30 }
 0x843   :  { %v2085_v18 = vadd.f32 1e-06, %v2079_v62  ;;  %v2285_v62 = vld [vmem:[%s8954_s9 + $0x58] sm:$0xff] }
 0x844   :  { %v2084_v31 = vadd.f32 1e-06, %v2078_v37  ;;  %v2075_v38 = vpop.xlane.xlu1 %2074  ;;  %v6346_v59 = vpack.c.bf16 %v2285_v62, %v2284_v27  ;;  %v2286_v37 = vld [vmem:[%s8954_s9 + $0x60] sm:$0xff] }
 0x845   :  { %6727 = vrsqrt.f32 %v2085_v18  ;;  %v2081_v3 = vmul.f32 0.03125, %v2075_v38  ;;  %v2072_v54 = vpop.xlane.xlu0 %2071  ;;  %v2287_v18 = vld [vmem:[%s8954_s9 + $0x68] sm:$0xff] }
 0x846   :  { %6729 = vrsqrt.f32 %v2084_v31  ;;  %v2080_v63 = vmul.f32 0.03125, %v2072_v54  ;;  %v2288_v31 = vld [vmem:[%s8954_s9 + $0x70] sm:$0xff]  ;;  %v6350_v38 = vpack.c.bf16 %v2287_v18, %v2286_v37 }
 0x847   :  { %v2087_v24 = vadd.f32 1e-06, %v2081_v3  ;;  %v2289_v3 = vld [vmem:[%s8954_s9 + $0x78] sm:$0xff] }
 0x848   :  { %v2086_v60 = vadd.f32 1e-06, %v2080_v63  ;;  %v6354_v54 = vpack.c.bf16 %v2289_v3, %v2288_v31  ;;  %v5013_v63 = vld [vmem:[%s8955_s8] ss:$0 sm:$0xff] }
 0x849   :  { %6731 = vrsqrt.f32 %v2087_v24 }
 0x84a   :  { %6733 = vrsqrt.f32 %v2086_v60 }
 0x84b   :  { %v6724_v48 = vpop.eup %6723 }
 0x84c   :  { %v6726_v7 = vpop.eup %6725  ;;  %v2095_v39 = vmul.f32 %v6724_v48, %v7847_v51 }
 0x84d   :  { %v2094_v2 = vmul.f32 %v6726_v7, %v7850_v12 }
 0x84e   :  { %v2105_v58 = vmul.f32 %v2103_v46, %v2095_v39 }
 0x84f   :  { %v6728_v52 = vpop.eup %6727  ;;  %v2104_v9 = vmul.f32 %v2103_v46, %v2094_v2 }
 0x850   :  { %v6730_v57 = vpop.eup %6729  ;;  %v2097_v21 = vmul.f32 %v6728_v52, %v7857_v16  ;;  %v2115_v10 = vadd.f32 %v2113_v47, %v2105_v58 }
 0x851   :  { %v2114_v55 = vadd.f32 %v2113_v47, %v2104_v9  ;;  %v2096_v56 = vmul.f32 %v6730_v57, %v7861_v13 }
 0x852   :  { %v2107_v28 = vmul.f32 %v2103_v46, %v2097_v21 }
 0x853   :  { %v6732_v6 = vpop.eup %6731  ;;  %5795 = vmatprep.mubr.msk.f32.mxu0 %vm200_vm1, %v2114_v55  ;;  %v2106_v51 = vmul.f32 %v2103_v46, %v2096_v56 }
 0x854   :  { %v6734_v26 = vpop.eup %6733  ;;  %5796 = vmatmul.mubr.msk.f32.vlgmr.msra.gmra.mrb[30].mxu0 %vm200_vm1, %v2115_v10  ;;  %v2099_v5 = vmul.f32 %v6732_v6, %v7869_v14  ;;  %v2117_v35 = vadd.f32 %v2113_v47, %v2107_v28  ;;  %v2280_v14 = vld [vmem:[%s8954_s9 + $0x30] sm:$0xff] }
 0x855   :  { %v2116_v12 = vadd.f32 %v2113_v47, %v2106_v51  ;;  %v2098_v1 = vmul.f32 %v6734_v26, %v7873_v29  ;;  %v2281_v29 = vld [vmem:[%s8954_s9 + $0x38] sm:$0xff] }
 0x856   :  { %v2109_v41 = vmul.f32 %v2103_v46, %v2099_v5  ;;  %v6338_v34 = vpack.c.bf16 %v2281_v29, %v2280_v14 }
 0x857   :  { %5798 = vmatprep.mubr.msk.f32.mxu0 %vm200_vm1, %v2116_v12  ;;  %v2108_v16 = vmul.f32 %v2103_v46, %v2098_v1 }
 0x858   :  { %5799 = vmatmul.mubr.msk.f32.gmra.mrb[32].mxu0 %vm200_vm1, %v2117_v35  ;;  %v2119_v25 = vadd.f32 %v2113_v47, %v2109_v41  ;;  %6339 = vmatprep.subr.bf16.mxu1 %v6338_v34 }
 0x859   :  { %v2118_v13 = vadd.f32 %v2113_v47, %v2108_v16  ;;  %6341 = vmatpush3.bf16.msra.mxu1 %v6338_v34 }
 0x85a   :  { %6343 = vmatprep.subr.bf16.mxu1 %v6342_v43 }
 0x85b   :  { %5801 = vmatprep.mubr.msk.f32.mxu0 %vm200_vm1, %v2118_v13 }
 0x85c   :  { %5802 = vmatmul.mubr.msk.f32.gmra.mrb[34].mxu0 %vm200_vm1, %v2119_v25 }
 0x85d   :  { %6345 = vmatpush3.bf16.msra.mxu1 %v6342_v43 }
 0x85e   :  { %6347 = vmatprep.subr.bf16.mxu1 %v6346_v59 }
 0x861   :  { %6349 = vmatpush3.bf16.msra.mxu1 %v6346_v59 }
 0x862   :  { %6351 = vmatprep.subr.bf16.mxu1 %v6350_v38 }
 0x865   :  { %6353 = vmatpush3.bf16.msra.mxu1 %v6350_v38 }
 0x866   :  { %6355 = vmatprep.subr.bf16.mxu1 %v6354_v54 }
 0x869   :  { %6357 = vmatpush3.bf16.msra.mxu1 %v6354_v54  ;;  %v5020_v54 = vld [vmem:[%s8949_s10 + $0x8] ss:$0 sm:$0xff] }
 0x927   :  { %v5797_v24 = vpop.f32.mrb[30].mxu0 }
 0x928   :  { %v2221_v60 = vadd.f32 %v5797_v24, %v5013_v63  ;;  %v2215_v46 = vpop.f32.mrb[31].mxu0 }
 0x929   :  { %v2216_v48 = vadd.f32 %v5013_v63, %v2215_v46 }
 0x92a   :  { %v2251_v7 = vmul.f32 0.70710677, %v2221_v60  ;;  %v2245_v35 = vmul.f32 0.5, %v2221_v60 }
 0x92b   :  { %v2250_v39 = vmul.f32 0.70710677, %v2216_v48  ;;  %v5800_v47 = vpop.f32.mrb[32].mxu0  ;;  %v2244_v12 = vmul.f32 0.5, %v2216_v48 }
 0x92c   :  { %6735 = verf.f32 %v2251_v7  ;;  %v2231_v2 = vadd.f32 %v5800_v47, %v5013_v63  ;;  %v2225_v58 = vpop.f32.mrb[33].mxu0 }
 0x92d   :  { %6737 = verf.f32 %v2250_v39  ;;  %v2226_v52 = vadd.f32 %v5013_v63, %v2225_v58 }
 0x92e   :  { %v2253_v9 = vmul.f32 0.70710677, %v2231_v2  ;;  %v2247_v30 = vmul.f32 0.5, %v2231_v2 }
 0x92f   :  { %v2252_v57 = vmul.f32 0.70710677, %v2226_v52  ;;  %v5803_v21 = vpop.f32.mrb[34].mxu0  ;;  %v2246_v29 = vmul.f32 0.5, %v2226_v52 }
 0x930   :  { %6739 = verf.f32 %v2253_v9  ;;  %v2241_v55 = vadd.f32 %v5803_v21, %v5013_v63  ;;  %v2235_v56 = vpop.f32.mrb[35].mxu0 }
 0x931   :  { %6741 = verf.f32 %v2252_v57  ;;  %v2236_v10 = vadd.f32 %v5013_v63, %v2235_v56 }
 0x932   :  { %v2255_v28 = vmul.f32 0.70710677, %v2241_v55  ;;  %v2249_v31 = vmul.f32 0.5, %v2241_v55 }
 0x933   :  { %v2254_v6 = vmul.f32 0.70710677, %v2236_v10  ;;  %v2248_v37 = vmul.f32 0.5, %v2236_v10 }
 0x934   :  { %6743 = verf.f32 %v2255_v28 }
 0x935   :  { %6745 = verf.f32 %v2254_v6 }
 0x936   :  { %v6736_v51 = vpop.eup %6735 }
 0x937   :  { %v6738_v26 = vpop.eup %6737  ;;  %v2263_v5 = vadd.f32 1.0, %v6736_v51 }
 0x938   :  { %v2262_v1 = vadd.f32 1.0, %v6738_v26 }
 0x939   :  { %v2269_v25 = vmul.f32 %v2263_v5, %v2245_v35 }
 0x93a   :  { %v6740_v41 = vpop.eup %6739  ;;  %v2268_v16 = vmul.f32 %v2262_v1, %v2244_v12 }
 0x93b   :  { %v6742_v13 = vpop.eup %6741  ;;  %v2265_v14 = vadd.f32 1.0, %v6740_v41 }
 0x93c   :  { %v2264_v34 = vadd.f32 1.0, %v6742_v13  ;;  %5836 = vmatprep.mubr.f32.mxu1 %v2268_v16 }
 0x93d   :  { %5837 = vmatmul.mubr.f32.vlgmr.msra.gmra.mrb[30].mxu1 %v2269_v25  ;;  %v2271_v59 = vmul.f32 %v2265_v14, %v2247_v30 }
 0x93e   :  { %v6744_v44 = vpop.eup %6743  ;;  %v2270_v43 = vmul.f32 %v2264_v34, %v2246_v29 }
 0x93f   :  { %v6746_v27 = vpop.eup %6745  ;;  %v2267_v62 = vadd.f32 1.0, %v6744_v44 }
 0x940   :  { %v2266_v18 = vadd.f32 1.0, %v6746_v27  ;;  %5839 = vmatprep.mubr.f32.mxu1 %v2270_v43 }
 0x941   :  { %5840 = vmatmul.mubr.f32.gmra.mrb[32].mxu1 %v2271_v59  ;;  %v2273_v3 = vmul.f32 %v2267_v62, %v2249_v31 }
 0x942   :  { %v2272_v38 = vmul.f32 %v2266_v18, %v2248_v37 }
 0x944   :  { %5842 = vmatprep.mubr.f32.mxu1 %v2272_v38 }
 0x945   :  { %5843 = vmatmul.mubr.f32.gmra.mrb[34].mxu1 %v2273_v3 }
 0xa10   :  { %v5838_v63 = vpop.f32.mrb[30].mxu1 }
 0xa11   :  { %v2386_v24 = vadd.f32 %v5838_v63, %v7818_v50  ;;  %v2356_v60 = vpop.f32.mrb[31].mxu1 }
 0xa12   :  { %v2385_v46 = vadd.f32 %v2356_v60, %v7820_v33 }
 0xa13   :  { %v7970_v48 = vadd.f32 %v5020_v54, %v2386_v24 }
 0xa14   :  { %v7972_v7 = vadd.f32 %v5020_v54, %v2385_v46  ;;  %v5841_v39 = vpop.f32.mrb[32].mxu1 }
 0xa15   :  { %v2388_v47 = vadd.f32 %v5841_v39, %v7828_v36  ;;  %v2366_v2 = vpop.f32.mrb[33].mxu1  ;;  %v2407_v58 = vsel %vm200_vm1, %v7970_v48, 0.0  ;;  %v5023_v39 = vld [vmem:[%s8946_s3 + $0x20] sm:$0xff] }
 0xa16   :  { %v2387_v52 = vadd.f32 %v2366_v2, %v7830_v19  ;;  %2408 = vadd.xlane.f32.xlu1 %v2407_v58  ;;  %v2404_v50 = vsel %vm200_vm1, %v7972_v7, 0.0  ;;  %v5025_v2 = vld [vmem:[%s8946_s3 + $0x30] sm:$0xff] }
 0xa17   :  { %v7980_v9 = vadd.f32 %v5020_v54, %v2388_v47  ;;  %2405 = vadd.xlane.f32.xlu0 %v2404_v50  ;;  %v5024_v47 = vld [vmem:[%s8946_s3 + $0x28] sm:$0xff] }
 0xa18   :  { %v7982_v33 = vadd.f32 %v5020_v54, %v2387_v52  ;;  %v5844_v57 = vpop.f32.mrb[34].mxu1  ;;  %v6358_v58 = vpack.c.bf16 %v5024_v47, %v5023_v39  ;;  %v5026_v52 = vld [vmem:[%s8946_s3 + $0x38] sm:$0xff] }
 0xa19   :  { %v2390_v21 = vadd.f32 %v5844_v57, %v7838_v61  ;;  %v2376_v55 = vpop.f32.mrb[35].mxu1  ;;  %v2413_v36 = vsel %vm200_vm1, %v7980_v9, 0.0  ;;  %v6362_v50 = vpack.c.bf16 %v5026_v52, %v5025_v2  ;;  %v5033_v57 = vld [vmem:[%s8948_s4 + $0x20] sm:$0xff]  ;;  %v5036_v39 = vld [vmem:[%s8948_s4 + $0x38] sm:$0xff] }
 0xa1a   :  { %v2389_v56 = vadd.f32 %v2376_v55, %v7840_v20  ;;  %2414 = vadd.xlane.f32.xlu1 %v2413_v36  ;;  %v2410_v19 = vsel %vm200_vm1, %v7982_v33, 0.0  ;;  %6359 = vmatprep.subr.bf16.mxu0 %v6358_v58 }
 0xa1b   :  { %v7990_v10 = vadd.f32 %v5020_v54, %v2390_v21  ;;  %2411 = vadd.xlane.f32.xlu0 %v2410_v19  ;;  %v5034_v21 = vld [vmem:[%s8948_s4 + $0x28] sm:$0xff]  ;;  %6361 = vmatpush3.bf16.msra.mxu0 %v6358_v58 }
 0xa1c   :  { %v7992_v28 = vadd.f32 %v5020_v54, %v2389_v56  ;;  %6363 = vmatprep.subr.bf16.mxu0 %v6362_v50  ;;  %v6366_v55 = vpack.c.bf16 %v5034_v21, %v5033_v57 }
 0xa1d   :  { %v2419_v6 = vsel %vm200_vm1, %v7990_v10, 0.0 }
 0xa1e   :  { %2420 = vadd.xlane.f32.xlu1 %v2419_v6  ;;  %v2416_v61 = vsel %vm200_vm1, %v7992_v28, 0.0 }
 0xa1f   :  { %2417 = vadd.xlane.f32.xlu0 %v2416_v61  ;;  %6365 = vmatpush3.bf16.msra.mxu0 %v6362_v50 }
 0xa20   :  { %6367 = vmatprep.subr.bf16.mxu0 %v6366_v55 }
 0xaa3   :  { %v2409_v51 = vpop.xlane.xlu1 %2408 }
 0xaa4   :  { %v2423_v26 = vmul.f32 0.03125, %v2409_v51  ;;  %v2406_v20 = vpop.xlane.xlu0 %2405 }
 0xaa5   :  { %v2422_v5 = vmul.f32 0.03125, %v2406_v20 }
 0xaa6   :  { %v7999_v12 = vsub.f32 %v7970_v48, %v2423_v26 }
 0xaa7   :  { %v8002_v1 = vsub.f32 %v7972_v7, %v2422_v5  ;;  %v2415_v35 = vpop.xlane.xlu1 %2414 }
 0xaa8   :  { %v2425_v41 = vmul.f32 0.03125, %v2415_v35  ;;  %v2412_v16 = vpop.xlane.xlu0 %2411  ;;  %v2435_v13 = vmul.f32 %v7999_v12, %v7999_v12 }
 0xaa9   :  { %v2424_v25 = vmul.f32 0.03125, %v2412_v16  ;;  %v2434_v14 = vmul.f32 %v8002_v1, %v8002_v1 }
 0xaaa   :  { %v8009_v29 = vsub.f32 %v7980_v9, %v2425_v41  ;;  %v2443_v34 = vsel %vm200_vm1, %v2435_v13, 0.0 }
 0xaab   :  { %v8013_v30 = vsub.f32 %v7982_v33, %v2424_v25  ;;  %2444 = vadd.xlane.f32.xlu1 %v2443_v34  ;;  %v2421_v44 = vpop.xlane.xlu1 %2420  ;;  %v2440_v43 = vsel %vm200_vm1, %v2434_v14, 0.0 }
 0xaac   :  { %v2427_v27 = vmul.f32 0.03125, %v2421_v44  ;;  %2441 = vadd.xlane.f32.xlu0 %v2440_v43  ;;  %v2418_v62 = vpop.xlane.xlu0 %2417  ;;  %v2437_v59 = vmul.f32 %v8009_v29, %v8009_v29  ;;  %v8055_v44 = vld [vmem:[%s8949_s10 + $0x10] sm:$0xff] }
 0xaad   :  { %v2426_v37 = vmul.f32 0.03125, %v2418_v62  ;;  %v2436_v18 = vmul.f32 %v8013_v30, %v8013_v30  ;;  %v2485_v62 = vrot.slane %v8055_v44, %v7159_v42 }
 0xaae   :  { %v8021_v31 = vsub.f32 %v7990_v10, %v2427_v27  ;;  %v2449_v38 = vsel %vm200_vm1, %v2437_v59, 0.0 }
 0xaaf   :  { %v8025_v3 = vsub.f32 %v7992_v28, %v2426_v37  ;;  %2450 = vadd.xlane.f32.xlu1 %v2449_v38  ;;  %v2446_v54 = vsel %vm200_vm1, %v2436_v18, 0.0  ;;  %v2495_v38 = vrot.slane %v8055_v44, %v7167_v49 }
 0xab0   :  { %2447 = vadd.xlane.f32.xlu0 %v2446_v54  ;;  %v2439_v63 = vmul.f32 %v8021_v31, %v8021_v31 }
 0xab1   :  { %v2438_v24 = vmul.f32 %v8025_v3, %v8025_v3 }
 0xab2   :  { %v2455_v60 = vsel %vm200_vm1, %v2439_v63, 0.0 }
 0xab3   :  { %2456 = vadd.xlane.f32.xlu1 %v2455_v60  ;;  %v2452_v46 = vsel %vm200_vm1, %v2438_v24, 0.0 }
 0xab4   :  { %2453 = vadd.xlane.f32.xlu0 %v2452_v46  ;;  %v5035_v46 = vld [vmem:[%s8948_s4 + $0x30] sm:$0xff] }
 0xb38   :  { %v2445_v36 = vpop.xlane.xlu1 %2444 }
 0xb39   :  { %v2459_v56 = vmul.f32 0.03125, %v2445_v36  ;;  %v2442_v19 = vpop.xlane.xlu0 %2441  ;;  %v5043_v36 = vld [vmem:[%s8947_s5 + $0x20] sm:$0xff] }
 0xb3a   :  { %v2458_v6 = vmul.f32 0.03125, %v2442_v19 }
 0xb3b   :  { %v2465_v61 = vadd.f32 1e-06, %v2459_v56  ;;  %v5044_v56 = vld [vmem:[%s8947_s5 + $0x28] sm:$0xff] }
 0xb3c   :  { %v2464_v51 = vadd.f32 1e-06, %v2458_v6  ;;  %v2451_v26 = vpop.xlane.xlu1 %2450 }
 0xb3d   :  { %6747 = vrsqrt.f32 %v2465_v61  ;;  %v2461_v20 = vmul.f32 0.03125, %v2451_v26  ;;  %v2448_v5 = vpop.xlane.xlu0 %2447  ;;  %v6374_v26 = vpack.c.bf16 %v5044_v56, %v5043_v36 }
 0xb3e   :  { %6749 = vrsqrt.f32 %v2464_v51  ;;  %v2460_v35 = vmul.f32 0.03125, %v2448_v5 }
 0xb3f   :  { %v2467_v41 = vadd.f32 1e-06, %v2461_v20 }
 0xb40   :  { %v2466_v16 = vadd.f32 1e-06, %v2460_v35  ;;  %v2457_v13 = vpop.xlane.xlu1 %2456 }
 0xb41   :  { %6751 = vrsqrt.f32 %v2467_v41  ;;  %v2463_v25 = vmul.f32 0.03125, %v2457_v13  ;;  %v2454_v14 = vpop.xlane.xlu0 %2453  ;;  %v8105_v41 = vrot.slane %v8055_v44, %v7205_v15 }
 0xb42   :  { %6753 = vrsqrt.f32 %v2466_v16  ;;  %v2462_v34 = vmul.f32 0.03125, %v2454_v14 }
 0xb43   :  { %v2469_v43 = vadd.f32 1e-06, %v2463_v25 }
 0xb44   :  { %v2468_v27 = vadd.f32 1e-06, %v2462_v34 }
 0xb45   :  { %6755 = vrsqrt.f32 %v2469_v43 }
 0xb46   :  { %6757 = vrsqrt.f32 %v2468_v27 }
 0xb47   :  { %v6748_v59 = vpop.eup %6747 }
 0xb48   :  { %v6750_v37 = vpop.eup %6749  ;;  %v2477_v18 = vmul.f32 %v6748_v59, %v7999_v12  ;;  %v2632_v59 = vrot.slane %v8055_v44, %v7247_v53 }
 0xb49   :  { %v2476_v54 = vmul.f32 %v6750_v37, %v8002_v1  ;;  %v6370_v1 = vpack.c.bf16 %v5036_v39, %v5035_v46 }
 0xb4a   :  { %v2487_v63 = vmul.f32 %v2485_v62, %v2477_v18 }
 0xb4b   :  { %v6752_v24 = vpop.eup %6751  ;;  %v2486_v60 = vmul.f32 %v2485_v62, %v2476_v54 }
 0xb4c   :  { %v6754_v47 = vpop.eup %6753  ;;  %v2479_v2 = vmul.f32 %v6752_v24, %v8009_v29  ;;  %v2497_v52 = vadd.f32 %v2495_v38, %v2487_v63 }
 0xb4d   :  { %v2496_v12 = vadd.f32 %v2495_v38, %v2486_v60  ;;  %v2478_v58 = vmul.f32 %v6754_v47, %v8013_v30 }
 0xb4e   :  { %v2489_v50 = vmul.f32 %v2485_v62, %v2479_v2 }
 0xb4f   :  { %v6756_v57 = vpop.eup %6755  ;;  %5853 = vmatprep.mubr.msk.f32.mxu0 %vm200_vm1, %v2496_v12  ;;  %v2488_v21 = vmul.f32 %v2485_v62, %v2478_v58  ;;  %v2736_v58 = vrot.slane %v8055_v44, %v530_v0 }
 0xb50   :  { %v6758_v19 = vpop.eup %6757  ;;  %5854 = vmatmul.mubr.msk.f32.vlgmr.msra.gmra.mrb[36].mxu0 %vm200_vm1, %v2497_v52  ;;  %v2481_v29 = vmul.f32 %v6756_v57, %v8021_v31  ;;  %v2499_v61 = vadd.f32 %v2495_v38, %v2489_v50  ;;  %v5045_v31 = vld [vmem:[%s8947_s5 + $0x30] sm:$0xff] }
 0xb51   :  { %6369 = vmatpush3.bf16.msra.mxu0 %v6366_v55  ;;  %v2498_v30 = vadd.f32 %v2495_v38, %v2488_v21  ;;  %v2480_v6 = vmul.f32 %v6758_v19, %v8025_v3  ;;  %v5046_v3 = vld [vmem:[%s8947_s5 + $0x38] sm:$0xff] }
 0xb52   :  { %6371 = vmatprep.subr.bf16.mxu0 %v6370_v1  ;;  %v2491_v51 = vmul.f32 %v2485_v62, %v2481_v29  ;;  %v6378_v55 = vpack.c.bf16 %v5046_v3, %v5045_v31 }
 0xb53   :  { %5856 = vmatprep.mubr.msk.f32.mxu0 %vm200_vm1, %v2498_v30  ;;  %v2490_v20 = vmul.f32 %v2485_v62, %v2480_v6 }
 0xb54   :  { %5857 = vmatmul.mubr.msk.f32.gmra.mrb[38].mxu0 %vm200_vm1, %v2499_v61  ;;  %v2501_v35 = vadd.f32 %v2495_v38, %v2491_v51 }
 0xb55   :  { %6373 = vmatpush3.bf16.msra.mxu0 %v6370_v1  ;;  %v2500_v5 = vadd.f32 %v2495_v38, %v2490_v20 }
 0xb56   :  { %6375 = vmatprep.subr.bf16.mxu0 %v6374_v26 }
 0xb57   :  { %5859 = vmatprep.mubr.msk.f32.mxu0 %vm200_vm1, %v2500_v5 }
 0xb58   :  { %5860 = vmatmul.mubr.msk.f32.gmra.mrb[40].mxu0 %vm200_vm1, %v2501_v35 }
 0xb59   :  { %5870 = vmatprep.mubr.msk.f32.mxu0 %vm200_vm1, %v2496_v12 }
 0xb5c   :  { %5871 = vmatmul.mubr.msk.f32.vlgmr.msra.gmra.mrb[42].mxu0 %vm200_vm1, %v2497_v52 }
 0xb5d   :  { %5873 = vmatprep.mubr.msk.f32.mxu0 %vm200_vm1, %v2498_v30  ;;  %6377 = vmatpush3.bf16.msra.mxu0 %v6374_v26 }
 0xb5e   :  { %6379 = vmatprep.subr.bf16.mxu0 %v6378_v55 }
 0xb60   :  { %5874 = vmatmul.mubr.msk.f32.gmra.mrb[44].mxu0 %vm200_vm1, %v2499_v61 }
 0xb61   :  { %5876 = vmatprep.mubr.msk.f32.mxu0 %vm200_vm1, %v2500_v5  ;;  %6381 = vmatpush3.bf16.msra.mxu0 %v6378_v55 }
 0xb64   :  { %5877 = vmatmul.mubr.msk.f32.gmra.mrb[46].mxu0 %vm200_vm1, %v2501_v35 }
 0xb65   :  { %5887 = vmatprep.mubr.msk.f32.mxu0 %vm200_vm1, %v2496_v12 }
 0xb68   :  { %5888 = vmatmul.mubr.msk.f32.vlgmr.msra.gmra.mrb[48].mxu0 %vm200_vm1, %v2497_v52 }
 0xb69   :  { %5890 = vmatprep.mubr.msk.f32.mxu0 %vm200_vm1, %v2498_v30 }
 0xb6c   :  { %5891 = vmatmul.mubr.msk.f32.gmra.mrb[50].mxu0 %vm200_vm1, %v2499_v61 }
 0xb6d   :  { %5893 = vmatprep.mubr.msk.f32.mxu0 %vm200_vm1, %v2500_v5 }
 0xb70   :  { %5894 = vmatmul.mubr.msk.f32.gmra.mrb[52].mxu0 %vm200_vm1, %v2501_v35 }
 0xc23   :  { %v8107_v16 = vpop.f32.mrb[36].mxu0 }
 0xc24   :  { %v2595_v13 = vpop.f32.mrb[37].mxu0 }
 0xc25   :  { %v8110_v25 = vadd.f32 %v2595_v13, %v8105_v41 }
 0xc27   :  { %v8112_v14 = vpop.f32.mrb[38].mxu0  ;;  %v2832_v34 = vmul.f32 %v8110_v25, %v7220_v22  ;;  %v3041_v43 = vmul.f32 %v8110_v25, %v7223_v23 }
 0xc28   :  { %v8118_v27 = vpop.f32.mrb[39].mxu0 }
 0xc29   :  { %5908 = vmatprep.mubr.msk.f32.mxu1 %vm200_vm1, %v2832_v34  ;;  %5929 = vmatprep.mubr.msk.f32.mxu0 %vm200_vm1, %v3041_v43 }
 0xc2b   :  { %v8122_v15 = vpop.f32.mrb[40].mxu0 }
 0xc2c   :  { %v8124_v62 = vpop.f32.mrb[41].mxu0 }
 0xc2f   :  { %v5872_v37 = vpop.f32.mrb[42].mxu0 }
 0xc30   :  { %v2705_v18 = vadd.f32 %v5872_v37, %v2632_v59  ;;  %v2699_v38 = vpop.f32.mrb[43].mxu0 }
 0xc31   :  { %v2700_v54 = vadd.f32 %v2699_v38, %v2632_v59 }
 0xc33   :  { %v8128_v63 = vpack.c.bf16 %v2705_v18, %v2700_v54  ;;  %v5875_v24 = vpop.f32.mrb[44].mxu0  ;;  %v8189_v54 = vadd.f32 %v8107_v16, %v8105_v41 }
 0xc34   :  { %v2715_v60 = vadd.f32 %v5875_v24, %v2632_v59  ;;  %v2709_v46 = vpop.f32.mrb[45].mxu0 }
 0xc35   :  { %v2710_v39 = vadd.f32 %v2709_v46, %v2632_v59  ;;  %6384 = vmatprep.subr.msk.bf16.mxu1 %vm7276_vm2, %v8128_v63  ;;  %6402 = vmatprep.subr.msk.bf16.mxu0 %vm7276_vm2, %v8128_v63 }
 0xc36   :  { %6387 = vmatpush3.bf16.xpose.msk.msra.mxu1 %vm7276_vm2, %v8128_v63  ;;  %6405 = vmatpush3.bf16.xpose.msk.msra.mxu0 %vm7276_vm2, %v8128_v63 }
 0xc37   :  { %v8142_v53 = vpack.c.bf16 %v2715_v60, %v2710_v39  ;;  %v5878_v47 = vpop.f32.mrb[46].mxu0 }
 0xc38   :  { %v2725_v2 = vadd.f32 %v5878_v47, %v2632_v59  ;;  %v2719_v12 = vpop.f32.mrb[47].mxu0 }
 0xc39   :  { %v2720_v52 = vadd.f32 %v2719_v12, %v2632_v59  ;;  %6390 = vmatprep.subr.msk.bf16.mxu1 %vm7276_vm2, %v8142_v53  ;;  %6408 = vmatprep.subr.msk.bf16.mxu0 %vm7276_vm2, %v8142_v53 }
 0xc3b   :  { %v8153_v50 = vpack.c.bf16 %v2725_v2, %v2720_v52  ;;  %v5889_v1 = vpop.f32.mrb[48].mxu0 }
 0xc3c   :  { %v2809_v57 = vadd.f32 %v5889_v1, %v2736_v58  ;;  %v2803_v21 = vpop.f32.mrb[49].mxu0 }
 0xc3d   :  { %v2804_v36 = vadd.f32 %v2803_v21, %v2736_v58 }
 0xc3e   :  { %6393 = vmatpush3.bf16.xpose.msk.msra.mxu1 %vm7276_vm2, %v8142_v53  ;;  %6411 = vmatpush3.bf16.xpose.msk.msra.mxu0 %vm7276_vm2, %v8142_v53  ;;  %v3227_v0 = vmul.f32 %v2809_v57, %v7223_v23  ;;  %v3036_v44 = vmul.f32 %v2809_v57, %v7220_v22  ;;  %v3644_v56 = vmul.f32 %v2809_v57, %v7264_v4 }
 0xc3f   :  { %v5892_v19 = vpop.f32.mrb[50].mxu0  ;;  %6396 = vmatprep.subr.msk.bf16.mxu1 %vm7276_vm2, %v8153_v50  ;;  %6414 = vmatprep.subr.msk.bf16.mxu0 %vm7276_vm2, %v8153_v50  ;;  %v3226_v29 = vmul.f32 %v2804_v36, %v7223_v23  ;;  %v3035_v30 = vmul.f32 %v2804_v36, %v7220_v22  ;;  %v3643_v6 = vmul.f32 %v2804_v36, %v7264_v4 }
 0xc40   :  { %v2819_v61 = vadd.f32 %v5892_v19, %v2736_v58  ;;  %v2813_v51 = vpop.f32.mrb[51].mxu0  ;;  %v3953_v26 = vmul.f32 %v2804_v36, %v7269_v8  ;;  %v3954_v20 = vmul.f32 %v2809_v57, %v7269_v8 }
 0xc41   :  { %v2814_v5 = vadd.f32 %v2813_v51, %v2736_v58  ;;  %v6418_v35 = vpack.c.bf16 %v3227_v0, %v3226_v29  ;;  %v8175_v31 = vpack.c.bf16 %v3036_v44, %v3035_v30  ;;  %v8177_v3 = vpack.c.bf16 %v3644_v56, %v3643_v6 }
 0xc42   :  { %v3229_v55 = vmul.f32 %v2819_v61, %v7223_v23  ;;  %v3038_v13 = vmul.f32 %v2819_v61, %v7220_v22  ;;  %v3646_v34 = vmul.f32 %v2819_v61, %v7264_v4  ;;  %v8182_v43 = vpack.c.bf16 %v3954_v20, %v3953_v26 }
 0xc43   :  { %v5895_v59 = vpop.f32.mrb[52].mxu0  ;;  %v3228_v37 = vmul.f32 %v2814_v5, %v7223_v23  ;;  %v3037_v18 = vmul.f32 %v2814_v5, %v7220_v22  ;;  %v3645_v38 = vmul.f32 %v2814_v5, %v7264_v4  ;;  %v3955_v46 = vmul.f32 %v2814_v5, %v7269_v8 }
 0xc44   :  { %v2829_v24 = vadd.f32 %v5895_v59, %v2736_v58  ;;  %v2823_v60 = vpop.f32.mrb[53].mxu0  ;;  %v3956_v39 = vmul.f32 %v2819_v61, %v7269_v8  ;;  %v8214_v0 = vadd.f32 %v8118_v27, %v8105_v41  ;;  %v2833_v51 = vmul.f32 %v8189_v54, %v7220_v22 }
 0xc45   :  { %v2824_v47 = vadd.f32 %v2823_v60, %v2736_v58  ;;  %v6422_v2 = vpack.c.bf16 %v3229_v55, %v3228_v37  ;;  %v8193_v12 = vpack.c.bf16 %v3038_v13, %v3037_v18  ;;  %v8195_v52 = vpack.c.bf16 %v3646_v34, %v3645_v38 }
 0xc46   :  { %6399 = vmatpush3.bf16.xpose.msk.msra.mxu1 %vm7276_vm2, %v8153_v50  ;;  %6417 = vmatpush3.bf16.xpose.msk.msra.mxu0 %vm7276_vm2, %v8153_v50  ;;  %v3231_v16 = vmul.f32 %v2829_v24, %v7223_v23  ;;  %v3040_v1 = vmul.f32 %v2829_v24, %v7220_v22  ;;  %v3648_v57 = vmul.f32 %v2829_v24, %v7264_v4 }
 0xc47   :  { %6419 = vmatprep.subr.bf16.mxu1 %v6418_v35  ;;  %6444 = vmatprep.subr.msk.bf16.mxu0 %vm7276_vm2, %v8128_v63  ;;  %v3230_v58 = vmul.f32 %v2824_v47, %v7223_v23  ;;  %v3039_v21 = vmul.f32 %v2824_v47, %v7220_v22  ;;  %v3647_v36 = vmul.f32 %v2824_v47, %v7264_v4 }
 0xc48   :  { %v8216_v44 = vpack.c.bf16 %v3956_v39, %v3955_v46  ;;  %v3957_v56 = vmul.f32 %v2824_v47, %v7269_v8  ;;  %v3958_v19 = vmul.f32 %v2829_v24, %v7269_v8  ;;  %v3042_v27 = vmul.f32 %v8189_v54, %v7223_v23  ;;  %v8323_v46 = vld [vmem:[%s8951_s12 + $0x8] sm:$0xff] }
 0xc49   :  { %v6426_v29 = vpack.c.bf16 %v3231_v16, %v3230_v58  ;;  %v8220_v30 = vpack.c.bf16 %v3040_v1, %v3039_v21  ;;  %v8222_v6 = vpack.c.bf16 %v3648_v57, %v3647_v36  ;;  %v2611_v26 = vadd.f32 %v8112_v14, %v8105_v41  ;;  %v8331_v16 = vld [vmem:[%s8951_s12] sm:$0xff]  ;;  %v8343_v36 = vld [vmem:[%s8951_s12 + $0x18] sm:$0xff] }
 0xc4a   :  { %v8224_v61 = vpack.c.bf16 %v3958_v19, %v3957_v56  ;;  %v2616_v20 = vadd.f32 %v8124_v62, %v8105_v41  ;;  %v2834_v5 = vmul.f32 %v8214_v0, %v7220_v22  ;;  %v3043_v55 = vmul.f32 %v8214_v0, %v7223_v23 }
 0xc4b   :  { %v2621_v14 = vadd.f32 %v8122_v15, %v8105_v41  ;;  %v2835_v62 = vmul.f32 %v2611_v26, %v7220_v22  ;;  %v3044_v13 = vmul.f32 %v2611_v26, %v7223_v23  ;;  %v3461_v37 = vmul.f32 %v2611_v26, %v7264_v4 }
 0xc4c   :  { %v2836_v34 = vmul.f32 %v2616_v20, %v7220_v22  ;;  %v3045_v59 = vmul.f32 %v2616_v20, %v7223_v23  ;;  %v3462_v18 = vmul.f32 %v2616_v20, %v7264_v4  ;;  %v3768_v24 = vmul.f32 %v8110_v25, %v7269_v8 }
 0xc4d   :  { %5909 = vmatmul.mubr.msk.f32.vlgmr.msra.gmra.mrb[36].mxu1 %vm200_vm1, %v2833_v51  ;;  %5930 = vmatmul.mubr.msk.f32.vlgmr.msra.gmra.mrb[54].mxu0 %vm200_vm1, %v3042_v27  ;;  %v2837_v41 = vmul.f32 %v2621_v14, %v7220_v22  ;;  %v3046_v15 = vmul.f32 %v2621_v14, %v7223_v23  ;;  %v3459_v22 = vmul.f32 %v8189_v54, %v7264_v4 }
 0xc4e   :  { %5911 = vmatprep.mubr.msk.f32.mxu1 %vm200_vm1, %v2834_v5  ;;  %5932 = vmatprep.mubr.msk.f32.mxu0 %vm200_vm1, %v3043_v55  ;;  %v3460_v23 = vmul.f32 %v8214_v0, %v7264_v4  ;;  %v3463_v38 = vmul.f32 %v2621_v14, %v7264_v4  ;;  %v8363_v55 = vld [vmem:[%s8951_s12 + $0x28] sm:$0xff] }
 0xc4f   :  { %6421 = vmatpush3.bf16.msra.mxu1 %v6418_v35  ;;  %6447 = vmatpush3.bf16.xpose.msk.msra.mxu0 %vm7276_vm2, %v8128_v63  ;;  %v3458_v35 = vmul.f32 %v8110_v25, %v7264_v4  ;;  %v3769_v4 = vmul.f32 %v8189_v54, %v7269_v8  ;;  %v3770_v25 = vmul.f32 %v8214_v0, %v7269_v8 }
 0xc50   :  { %6423 = vmatprep.subr.bf16.mxu1 %v6422_v2  ;;  %6450 = vmatprep.subr.msk.bf16.mxu0 %vm7276_vm2, %v8142_v53 }
 0xc51   :  { %5912 = vmatmul.mubr.msk.f32.gmra.mrb[38].mxu1 %vm200_vm1, %v2835_v62  ;;  %5933 = vmatmul.mubr.msk.f32.gmra.mrb[56].mxu0 %vm200_vm1, %v3044_v13 }
 0xc52   :  { %5914 = vmatprep.mubr.msk.f32.mxu1 %vm200_vm1, %v2836_v34  ;;  %5935 = vmatprep.mubr.msk.f32.mxu0 %vm200_vm1, %v3045_v59  ;;  %v8371_v34 = vld [vmem:[%s8951_s12 + $0x20] sm:$0xff] }
 0xc53   :  { %6425 = vmatpush3.bf16.msra.mxu1 %v6422_v2 }
 0xc54   :  { %6427 = vmatprep.subr.bf16.mxu1 %v6426_v29 }
 0xc55   :  { %5915 = vmatmul.mubr.msk.f32.gmra.mrb[40].mxu1 %vm200_vm1, %v2837_v41  ;;  %5936 = vmatmul.mubr.msk.f32.gmra.mrb[58].mxu0 %vm200_vm1, %v3046_v15 }
 0xc56   :  { %5992 = vmatprep.mubr.msk.f32.mxu0 %vm200_vm1, %v3458_v35 }
 0xc57   :  { %6429 = vmatpush3.bf16.msra.mxu1 %v6426_v29  ;;  %6453 = vmatpush3.bf16.xpose.msk.msra.mxu0 %vm7276_vm2, %v8142_v53  ;;  %v8351_v29 = vld [vmem:[%s8951_s12 + $0x10] sm:$0xff] }
 0xc58   :  { %6431 = vmatprep.subr.bf16.mxu1 %v8175_v31  ;;  %6456 = vmatprep.subr.msk.bf16.mxu0 %vm7276_vm2, %v8153_v50 }
 0xc5f   :  { %6459 = vmatpush3.bf16.xpose.msk.msra.mxu0 %vm7276_vm2, %v8153_v50 }
 0xc60   :  { %6474 = vmatprep.subr.msk.bf16.mxu0 %vm7276_vm2, %v8128_v63 }
 0xc66   :  { %5993 = vmatmul.mubr.msk.f32.vlgmr.msra.gmra.mrb[60].mxu0 %vm200_vm1, %v3459_v22 }
 0xc67   :  { %5995 = vmatprep.mubr.msk.f32.mxu0 %vm200_vm1, %v3460_v23  ;;  %6477 = vmatpush3.bf16.xpose.msk.msra.mxu0 %vm7276_vm2, %v8128_v63  ;;  %v3771_v63 = vmul.f32 %v2611_v26, %v7269_v8 }
 0xc68   :  { %6480 = vmatprep.subr.msk.bf16.mxu0 %vm7276_vm2, %v8142_v53 }
 0xc6a   :  { %5996 = vmatmul.mubr.msk.f32.gmra.mrb[62].mxu0 %vm200_vm1, %v3461_v37 }
 0xc6b   :  { %5998 = vmatprep.mubr.msk.f32.mxu0 %vm200_vm1, %v3462_v18 }
 0xc6e   :  { %5999 = vmatmul.mubr.msk.f32.gmra.mrb[64].mxu0 %vm200_vm1, %v3463_v38 }
 0xc6f   :  { %6483 = vmatpush3.bf16.xpose.msk.msra.mxu0 %vm7276_vm2, %v8142_v53  ;;  %6034 = vmatprep.mubr.msk.f32.mxu0 %vm200_vm1, %v3768_v24  ;;  %v3772_v53 = vmul.f32 %v2616_v20, %v7269_v8 }
 0xc70   :  { %6486 = vmatprep.subr.msk.bf16.mxu0 %vm7276_vm2, %v8153_v50 }
 0xc77   :  { %6489 = vmatpush3.bf16.xpose.msk.msra.mxu0 %vm7276_vm2, %v8153_v50  ;;  %v3773_v50 = vmul.f32 %v2621_v14, %v7269_v8 }
 0xc7e   :  { %6035 = vmatmul.mubr.msk.f32.vlgmr.msra.gmra.mrb[66].mxu0 %vm200_vm1, %v3769_v4 }
 0xc7f   :  { %6037 = vmatprep.mubr.msk.f32.mxu0 %vm200_vm1, %v3770_v25 }
 0xc82   :  { %6038 = vmatmul.mubr.msk.f32.gmra.mrb[68].mxu0 %vm200_vm1, %v3771_v63 }
 0xc83   :  { %6040 = vmatprep.mubr.msk.f32.mxu0 %vm200_vm1, %v3772_v53 }
 0xc86   :  { %6041 = vmatmul.mubr.msk.f32.gmra.mrb[70].mxu0 %vm200_vm1, %v3773_v50 }
 0xd20   :  { %v5910_v54 = vpop.f32.mrb[36].mxu1  ;;  %v5931_v60 = vpop.f32.mrb[54].mxu0 }
 0xd21   :  { %v8326_v39 = vadd.f32 %v8323_v46, %v5931_v60  ;;  %v2940_v47 = vpop.f32.mrb[37].mxu1  ;;  %v3131_v2 = vpop.f32.mrb[55].mxu0  ;;  %v8377_v41 = vadd.f32 %v8323_v46, %v5910_v54 }
 0xd22   :  { %v8334_v8 = vadd.f32 %v8331_v16, %v3131_v2  ;;  %v8382_v35 = vadd.f32 %v8331_v16, %v2940_v47 }
 0xd23   :  { %v3163_v1 = vsel %vm77_vm0, %v8326_v39, -inf  ;;  %v2972_v37 = vsel %vm77_vm0, %v8377_v41, -inf }
 0xd24   :  { %3164 = vmax.xlane.f32.xlu1 %v3163_v1  ;;  %v5913_v57 = vpop.f32.mrb[38].mxu1  ;;  %v5934_v58 = vpop.f32.mrb[56].mxu0  ;;  %v3160_v21 = vsel %vm77_vm0, %v8334_v8, -inf  ;;  %v2969_v38 = vsel %vm77_vm0, %v8382_v35, -inf }
 0xd25   :  { %v8346_v0 = vadd.f32 %v8343_v36, %v5934_v58  ;;  %v3141_v56 = vpop.f32.mrb[57].mxu0  ;;  %3161 = vmax.xlane.f32.xlu0 %v3160_v21  ;;  %v2950_v19 = vpop.f32.mrb[39].mxu1  ;;  %v8387_v23 = vadd.f32 %v8343_v36, %v5913_v57 }
 0xd26   :  { %v8354_v51 = vadd.f32 %v8351_v29, %v3141_v56  ;;  %v8392_v18 = vadd.f32 %v8351_v29, %v2950_v19 }
 0xd27   :  { %v3169_v27 = vsel %vm77_vm0, %v8346_v0, -inf  ;;  %v2978_v4 = vsel %vm77_vm0, %v8387_v23, -inf }
 0xd28   :  { %3170 = vmax.xlane.f32.xlu1 %v3169_v27  ;;  %v5916_v26 = vpop.f32.mrb[40].mxu1  ;;  %v5937_v20 = vpop.f32.mrb[58].mxu0  ;;  %v3166_v5 = vsel %vm77_vm0, %v8354_v51, -inf  ;;  %v2975_v63 = vsel %vm77_vm0, %v8392_v18, -inf }
 0xd29   :  { %v8366_v14 = vadd.f32 %v8363_v55, %v5937_v20  ;;  %3167 = vmax.xlane.f32.xlu0 %v3166_v5  ;;  %v2960_v62 = vpop.f32.mrb[41].mxu1  ;;  %v3151_v13 = vpop.f32.mrb[59].mxu0  ;;  %v8397_v24 = vadd.f32 %v8363_v55, %v5916_v26 }
 0xd2a   :  { %v8374_v59 = vadd.f32 %v8371_v34, %v3151_v13  ;;  %v8402_v25 = vadd.f32 %v8371_v34, %v2960_v62 }
 0xd2b   :  { %v3175_v15 = vsel %vm77_vm0, %v8366_v14, -inf  ;;  %v2984_v53 = vsel %vm77_vm0, %v8397_v24, -inf }
 0xd2c   :  { %3176 = vmax.xlane.f32.xlu1 %v3175_v15  ;;  %v3172_v22 = vsel %vm77_vm0, %v8374_v59, -inf  ;;  %v2981_v50 = vsel %vm77_vm0, %v8402_v25, -inf }
 0xd2d   :  { %3173 = vmax.xlane.f32.xlu0 %v3172_v22 }
 0xd30   :  { %2973 = vmax.xlane.f32.xlu1 %v2972_v37 }
 0xd31   :  { %2970 = vmax.xlane.f32.xlu0 %v2969_v38 }
 0xd34   :  { %2979 = vmax.xlane.f32.xlu1 %v2978_v4 }
 0xd35   :  { %2976 = vmax.xlane.f32.xlu0 %v2975_v63 }
 0xd38   :  { %2985 = vmax.xlane.f32.xlu1 %v2984_v53 }
 0xd39   :  { %v5994_v54 = vpop.f32.mrb[60].mxu0  ;;  %2982 = vmax.xlane.f32.xlu0 %v2981_v50 }
 0xd3a   :  { %v8411_v60 = vadd.f32 %v8323_v46, %v5994_v54  ;;  %v3548_v47 = vpop.f32.mrb[61].mxu0 }
 0xd3b   :  { %v8414_v2 = vadd.f32 %v8331_v16, %v3548_v47 }
 0xd3c   :  { %v3580_v1 = vsel %vm77_vm0, %v8411_v60, -inf }
 0xd3d   :  { %v5997_v57 = vpop.f32.mrb[62].mxu0  ;;  %3581 = vmax.xlane.f32.xlu1 %v3580_v1  ;;  %v3577_v58 = vsel %vm77_vm0, %v8414_v2, -inf }
 0xd3e   :  { %v8421_v21 = vadd.f32 %v8343_v36, %v5997_v57  ;;  %v3558_v56 = vpop.f32.mrb[63].mxu0  ;;  %3578 = vmax.xlane.f32.xlu0 %v3577_v58 }
 0xd3f   :  { %v8424_v19 = vadd.f32 %v8351_v29, %v3558_v56 }
 0xd40   :  { %v3586_v27 = vsel %vm77_vm0, %v8421_v21, -inf }
 0xd41   :  { %v6000_v26 = vpop.f32.mrb[64].mxu0  ;;  %3587 = vmax.xlane.f32.xlu1 %v3586_v27  ;;  %v3583_v20 = vsel %vm77_vm0, %v8424_v19, -inf }
 0xd42   :  { %v8431_v5 = vadd.f32 %v8363_v55, %v6000_v26  ;;  %v3568_v62 = vpop.f32.mrb[65].mxu0  ;;  %3584 = vmax.xlane.f32.xlu0 %v3583_v20 }
 0xd43   :  { %v8434_v13 = vadd.f32 %v8371_v34, %v3568_v62 }
 0xd44   :  { %v3592_v15 = vsel %vm77_vm0, %v8431_v5, -inf }
 0xd45   :  { %3593 = vmax.xlane.f32.xlu1 %v3592_v15  ;;  %v3589_v22 = vsel %vm77_vm0, %v8434_v13, -inf }
 0xd46   :  { %3590 = vmax.xlane.f32.xlu0 %v3589_v22 }
 0xd51   :  { %v6036_v37 = vpop.f32.mrb[66].mxu0 }
 0xd52   :  { %v8441_v38 = vadd.f32 %v8323_v46, %v6036_v37  ;;  %v3858_v4 = vpop.f32.mrb[67].mxu0 }
 0xd53   :  { %v8444_v63 = vadd.f32 %v8331_v16, %v3858_v4 }
 0xd54   :  { %v3890_v53 = vsel %vm77_vm0, %v8441_v38, -inf }
 0xd55   :  { %v6039_v50 = vpop.f32.mrb[68].mxu0  ;;  %3891 = vmax.xlane.f32.xlu1 %v3890_v53  ;;  %v3887_v54 = vsel %vm77_vm0, %v8444_v63, -inf }
 0xd56   :  { %v8451_v47 = vadd.f32 %v8343_v36, %v6039_v50  ;;  %v3868_v1 = vpop.f32.mrb[69].mxu0  ;;  %3888 = vmax.xlane.f32.xlu0 %v3887_v54 }
 0xd57   :  { %v8454_v46 = vadd.f32 %v8351_v29, %v3868_v1 }
 0xd58   :  { %v3896_v16 = vsel %vm77_vm0, %v8451_v47, -inf }
 0xd59   :  { %v6042_v57 = vpop.f32.mrb[70].mxu0  ;;  %3897 = vmax.xlane.f32.xlu1 %v3896_v16  ;;  %v3893_v58 = vsel %vm77_vm0, %v8454_v46, -inf }
 0xd5a   :  { %v8461_v56 = vadd.f32 %v8363_v55, %v6042_v57  ;;  %v3878_v27 = vpop.f32.mrb[71].mxu0  ;;  %3894 = vmax.xlane.f32.xlu0 %v3893_v58 }
 0xd5b   :  { %v8464_v36 = vadd.f32 %v8371_v34, %v3878_v27 }
 0xd5c   :  { %v3902_v29 = vsel %vm77_vm0, %v8461_v56, -inf }
 0xd5d   :  { %3903 = vmax.xlane.f32.xlu1 %v3902_v29  ;;  %v3899_v26 = vsel %vm77_vm0, %v8464_v36, -inf }
 0xd5e   :  { %3900 = vmax.xlane.f32.xlu0 %v3899_v26 }
 0xdb1   :  { %v3165_v20 = vpop.xlane.xlu1 %3164 }
 0xdb2   :  { %v3179_v62 = vsub.f32 %v8326_v39, %v3165_v20  ;;  %v3162_v15 = vpop.xlane.xlu0 %3161 }
 0xdb3   :  { %v3178_v55 = vsub.f32 %v8334_v8, %v3162_v15 }
 0xdb4   :  { %v3186_v22 = vmul.f32 1.442695, %v3179_v62 }
 0xdb5   :  { %v3184_v37 = vmul.f32 1.442695, %v3178_v55  ;;  %v3171_v4 = vpop.xlane.xlu1 %3170 }
 0xdb6   :  { %6759 = vpow2.f32 %v3186_v22  ;;  %v3181_v34 = vsub.f32 %v8346_v0, %v3171_v4  ;;  %v3168_v53 = vpop.xlane.xlu0 %3167 }
 0xdb7   :  { %6761 = vpow2.f32 %v3184_v37  ;;  %v3180_v50 = vsub.f32 %v8354_v51, %v3168_v53 }
 0xdb8   :  { %v3190_v54 = vmul.f32 1.442695, %v3181_v34 }
 0xdb9   :  { %v3188_v1 = vmul.f32 1.442695, %v3180_v50  ;;  %v3177_v16 = vpop.xlane.xlu1 %3176 }
 0xdba   :  { %6763 = vpow2.f32 %v3190_v54  ;;  %v3183_v57 = vsub.f32 %v8366_v14, %v3177_v16  ;;  %v3174_v39 = vpop.xlane.xlu0 %3173 }
 0xdbb   :  { %6765 = vpow2.f32 %v3188_v1  ;;  %v3182_v8 = vsub.f32 %v8374_v59, %v3174_v39 }
 0xdbc   :  { %v3194_v58 = vmul.f32 1.442695, %v3183_v57 }
 0xdbd   :  { %v3192_v27 = vmul.f32 1.442695, %v3182_v8  ;;  %v2974_v29 = vpop.xlane.xlu1 %2973 }
 0xdbe   :  { %6767 = vpow2.f32 %v3194_v58  ;;  %v2988_v0 = vsub.f32 %v8377_v41, %v2974_v29  ;;  %v2971_v26 = vpop.xlane.xlu0 %2970 }
 0xdbf   :  { %6769 = vpow2.f32 %v3192_v27  ;;  %v2987_v51 = vsub.f32 %v8382_v35, %v2971_v26 }
 0xdc0   :  { %v8478_v20 = vpop.eup %6759  ;;  %v2995_v62 = vmul.f32 1.442695, %v2988_v0 }
 0xdc1   :  { %v8480_v15 = vpop.eup %6761  ;;  %v2993_v14 = vmul.f32 1.442695, %v2987_v51  ;;  %v2980_v55 = vpop.xlane.xlu1 %2979  ;;  %v3199_v59 = vsel %vm77_vm0, %v8478_v20, 0.0 }
 0xdc2   :  { %6771 = vpow2.f32 %v2995_v62  ;;  %v2990_v22 = vsub.f32 %v8387_v23, %v2980_v55  ;;  %v2977_v37 = vpop.xlane.xlu0 %2976  ;;  %3200 = vadd.xlane.f32.xlu1 %v3199_v59  ;;  %v3196_v41 = vsel %vm77_vm0, %v8480_v15, 0.0 }
 0xdc3   :  { %6773 = vpow2.f32 %v2993_v14  ;;  %v2989_v35 = vsub.f32 %v8392_v18, %v2977_v37  ;;  %3197 = vadd.xlane.f32.xlu0 %v3196_v41 }
 0xdc4   :  { %v8488_v4 = vpop.eup %6763  ;;  %v2999_v34 = vmul.f32 1.442695, %v2990_v22 }
 0xdc5   :  { %v8490_v53 = vpop.eup %6765  ;;  %v2997_v50 = vmul.f32 1.442695, %v2989_v35  ;;  %v2986_v54 = vpop.xlane.xlu1 %2985  ;;  %v3205_v1 = vsel %vm77_vm0, %v8488_v4, 0.0 }
 0xdc6   :  { %6775 = vpow2.f32 %v2999_v34  ;;  %v2992_v23 = vsub.f32 %v8397_v24, %v2986_v54  ;;  %3206 = vadd.xlane.f32.xlu1 %v3205_v1  ;;  %v2983_v16 = vpop.xlane.xlu0 %2982  ;;  %v3202_v57 = vsel %vm77_vm0, %v8490_v53, 0.0 }
 0xdc7   :  { %6777 = vpow2.f32 %v2997_v50  ;;  %v2991_v18 = vsub.f32 %v8402_v25, %v2983_v16  ;;  %3203 = vadd.xlane.f32.xlu0 %v3202_v57 }
 0xdc8   :  { %v8498_v39 = vpop.eup %6767  ;;  %v3003_v8 = vmul.f32 1.442695, %v2992_v23 }
 0xdc9   :  { %v8500_v58 = vpop.eup %6769  ;;  %v3001_v27 = vmul.f32 1.442695, %v2991_v18  ;;  %v3211_v29 = vsel %vm77_vm0, %v8498_v39, 0.0 }
 0xdca   :  { %6779 = vpow2.f32 %v3003_v8  ;;  %v3582_v24 = vpop.xlane.xlu1 %3581  ;;  %3212 = vadd.xlane.f32.xlu1 %v3211_v29  ;;  %v3208_v0 = vsel %vm77_vm0, %v8500_v58, 0.0 }
 0xdcb   :  { %6781 = vpow2.f32 %v3001_v27  ;;  %v3596_v26 = vsub.f32 %v8411_v60, %v3582_v24  ;;  %v3579_v25 = vpop.xlane.xlu0 %3578  ;;  %3209 = vadd.xlane.f32.xlu0 %v3208_v0 }
 0xdcc   :  { %v8507_v51 = vpop.eup %6771  ;;  %v3595_v62 = vsub.f32 %v8414_v2, %v3579_v25 }
 0xdcd   :  { %v8510_v14 = vpop.eup %6773  ;;  %v3603_v55 = vmul.f32 1.442695, %v3596_v26  ;;  %v3008_v59 = vsel %vm77_vm0, %v8507_v51, 0.0 }
 0xdce   :  { %v3601_v22 = vmul.f32 1.442695, %v3595_v62  ;;  %v3588_v37 = vpop.xlane.xlu1 %3587  ;;  %3009 = vadd.xlane.f32.xlu1 %v3008_v59  ;;  %v3005_v41 = vsel %vm77_vm0, %v8510_v14, 0.0 }
 0xdcf   :  { %6783 = vpow2.f32 %v3603_v55  ;;  %v3598_v60 = vsub.f32 %v8421_v21, %v3588_v37  ;;  %v3585_v35 = vpop.xlane.xlu0 %3584  ;;  %3006 = vadd.xlane.f32.xlu0 %v3005_v41 }
 0xdd0   :  { %v8517_v34 = vpop.eup %6775  ;;  %6785 = vpow2.f32 %v3601_v22  ;;  %v3597_v2 = vsub.f32 %v8424_v19, %v3585_v35 }
 0xdd1   :  { %v8520_v50 = vpop.eup %6777  ;;  %v3607_v54 = vmul.f32 1.442695, %v3598_v60  ;;  %v3014_v1 = vsel %vm77_vm0, %v8517_v34, 0.0 }
 0xdd2   :  { %v3605_v23 = vmul.f32 1.442695, %v3597_v2  ;;  %v3594_v16 = vpop.xlane.xlu1 %3593  ;;  %3015 = vadd.xlane.f32.xlu1 %v3014_v1  ;;  %v3011_v57 = vsel %vm77_vm0, %v8520_v50, 0.0 }
 0xdd3   :  { %6787 = vpow2.f32 %v3607_v54  ;;  %v3600_v21 = vsub.f32 %v8431_v5, %v3594_v16  ;;  %v3591_v18 = vpop.xlane.xlu0 %3590  ;;  %3012 = vadd.xlane.f32.xlu0 %v3011_v57 }
 0xdd4   :  { %v8527_v8 = vpop.eup %6779  ;;  %6789 = vpow2.f32 %v3605_v23  ;;  %v3599_v19 = vsub.f32 %v8434_v13, %v3591_v18 }
 0xdd5   :  { %v8530_v27 = vpop.eup %6781  ;;  %v3611_v29 = vmul.f32 1.442695, %v3600_v21  ;;  %v3020_v24 = vsel %vm77_vm0, %v8527_v8, 0.0 }
 0xdd6   :  { %v3609_v0 = vmul.f32 1.442695, %v3599_v19  ;;  %3021 = vadd.xlane.f32.xlu1 %v3020_v24  ;;  %v3017_v26 = vsel %vm77_vm0, %v8530_v27, 0.0 }
 0xdd7   :  { %6791 = vpow2.f32 %v3611_v29  ;;  %3018 = vadd.xlane.f32.xlu0 %v3017_v26 }
 0xdd8   :  { %6793 = vpow2.f32 %v3609_v0 }
 0xdd9   :  { %v8536_v5 = vpop.eup %6783 }
 0xdda   :  { %v8538_v25 = vpop.eup %6785  ;;  %v3616_v13 = vsel %vm77_vm0, %v8536_v5, 0.0 }
 0xddb   :  { %3617 = vadd.xlane.f32.xlu1 %v3616_v13  ;;  %v3613_v62 = vsel %vm77_vm0, %v8538_v25, 0.0 }
 0xddc   :  { %3614 = vadd.xlane.f32.xlu0 %v3613_v62 }
 0xddd   :  { %v8544_v55 = vpop.eup %6787 }
 0xdde   :  { %v8546_v59 = vpop.eup %6789  ;;  %v3622_v22 = vsel %vm77_vm0, %v8544_v55, 0.0 }
 0xddf   :  { %3623 = vadd.xlane.f32.xlu1 %v3622_v22  ;;  %v3619_v37 = vsel %vm77_vm0, %v8546_v59, 0.0 }
 0xde0   :  { %3620 = vadd.xlane.f32.xlu0 %v3619_v37 }
 0xde1   :  { %v8552_v41 = vpop.eup %6791 }
 0xde2   :  { %v8554_v60 = vpop.eup %6793  ;;  %v3892_v35 = vpop.xlane.xlu1 %3891  ;;  %v3628_v2 = vsel %vm77_vm0, %v8552_v41, 0.0 }
 0xde3   :  { %v3906_v54 = vsub.f32 %v8441_v38, %v3892_v35  ;;  %3629 = vadd.xlane.f32.xlu1 %v3628_v2  ;;  %v3889_v1 = vpop.xlane.xlu0 %3888  ;;  %v3625_v23 = vsel %vm77_vm0, %v8554_v60, 0.0 }
 0xde4   :  { %v3905_v16 = vsub.f32 %v8444_v63, %v3889_v1  ;;  %3626 = vadd.xlane.f32.xlu0 %v3625_v23 }
 0xde5   :  { %v3913_v57 = vmul.f32 1.442695, %v3906_v54 }
 0xde6   :  { %v3911_v21 = vmul.f32 1.442695, %v3905_v16  ;;  %v3898_v18 = vpop.xlane.xlu1 %3897 }
 0xde7   :  { %6795 = vpow2.f32 %v3913_v57  ;;  %v3908_v19 = vsub.f32 %v8451_v47, %v3898_v18  ;;  %v3895_v29 = vpop.xlane.xlu0 %3894 }
 0xde8   :  { %6797 = vpow2.f32 %v3911_v21  ;;  %v3907_v24 = vsub.f32 %v8454_v46, %v3895_v29 }
 0xde9   :  { %v3917_v0 = vmul.f32 1.442695, %v3908_v19 }
 0xdea   :  { %v3915_v38 = vmul.f32 1.442695, %v3907_v24  ;;  %v3904_v26 = vpop.xlane.xlu1 %3903 }
 0xdeb   :  { %6799 = vpow2.f32 %v3917_v0  ;;  %v3910_v13 = vsub.f32 %v8461_v56, %v3904_v26  ;;  %v3901_v62 = vpop.xlane.xlu0 %3900 }
 0xdec   :  { %6801 = vpow2.f32 %v3915_v38  ;;  %v3909_v63 = vsub.f32 %v8464_v36, %v3901_v62 }
 0xded   :  { %v3921_v22 = vmul.f32 1.442695, %v3910_v13 }
 0xdee   :  { %v3919_v37 = vmul.f32 1.442695, %v3909_v63 }
 0xdef   :  { %6803 = vpow2.f32 %v3921_v22 }
 0xdf0   :  { %6805 = vpow2.f32 %v3919_v37 }
 0xdf1   :  { %v8566_v35 = vpop.eup %6795 }
 0xdf2   :  { %v8568_v47 = vpop.eup %6797  ;;  %v3926_v46 = vsel %vm77_vm0, %v8566_v35, 0.0 }
 0xdf3   :  { %3927 = vadd.xlane.f32.xlu1 %v3926_v46  ;;  %v3923_v2 = vsel %vm77_vm0, %v8568_v47, 0.0 }
 0xdf4   :  { %3924 = vadd.xlane.f32.xlu0 %v3923_v2 }
 0xdf5   :  { %v8574_v56 = vpop.eup %6799 }
 0xdf6   :  { %v8576_v54 = vpop.eup %6801  ;;  %v3932_v36 = vsel %vm77_vm0, %v8574_v56, 0.0 }
 0xdf7   :  { %3933 = vadd.xlane.f32.xlu1 %v3932_v36  ;;  %v3929_v1 = vsel %vm77_vm0, %v8576_v54, 0.0 }
 0xdf8   :  { %3930 = vadd.xlane.f32.xlu0 %v3929_v1 }
 0xdf9   :  { %v8582_v23 = vpop.eup %6803 }
 0xdfa   :  { %v8584_v16 = vpop.eup %6805  ;;  %v3938_v57 = vsel %vm77_vm0, %v8582_v23, 0.0 }
 0xdfb   :  { %3939 = vadd.xlane.f32.xlu1 %v3938_v57  ;;  %v3935_v21 = vsel %vm77_vm0, %v8584_v16, 0.0 }
 0xdfc   :  { %3936 = vadd.xlane.f32.xlu0 %v3935_v21 }
 0xe4f   :  { %v3201_v18 = vpop.xlane.xlu1 %3200 }
 0xe50   :  { %6807 = vrcp.f32 %v3201_v18  ;;  %v3198_v19 = vpop.xlane.xlu0 %3197 }
 0xe51   :  { %6809 = vrcp.f32 %v3198_v19 }
 0xe53   :  { %v3207_v29 = vpop.xlane.xlu1 %3206 }
 0xe54   :  { %6811 = vrcp.f32 %v3207_v29  ;;  %v3204_v24 = vpop.xlane.xlu0 %3203 }
 0xe55   :  { %6813 = vrcp.f32 %v3204_v24 }
 0xe57   :  { %v3213_v0 = vpop.xlane.xlu1 %3212 }
 0xe58   :  { %6815 = vrcp.f32 %v3213_v0  ;;  %v3210_v38 = vpop.xlane.xlu0 %3209 }
 0xe59   :  { %6817 = vrcp.f32 %v3210_v38 }
 0xe5a   :  { %v6808_v26 = vpop.eup %6807 }
 0xe5b   :  { %v6810_v13 = vpop.eup %6809  ;;  %v3010_v62 = vpop.xlane.xlu1 %3009  ;;  %v3221_v37 = vmul.f32 %v6808_v26, %v8478_v20 }
 0xe5c   :  { %6819 = vrcp.f32 %v3010_v62  ;;  %v3007_v63 = vpop.xlane.xlu0 %3006  ;;  %v3220_v22 = vmul.f32 %v6810_v13, %v8480_v15 }
 0xe5d   :  { %6821 = vrcp.f32 %v3007_v63 }
 0xe5e   :  { %v6812_v46 = vpop.eup %6811  ;;  %5950 = vmatprep.mubr.msk.f32.mxu1 %vm77_vm0, %v3220_v22 }
 0xe5f   :  { %v6814_v2 = vpop.eup %6813  ;;  %v3016_v36 = vpop.xlane.xlu1 %3015  ;;  %5951 = vmatmul.mubr.msk.f32.vlgmr.msra.gmra.mrb[42].mxu1 %vm77_vm0, %v3221_v37  ;;  %v3223_v15 = vmul.f32 %v6812_v46, %v8488_v4 }
 0xe60   :  { %6823 = vrcp.f32 %v3016_v36  ;;  %6433 = vmatpush3.bf16.msra.mxu1 %v8175_v31  ;;  %v3013_v1 = vpop.xlane.xlu0 %3012  ;;  %v3222_v57 = vmul.f32 %v6814_v2, %v8490_v53 }
 0xe61   :  { %6435 = vmatprep.subr.bf16.mxu1 %v8193_v12  ;;  %6825 = vrcp.f32 %v3013_v1 }
 0xe62   :  { %v6816_v20 = vpop.eup %6815  ;;  %5953 = vmatprep.mubr.msk.f32.mxu1 %vm77_vm0, %v3222_v57 }
 0xe63   :  { %v6818_v21 = vpop.eup %6817  ;;  %v3022_v18 = vpop.xlane.xlu1 %3021  ;;  %5954 = vmatmul.mubr.msk.f32.gmra.mrb[44].mxu1 %vm77_vm0, %v3223_v15  ;;  %v3225_v53 = vmul.f32 %v6816_v20, %v8498_v39 }
 0xe64   :  { %6827 = vrcp.f32 %v3022_v18  ;;  %6437 = vmatpush3.bf16.msra.mxu1 %v8193_v12  ;;  %v3019_v19 = vpop.xlane.xlu0 %3018  ;;  %v3224_v31 = vmul.f32 %v6818_v21, %v8500_v58  ;;  %v5127_v18 = vld [vmem:[%s8952_s6 + $0x30] sm:$0xff] }
 0xe65   :  { %6439 = vmatprep.subr.bf16.mxu1 %v8220_v30  ;;  %6829 = vrcp.f32 %v3019_v19 }
 0xe66   :  { %v6820_v29 = vpop.eup %6819  ;;  %5956 = vmatprep.mubr.msk.f32.mxu1 %vm77_vm0, %v3224_v31 }
 0xe67   :  { %v6822_v4 = vpop.eup %6821  ;;  %5957 = vmatmul.mubr.msk.f32.gmra.mrb[46].mxu1 %vm77_vm0, %v3225_v53  ;;  %v3030_v12 = vmul.f32 %v6820_v29, %v8507_v51 }
 0xe68   :  { %v3618_v24 = vpop.xlane.xlu1 %3617  ;;  %6441 = vmatpush3.bf16.msra.mxu1 %v8220_v30  ;;  %v3029_v0 = vmul.f32 %v6822_v4, %v8510_v14 }
 0xe69   :  { %6831 = vrcp.f32 %v3618_v24  ;;  %6461 = vmatprep.subr.bf16.mxu1 %v8177_v3  ;;  %v3615_v58 = vpop.xlane.xlu0 %3614 }
 0xe6a   :  { %v6824_v38 = vpop.eup %6823  ;;  %6833 = vrcp.f32 %v3615_v58  ;;  %5971 = vmatprep.mubr.msk.f32.mxu1 %vm77_vm0, %v3029_v0 }
 0xe6b   :  { %v6826_v39 = vpop.eup %6825  ;;  %5972 = vmatmul.mubr.msk.f32.vlgmr.msra.gmra.mrb[42].mxu1 %vm77_vm0, %v3030_v12  ;;  %v3032_v14 = vmul.f32 %v6824_v38, %v8517_v34 }
 0xe6c   :  { %v3624_v26 = vpop.xlane.xlu1 %3623  ;;  %6463 = vmatpush3.bf16.msra.mxu1 %v8177_v3  ;;  %v3031_v30 = vmul.f32 %v6826_v39, %v8520_v50 }
 0xe6d   :  { %6835 = vrcp.f32 %v3624_v26  ;;  %6465 = vmatprep.subr.bf16.mxu1 %v8195_v52  ;;  %v3621_v51 = vpop.xlane.xlu0 %3620 }
 0xe6e   :  { %v6828_v13 = vpop.eup %6827  ;;  %6837 = vrcp.f32 %v3621_v51  ;;  %5974 = vmatprep.mubr.msk.f32.mxu1 %vm77_vm0, %v3031_v30 }
 0xe6f   :  { %v6830_v62 = vpop.eup %6829  ;;  %5975 = vmatmul.mubr.msk.f32.gmra.mrb[44].mxu1 %vm77_vm0, %v3032_v14  ;;  %v3034_v22 = vmul.f32 %v6828_v13, %v8527_v8 }
 0xe70   :  { %v3630_v63 = vpop.xlane.xlu1 %3629  ;;  %6467 = vmatpush3.bf16.msra.mxu1 %v8195_v52  ;;  %v3033_v3 = vmul.f32 %v6830_v62, %v8530_v27 }
 0xe71   :  { %6839 = vrcp.f32 %v3630_v63  ;;  %6469 = vmatprep.subr.bf16.mxu1 %v8222_v6  ;;  %v3627_v50 = vpop.xlane.xlu0 %3626 }
 0xe72   :  { %6841 = vrcp.f32 %v3627_v50  ;;  %5977 = vmatprep.mubr.msk.f32.mxu1 %vm77_vm0, %v3033_v3 }
 0xe73   :  { %v6832_v34 = vpop.eup %6831  ;;  %5978 = vmatmul.mubr.msk.f32.gmra.mrb[46].mxu1 %vm77_vm0, %v3034_v22 }
 0xe74   :  { %v6834_v37 = vpop.eup %6833  ;;  %6471 = vmatpush3.bf16.msra.mxu1 %v8222_v6  ;;  %v3638_v27 = vmul.f32 %v6832_v34, %v8536_v5  ;;  %v5125_v5 = vld [vmem:[%s8952_s6 + $0x20] sm:$0xff] }
 0xe75   :  { %6491 = vmatprep.subr.bf16.mxu1 %v8182_v43  ;;  %v3637_v52 = vmul.f32 %v6834_v37, %v8538_v25  ;;  %v5126_v25 = vld [vmem:[%s8952_s6 + $0x28] sm:$0xff] }
 0xe77   :  { %v6836_v46 = vpop.eup %6835  ;;  %6013 = vmatprep.mubr.msk.f32.mxu1 %vm77_vm0, %v3637_v52 }
 0xe78   :  { %v6838_v2 = vpop.eup %6837  ;;  %6014 = vmatmul.mubr.msk.f32.vlgmr.msra.gmra.mrb[42].mxu1 %vm77_vm0, %v3638_v27  ;;  %v3640_v6 = vmul.f32 %v6836_v46, %v8544_v55 }
 0xe79   :  { %6493 = vmatpush3.bf16.msra.mxu1 %v8182_v43  ;;  %v3639_v8 = vmul.f32 %v6838_v2, %v8546_v59  ;;  %v6502_v59 = vpack.c.bf16 %v5126_v25, %v5125_v5 }
 0xe7a   :  { %6495 = vmatprep.subr.bf16.mxu1 %v8216_v44 }
 0xe7b   :  { %v6840_v36 = vpop.eup %6839  ;;  %6016 = vmatprep.mubr.msk.f32.mxu1 %vm77_vm0, %v3639_v8 }
 0xe7c   :  { %v6842_v1 = vpop.eup %6841  ;;  %6017 = vmatmul.mubr.msk.f32.gmra.mrb[44].mxu1 %vm77_vm0, %v3640_v6  ;;  %v3642_v55 = vmul.f32 %v6840_v36, %v8552_v41 }
 0xe7d   :  { %6497 = vmatpush3.bf16.msra.mxu1 %v8216_v44  ;;  %v3641_v43 = vmul.f32 %v6842_v1, %v8554_v60 }
 0xe7e   :  { %6499 = vmatprep.subr.bf16.mxu1 %v8224_v61 }
 0xe7f   :  { %6019 = vmatprep.mubr.msk.f32.mxu1 %vm77_vm0, %v3641_v43 }
 0xe80   :  { %v3928_v57 = vpop.xlane.xlu1 %3927  ;;  %6020 = vmatmul.mubr.msk.f32.gmra.mrb[46].mxu1 %vm77_vm0, %v3642_v55 }
 0xe81   :  { %6843 = vrcp.f32 %v3928_v57  ;;  %6501 = vmatpush3.bf16.msra.mxu1 %v8224_v61  ;;  %v3925_v15 = vpop.xlane.xlu0 %3924  ;;  %v5128_v61 = vld [vmem:[%s8952_s6 + $0x38] sm:$0xff] }
 0xe82   :  { %6845 = vrcp.f32 %v3925_v15  ;;  %6503 = vmatprep.subr.bf16.mxu1 %v6502_v59  ;;  %v6506_v29 = vpack.c.bf16 %v5128_v61, %v5127_v18 }
 0xe84   :  { %v3934_v20 = vpop.xlane.xlu1 %3933 }
 0xe85   :  { %6847 = vrcp.f32 %v3934_v20  ;;  %v3931_v44 = vpop.xlane.xlu0 %3930 }
 0xe86   :  { %6849 = vrcp.f32 %v3931_v44 }
 0xe88   :  { %v3940_v60 = vpop.xlane.xlu1 %3939 }
 0xe89   :  { %6851 = vrcp.f32 %v3940_v60  ;;  %v3937_v21 = vpop.xlane.xlu0 %3936 }
 0xe8a   :  { %6853 = vrcp.f32 %v3937_v21 }
 0xe8b   :  { %v6844_v41 = vpop.eup %6843 }
 0xe8c   :  { %v6846_v19 = vpop.eup %6845  ;;  %v3948_v53 = vmul.f32 %v6844_v41, %v8566_v35 }
 0xe8d   :  { %v3947_v31 = vmul.f32 %v6846_v19, %v8568_v47 }
 0xe8f   :  { %v6848_v4 = vpop.eup %6847  ;;  %6055 = vmatprep.mubr.msk.f32.mxu1 %vm77_vm0, %v3947_v31 }
 0xe90   :  { %v6850_v24 = vpop.eup %6849  ;;  %6056 = vmatmul.mubr.msk.f32.vlgmr.msra.gmra.mrb[42].mxu1 %vm77_vm0, %v3948_v53  ;;  %v3950_v12 = vmul.f32 %v6848_v4, %v8574_v56 }
 0xe91   :  { %v3949_v0 = vmul.f32 %v6850_v24, %v8576_v54  ;;  %6505 = vmatpush3.bf16.msra.mxu1 %v6502_v59 }
 0xe92   :  { %6507 = vmatprep.subr.bf16.mxu1 %v6506_v29 }
 0xe93   :  { %v6852_v58 = vpop.eup %6851  ;;  %6058 = vmatprep.mubr.msk.f32.mxu1 %vm77_vm0, %v3949_v0 }
 0xe94   :  { %v6854_v38 = vpop.eup %6853  ;;  %6059 = vmatmul.mubr.msk.f32.gmra.mrb[44].mxu1 %vm77_vm0, %v3950_v12  ;;  %v3952_v47 = vmul.f32 %v6852_v58, %v8582_v23  ;;  %v8676_v23 = vld [vmem:[%s8949_s10 + $0x10] sm:$0xff] }
 0xe95   :  { %v3951_v35 = vmul.f32 %v6854_v38, %v8584_v16  ;;  %6509 = vmatpush3.bf16.msra.mxu1 %v6506_v29  ;;  %v4205_v51 = vrot.slane %v8676_v23, %v2014_v45 }
 0xe97   :  { %6061 = vmatprep.mubr.msk.f32.mxu1 %vm77_vm0, %v3951_v35 }
 0xe98   :  { %6062 = vmatmul.mubr.msk.f32.gmra.mrb[46].mxu1 %vm77_vm0, %v3952_v47 }
 0xf63   :  { %v6057_v54 = vpop.f32.mrb[42].mxu1 }
 0xf64   :  { %v4043_v39 = vpop.f32.mrb[43].mxu1 }
 0xf65   :  { %6072 = vmatprep.mubr.msk.f32.mxu1 %vm200_vm1, %v4043_v39 }
 0xf66   :  { %6073 = vmatmul.mubr.msk.f32.vlgmr.msra.gmra.mrb[48].mxu1 %vm200_vm1, %v6057_v54 }
 0xf67   :  { %v6060_v56 = vpop.f32.mrb[44].mxu1 }
 0xf68   :  { %v4053_v26 = vpop.f32.mrb[45].mxu1 }
 0xf69   :  { %6075 = vmatprep.mubr.msk.f32.mxu1 %vm200_vm1, %v4053_v26 }
 0xf6a   :  { %6076 = vmatmul.mubr.msk.f32.gmra.mrb[50].mxu1 %vm200_vm1, %v6060_v56 }
 0xf6b   :  { %v6063_v16 = vpop.f32.mrb[46].mxu1 }
 0xf6c   :  { %v4063_v30 = vpop.f32.mrb[47].mxu1 }
 0xf6d   :  { %6078 = vmatprep.mubr.msk.f32.mxu1 %vm200_vm1, %v4063_v30  ;;  %v5136_v30 = vld [vmem:[%s8953_s7 + $0x28] sm:$0xff] }
 0xf6e   :  { %6079 = vmatmul.mubr.msk.f32.gmra.mrb[52].mxu1 %vm200_vm1, %v6063_v16  ;;  %v5135_v16 = vld [vmem:[%s8953_s7 + $0x20] sm:$0xff] }
0x1039   :  { %v6074_v14 = vpop.f32.mrb[48].mxu1 }
0x103a   :  { %v4197_v13 = vadd.f32 %v6074_v14, %v7970_v48  ;;  %v4167_v62 = vpop.f32.mrb[49].mxu1  ;;  %v6510_v14 = vpack.c.bf16 %v5136_v30, %v5135_v16 }
0x103b   :  { %v4196_v63 = vadd.f32 %v4167_v62, %v7972_v7 }
0x103c   :  { %v8683_v3 = vadd.f32 %v4205_v51, %v4197_v13  ;;  %v5138_v13 = vld [vmem:[%s8953_s7 + $0x38] sm:$0xff]  ;;  %6511 = vmatprep.subr.bf16.mxu0 %v6510_v14 }
0x103d   :  { %v8685_v50 = vadd.f32 %v4205_v51, %v4196_v63  ;;  %v6077_v22 = vpop.f32.mrb[50].mxu1  ;;  %6513 = vmatpush3.bf16.msra.mxu0 %v6510_v14  ;;  %v5147_v63 = vld [vmem:[%s8954_s9 + $0x80] sm:$0xff] }
0x103e   :  { %v4199_v34 = vadd.f32 %v6077_v22, %v7980_v9  ;;  %v4177_v37 = vpop.f32.mrb[51].mxu1  ;;  %v4215_v52 = vsel %vm200_vm1, %v8683_v3, 0.0  ;;  %v5148_v22 = vld [vmem:[%s8954_s9 + $0x88] sm:$0xff] }
0x103f   :  { %v4198_v27 = vadd.f32 %v4177_v37, %v7982_v33  ;;  %4216 = vadd.xlane.f32.xlu1 %v4215_v52  ;;  %v4212_v45 = vsel %vm200_vm1, %v8685_v50, 0.0  ;;  %v6518_v37 = vpack.c.bf16 %v5148_v22, %v5147_v63  ;;  %v5150_v52 = vld [vmem:[%s8954_s9 + $0x98] sm:$0xff]  ;;  %v5155_v22 = vld [vmem:[%s8954_s9 + $0xc0] sm:$0xff] }
0x1040   :  { %v8693_v48 = vadd.f32 %v4205_v51, %v4199_v34  ;;  %4213 = vadd.xlane.f32.xlu0 %v4212_v45  ;;  %v5149_v34 = vld [vmem:[%s8954_s9 + $0x90] sm:$0xff]  ;;  %v5151_v45 = vld [vmem:[%s8954_s9 + $0xa0] sm:$0xff] }
0x1041   :  { %v8695_v7 = vadd.f32 %v4205_v51, %v4198_v27  ;;  %v6080_v46 = vpop.f32.mrb[52].mxu1  ;;  %v6522_v27 = vpack.c.bf16 %v5150_v52, %v5149_v34  ;;  %6519 = vmatprep.subr.bf16.mxu1 %v6518_v37  ;;  %v5156_v34 = vld [vmem:[%s8954_s9 + $0xc8] sm:$0xff]  ;;  %v5157_v52 = vld [vmem:[%s8954_s9 + $0xd0] sm:$0xff] }
0x1042   :  { %v4201_v2 = vadd.f32 %v6080_v46, %v7990_v10  ;;  %v4187_v8 = vpop.f32.mrb[53].mxu1  ;;  %v4221_v9 = vsel %vm200_vm1, %v8693_v48, 0.0  ;;  %v5152_v46 = vld [vmem:[%s8954_s9 + $0xa8] sm:$0xff]  ;;  %6521 = vmatpush3.bf16.msra.mxu1 %v6518_v37  ;;  %v6534_v37 = vpack.c.bf16 %v5156_v34, %v5155_v22  ;;  %v5163_v22 = vld [vmem:[%s8949_s10 + $0x18] ss:$0 sm:$0xff] }
0x1043   :  { %v4200_v6 = vadd.f32 %v4187_v8, %v7992_v28  ;;  %4222 = vadd.xlane.f32.xlu1 %v4221_v9  ;;  %v4218_v33 = vsel %vm200_vm1, %v8695_v7, 0.0  ;;  %6523 = vmatprep.subr.bf16.mxu1 %v6522_v27 }
0x1044   :  { %v8703_v36 = vadd.f32 %v4205_v51, %v4201_v2  ;;  %4219 = vadd.xlane.f32.xlu0 %v4218_v33  ;;  %v6526_v2 = vpack.c.bf16 %v5152_v46, %v5151_v45  ;;  %v5159_v46 = vld [vmem:[%s8954_s9 + $0xe0] sm:$0xff] }
0x1045   :  { %v8705_v5 = vadd.f32 %v4205_v51, %v4200_v6  ;;  %v5137_v51 = vld [vmem:[%s8953_s7 + $0x30] sm:$0xff] }
0x1046   :  { %v4227_v25 = vsel %vm200_vm1, %v8703_v36, 0.0  ;;  %v6514_v62 = vpack.c.bf16 %v5138_v13, %v5137_v51  ;;  %6525 = vmatpush3.bf16.msra.mxu1 %v6522_v27  ;;  %v5158_v27 = vld [vmem:[%s8954_s9 + $0xd8] sm:$0xff] }
0x1047   :  { %4228 = vadd.xlane.f32.xlu1 %v4227_v25  ;;  %v4224_v10 = vsel %vm200_vm1, %v8705_v5, 0.0  ;;  %6527 = vmatprep.subr.bf16.mxu1 %v6526_v2  ;;  %v6538_v45 = vpack.c.bf16 %v5158_v27, %v5157_v52 }
0x1048   :  { %4225 = vadd.xlane.f32.xlu0 %v4224_v10  ;;  %6515 = vmatprep.subr.bf16.mxu0 %v6514_v62 }
0x1049   :  { %6517 = vmatpush3.bf16.msra.mxu0 %v6514_v62 }
0x104a   :  { %6529 = vmatpush3.bf16.msra.mxu1 %v6526_v2  ;;  %v5160_v2 = vld [vmem:[%s8954_s9 + $0xe8] sm:$0xff] }
0x10cc   :  { %v4217_v1 = vpop.xlane.xlu1 %4216 }
0x10cd   :  { %v4231_v43 = vmul.f32 0.03125, %v4217_v1  ;;  %v4214_v28 = vpop.xlane.xlu0 %4213 }
0x10ce   :  { %v4230_v55 = vmul.f32 0.03125, %v4214_v28 }
0x10cf   :  { %v8712_v59 = vsub.f32 %v8683_v3, %v4231_v43 }
0x10d0   :  { %v8715_v57 = vsub.f32 %v8685_v50, %v4230_v55  ;;  %v4223_v15 = vpop.xlane.xlu1 %4222 }
0x10d1   :  { %v4233_v20 = vmul.f32 0.03125, %v4223_v15  ;;  %v4220_v44 = vpop.xlane.xlu0 %4219  ;;  %v4243_v60 = vmul.f32 %v8712_v59, %v8712_v59 }
0x10d2   :  { %v4232_v21 = vmul.f32 0.03125, %v4220_v44  ;;  %v4242_v41 = vmul.f32 %v8715_v57, %v8715_v57 }
0x10d3   :  { %v8722_v18 = vsub.f32 %v8693_v48, %v4233_v20  ;;  %v4251_v61 = vsel %vm200_vm1, %v4243_v60, 0.0 }
0x10d4   :  { %v8726_v19 = vsub.f32 %v8695_v7, %v4232_v21  ;;  %4252 = vadd.xlane.f32.xlu1 %v4251_v61  ;;  %v4229_v31 = vpop.xlane.xlu1 %4228  ;;  %v4248_v53 = vsel %vm200_vm1, %v4242_v41, 0.0 }
0x10d5   :  { %v4235_v29 = vmul.f32 0.03125, %v4229_v31  ;;  %4249 = vadd.xlane.f32.xlu0 %v4248_v53  ;;  %v4226_v4 = vpop.xlane.xlu0 %4225  ;;  %v4245_v24 = vmul.f32 %v8722_v18, %v8722_v18  ;;  %v4293_v53 = vrot.slane %v8676_v23, %v2102_v17 }
0x10d6   :  { %v4234_v0 = vmul.f32 0.03125, %v4226_v4  ;;  %v4244_v12 = vmul.f32 %v8726_v19, %v8726_v19 }
0x10d7   :  { %v8734_v58 = vsub.f32 %v8703_v36, %v4235_v29  ;;  %v4257_v38 = vsel %vm200_vm1, %v4245_v24, 0.0 }
0x10d8   :  { %v8738_v35 = vsub.f32 %v8705_v5, %v4234_v0  ;;  %4258 = vadd.xlane.f32.xlu1 %v4257_v38  ;;  %v4254_v47 = vsel %vm200_vm1, %v4244_v12, 0.0  ;;  %v4303_v0 = vrot.slane %v8676_v23, %v2112_v40 }
0x10d9   :  { %4255 = vadd.xlane.f32.xlu0 %v4254_v47  ;;  %v4247_v54 = vmul.f32 %v8734_v58, %v8734_v58 }
0x10da   :  { %v4246_v39 = vmul.f32 %v8738_v35, %v8738_v35 }
0x10db   :  { %v4263_v56 = vsel %vm200_vm1, %v4247_v54, 0.0 }
0x10dc   :  { %4264 = vadd.xlane.f32.xlu1 %v4263_v56  ;;  %v4260_v26 = vsel %vm200_vm1, %v4246_v39, 0.0 }
0x10dd   :  { %4261 = vadd.xlane.f32.xlu0 %v4260_v26 }
0x1161   :  { %v4253_v8 = vpop.xlane.xlu1 %4252 }
0x1162   :  { %v4267_v9 = vmul.f32 0.03125, %v4253_v8  ;;  %v4250_v6 = vpop.xlane.xlu0 %4249  ;;  %v5161_v8 = vld [vmem:[%s8954_s9 + $0xf0] sm:$0xff] }
0x1163   :  { %v4266_v33 = vmul.f32 0.03125, %v4250_v6  ;;  %v5162_v6 = vld [vmem:[%s8954_s9 + $0xf8] sm:$0xff] }
0x1164   :  { %v4273_v25 = vadd.f32 1e-06, %v4267_v9  ;;  %v6542_v9 = vpack.c.bf16 %v5160_v2, %v5159_v46 }
0x1165   :  { %v4272_v10 = vadd.f32 1e-06, %v4266_v33  ;;  %v4259_v1 = vpop.xlane.xlu1 %4258  ;;  %v6546_v33 = vpack.c.bf16 %v5162_v6, %v5161_v8 }
0x1166   :  { %6855 = vrsqrt.f32 %v4273_v25  ;;  %v4269_v43 = vmul.f32 0.03125, %v4259_v1  ;;  %v4256_v28 = vpop.xlane.xlu0 %4255  ;;  %v5140_v25 = vld [vmem:[%s8955_s8 + $0x1] ss:$0 sm:$0xff] }
0x1167   :  { %6857 = vrsqrt.f32 %v4272_v10  ;;  %v4268_v55 = vmul.f32 0.03125, %v4256_v28 }
0x1168   :  { %v4275_v15 = vadd.f32 1e-06, %v4269_v43 }
0x1169   :  { %v4274_v20 = vadd.f32 1e-06, %v4268_v55  ;;  %v4265_v44 = vpop.xlane.xlu1 %4264 }
0x116a   :  { %6859 = vrsqrt.f32 %v4275_v15  ;;  %v4271_v60 = vmul.f32 0.03125, %v4265_v44  ;;  %v4262_v21 = vpop.xlane.xlu0 %4261 }
0x116b   :  { %6861 = vrsqrt.f32 %v4274_v20  ;;  %v4270_v41 = vmul.f32 0.03125, %v4262_v21 }
0x116c   :  { %v4277_v61 = vadd.f32 1e-06, %v4271_v60 }
0x116d   :  { %v4276_v31 = vadd.f32 1e-06, %v4270_v41 }
0x116e   :  { %6863 = vrsqrt.f32 %v4277_v61 }
0x116f   :  { %6865 = vrsqrt.f32 %v4276_v31 }
0x1170   :  { %v6856_v29 = vpop.eup %6855 }
0x1171   :  { %v6858_v4 = vpop.eup %6857  ;;  %v4285_v24 = vmul.f32 %v6856_v29, %v8712_v59 }
0x1172   :  { %v4284_v12 = vmul.f32 %v6858_v4, %v8715_v57 }
0x1173   :  { %v4295_v38 = vmul.f32 %v4293_v53, %v4285_v24 }
0x1174   :  { %v6860_v47 = vpop.eup %6859  ;;  %v4294_v54 = vmul.f32 %v4293_v53, %v4284_v12 }
0x1175   :  { %v6862_v39 = vpop.eup %6861  ;;  %v4287_v56 = vmul.f32 %v6860_v47, %v8722_v18  ;;  %v4305_v16 = vadd.f32 %v4303_v0, %v4295_v38 }
0x1176   :  { %v4304_v26 = vadd.f32 %v4303_v0, %v4294_v54  ;;  %v4286_v17 = vmul.f32 %v6862_v39, %v8726_v19 }
0x1177   :  { %v4297_v30 = vmul.f32 %v4293_v53, %v4287_v56 }
0x1178   :  { %v6864_v51 = vpop.eup %6863  ;;  %6089 = vmatprep.mubr.msk.f32.mxu0 %vm200_vm1, %v4304_v26  ;;  %v4296_v59 = vmul.f32 %v4293_v53, %v4286_v17 }
0x1179   :  { %v6866_v32 = vpop.eup %6865  ;;  %6090 = vmatmul.mubr.msk.f32.vlgmr.msra.gmra.mrb[72].mxu0 %vm200_vm1, %v4305_v16  ;;  %v4289_v40 = vmul.f32 %v6864_v51, %v8734_v58  ;;  %v4307_v14 = vadd.f32 %v4303_v0, %v4297_v30  ;;  %v5153_v58 = vld [vmem:[%s8954_s9 + $0xb0] sm:$0xff] }
0x117a   :  { %v4306_v23 = vadd.f32 %v4303_v0, %v4296_v59  ;;  %v4288_v57 = vmul.f32 %v6866_v32, %v8738_v35  ;;  %v5154_v35 = vld [vmem:[%s8954_s9 + $0xb8] sm:$0xff] }
0x117b   :  { %v4299_v13 = vmul.f32 %v4293_v53, %v4289_v40  ;;  %v6530_v63 = vpack.c.bf16 %v5154_v35, %v5153_v58 }
0x117c   :  { %6092 = vmatprep.mubr.msk.f32.mxu0 %vm200_vm1, %v4306_v23  ;;  %v4298_v18 = vmul.f32 %v4293_v53, %v4288_v57 }
0x117d   :  { %6093 = vmatmul.mubr.msk.f32.gmra.mrb[74].mxu0 %vm200_vm1, %v4307_v14  ;;  %v4309_v62 = vadd.f32 %v4303_v0, %v4299_v13  ;;  %6531 = vmatprep.subr.bf16.mxu1 %v6530_v63 }
0x117e   :  { %v4308_v19 = vadd.f32 %v4303_v0, %v4298_v18  ;;  %6533 = vmatpush3.bf16.msra.mxu1 %v6530_v63 }
0x117f   :  { %6535 = vmatprep.subr.bf16.mxu1 %v6534_v37 }
0x1180   :  { %6095 = vmatprep.mubr.msk.f32.mxu0 %vm200_vm1, %v4308_v19 }
0x1181   :  { %6096 = vmatmul.mubr.msk.f32.gmra.mrb[76].mxu0 %vm200_vm1, %v4309_v62 }
0x1182   :  { %6537 = vmatpush3.bf16.msra.mxu1 %v6534_v37 }
0x1183   :  { %6539 = vmatprep.subr.bf16.mxu1 %v6538_v45 }
0x1186   :  { %6541 = vmatpush3.bf16.msra.mxu1 %v6538_v45 }
0x1187   :  { %6543 = vmatprep.subr.bf16.mxu1 %v6542_v9 }
0x118a   :  { %6545 = vmatpush3.bf16.msra.mxu1 %v6542_v9 }
0x118b   :  { %6547 = vmatprep.subr.bf16.mxu1 %v6546_v33 }
0x118e   :  { %6549 = vmatpush3.bf16.msra.mxu1 %v6546_v33 }
0x124c   :  { %v6091_v10 = vpop.f32.mrb[72].mxu0 }
0x124d   :  { %v4413_v1 = vadd.f32 %v6091_v10, %v5140_v25  ;;  %v4407_v43 = vpop.f32.mrb[73].mxu0 }
0x124e   :  { %v4408_v28 = vadd.f32 %v5140_v25, %v4407_v43 }
0x124f   :  { %v4443_v55 = vmul.f32 0.70710677, %v4413_v1  ;;  %v4437_v56 = vmul.f32 0.5, %v4413_v1 }
0x1250   :  { %v4442_v15 = vmul.f32 0.70710677, %v4408_v28  ;;  %v6094_v20 = vpop.f32.mrb[74].mxu0  ;;  %v4436_v54 = vmul.f32 0.5, %v4408_v28 }
0x1251   :  { %6867 = verf.f32 %v4443_v55  ;;  %v4423_v44 = vadd.f32 %v6094_v20, %v5140_v25  ;;  %v4417_v60 = vpop.f32.mrb[75].mxu0 }
0x1252   :  { %6869 = verf.f32 %v4442_v15  ;;  %v4418_v21 = vadd.f32 %v5140_v25, %v4417_v60 }
0x1253   :  { %v4445_v41 = vmul.f32 0.70710677, %v4423_v44  ;;  %v4439_v40 = vmul.f32 0.5, %v4423_v44 }
0x1254   :  { %v4444_v61 = vmul.f32 0.70710677, %v4418_v21  ;;  %v6097_v31 = vpop.f32.mrb[76].mxu0  ;;  %v4438_v59 = vmul.f32 0.5, %v4418_v21 }
0x1255   :  { %6871 = verf.f32 %v4445_v41  ;;  %v4433_v53 = vadd.f32 %v6097_v31, %v5140_v25  ;;  %v4427_v29 = vpop.f32.mrb[77].mxu0 }
0x1256   :  { %6873 = verf.f32 %v4444_v61  ;;  %v4428_v4 = vadd.f32 %v5140_v25, %v4427_v29 }
0x1257   :  { %v4447_v24 = vmul.f32 0.70710677, %v4433_v53  ;;  %v4441_v58 = vmul.f32 0.5, %v4433_v53 }
0x1258   :  { %v4446_v0 = vmul.f32 0.70710677, %v4428_v4  ;;  %v4440_v19 = vmul.f32 0.5, %v4428_v4 }
0x1259   :  { %6875 = verf.f32 %v4447_v24 }
0x125a   :  { %6877 = verf.f32 %v4446_v0 }
0x125b   :  { %v6868_v12 = vpop.eup %6867 }
0x125c   :  { %v6870_v38 = vpop.eup %6869  ;;  %v4455_v47 = vadd.f32 1.0, %v6868_v12 }
0x125d   :  { %v4454_v39 = vadd.f32 1.0, %v6870_v38 }
0x125e   :  { %v4461_v30 = vmul.f32 %v4455_v47, %v4437_v56 }
0x125f   :  { %v6872_v26 = vpop.eup %6871  ;;  %v4460_v17 = vmul.f32 %v4454_v39, %v4436_v54 }
0x1260   :  { %v6874_v16 = vpop.eup %6873  ;;  %v4457_v51 = vadd.f32 1.0, %v6872_v26 }
0x1261   :  { %v4456_v32 = vadd.f32 1.0, %v6874_v16  ;;  %6130 = vmatprep.mubr.f32.mxu1 %v4460_v17 }
0x1262   :  { %6131 = vmatmul.mubr.f32.vlgmr.msra.gmra.mrb[54].mxu1 %v4461_v30  ;;  %v4463_v18 = vmul.f32 %v4457_v51, %v4439_v40 }
0x1263   :  { %v6876_v23 = vpop.eup %6875  ;;  %v4462_v57 = vmul.f32 %v4456_v32, %v4438_v59 }
0x1264   :  { %v6878_v14 = vpop.eup %6877  ;;  %v4459_v13 = vadd.f32 1.0, %v6876_v23 }
0x1265   :  { %v4458_v62 = vadd.f32 1.0, %v6878_v14  ;;  %6133 = vmatprep.mubr.f32.mxu1 %v4462_v57 }
0x1266   :  { %6134 = vmatmul.mubr.f32.gmra.mrb[56].mxu1 %v4463_v18  ;;  %v4465_v63 = vmul.f32 %v4459_v13, %v4441_v58  ;;  %v6907_v18 = vmov 0.0|0.0  }
0x1267   :  { %v4464_v35 = vmul.f32 %v4458_v62, %v4440_v19  ;;  %6550 = vmatprep.subr.bf16.mxu0 %v6907_v18  ;;  %v6909_v19 = vmov 0.0  }
0x1268   :  { %6151 = vmatprep.mubr.msk.f32.mxu0 %vm6908_vm3, %v6909_v19 }
0x1269   :  { %6136 = vmatprep.mubr.f32.mxu1 %v4464_v35 }
0x126a   :  { %6137 = vmatmul.mubr.f32.gmra.mrb[58].mxu1 %v4465_v63 }
0x1335   :  { %v6132_v34 = vpop.f32.mrb[54].mxu1 }
0x1336   :  { %v4579_v37 = vadd.f32 %v6132_v34, %v8683_v3  ;;  %v4549_v52 = vpop.f32.mrb[55].mxu1 }
0x1337   :  { %v4578_v27 = vadd.f32 %v4549_v52, %v8685_v50 }
0x1338   :  { %v4589_v45 = vadd.f32 %v5163_v22, %v4579_v37 }
0x1339   :  { %v4588_v46 = vadd.f32 %v5163_v22, %v4578_v27  ;;  %v6135_v2 = vpop.f32.mrb[56].mxu1 }
0x133a   :  { %v4581_v8 = vadd.f32 %v6135_v2, %v8693_v48  ;;  %v4559_v9 = vpop.f32.mrb[57].mxu1  ;;  %v4598_v6 = vsel %vm200_vm1, %v4589_v45, 0.0 }
0x133b   :  { %v4580_v33 = vadd.f32 %v4559_v9, %v8695_v7  ;;  %4599 = vadd.xlane.f32.xlu1 %v4598_v6  ;;  %v4595_v25 = vsel %vm200_vm1, %v4588_v46, 0.0 }
0x133c   :  { %v4591_v10 = vadd.f32 %v5163_v22, %v4581_v8  ;;  %4596 = vadd.xlane.f32.xlu0 %v4595_v25  ;;  %v4594_v25 = vld [vmem:[%s8956_s13] sm:$0x3] }
0x133d   :  { %v4590_v1 = vadd.f32 %v5163_v22, %v4580_v33  ;;  %v6138_v3 = vpop.f32.mrb[58].mxu1 }
0x133e   :  { %v4583_v43 = vadd.f32 %v6138_v3, %v8703_v36  ;;  %v4569_v50 = vpop.f32.mrb[59].mxu1  ;;  %v4604_v28 = vsel %vm200_vm1, %v4591_v10, 0.0  ;;  %v4676_v3 = vrot.slane %v4594_v25, %v7159_v42 }
0x133f   :  { %v4582_v55 = vadd.f32 %v4569_v50, %v8705_v5  ;;  %4605 = vadd.xlane.f32.xlu1 %v4604_v28  ;;  %v4601_v48 = vsel %vm200_vm1, %v4590_v1, 0.0 }
0x1340   :  { %v4593_v15 = vadd.f32 %v5163_v22, %v4583_v43  ;;  %4602 = vadd.xlane.f32.xlu0 %v4601_v48 }
0x1341   :  { %v4592_v7 = vadd.f32 %v5163_v22, %v4582_v55  ;;  %v4686_v55 = vrot.slane %v4594_v25, %v7167_v49 }
0x1342   :  { %v4610_v20 = vsel %vm200_vm1, %v4593_v15, 0.0 }
0x1343   :  { %4611 = vadd.xlane.f32.xlu1 %v4610_v20  ;;  %v4607_v44 = vsel %vm200_vm1, %v4592_v7, 0.0 }
0x1344   :  { %4608 = vadd.xlane.f32.xlu0 %v4607_v44 }
0x13c8   :  { %v4600_v60 = vpop.xlane.xlu1 %4599 }
0x13c9   :  { %v4614_v21 = vmul.f32 0.03125, %v4600_v60  ;;  %v4597_v36 = vpop.xlane.xlu0 %4596 }
0x13ca   :  { %v4613_v41 = vmul.f32 0.03125, %v4597_v36 }
0x13cb   :  { %v8843_v61 = vsub.f32 %v4589_v45, %v4614_v21 }
0x13cc   :  { %v8845_v31 = vsub.f32 %v4588_v46, %v4613_v41  ;;  %v4606_v5 = vpop.xlane.xlu1 %4605 }
0x13cd   :  { %v4616_v53 = vmul.f32 0.03125, %v4606_v5  ;;  %v4603_v29 = vpop.xlane.xlu0 %4602  ;;  %v4626_v4 = vmul.f32 %v8843_v61, %v8843_v61 }
0x13ce   :  { %v4615_v24 = vmul.f32 0.03125, %v4603_v29  ;;  %v4625_v0 = vmul.f32 %v8845_v31, %v8845_v31 }
0x13cf   :  { %v8851_v12 = vsub.f32 %v4591_v10, %v4616_v53  ;;  %v4634_v38 = vsel %vm200_vm1, %v4626_v4, 0.0 }
0x13d0   :  { %v8854_v47 = vsub.f32 %v4590_v1, %v4615_v24  ;;  %4635 = vadd.xlane.f32.xlu1 %v4634_v38  ;;  %v4612_v54 = vpop.xlane.xlu1 %4611  ;;  %v4631_v39 = vsel %vm200_vm1, %v4625_v0, 0.0 }
0x13d1   :  { %v4618_v56 = vmul.f32 0.03125, %v4612_v54  ;;  %4632 = vadd.xlane.f32.xlu0 %v4631_v39  ;;  %v4609_v26 = vpop.xlane.xlu0 %4608  ;;  %v4628_v17 = vmul.f32 %v8851_v12, %v8851_v12 }
0x13d2   :  { %v4617_v16 = vmul.f32 0.03125, %v4609_v26  ;;  %v4627_v30 = vmul.f32 %v8854_v47, %v8854_v47  ;;  %v4794_v26 = vld [vmem:[%s8957_s16 + $0x18] sm:$0xff] }
0x13d3   :  { %v8861_v51 = vsub.f32 %v4593_v15, %v4618_v56  ;;  %v4640_v59 = vsel %vm200_vm1, %v4628_v17, 0.0  ;;  %v4792_v56 = vld [vmem:[%s8957_s16 + $0x8] sm:$0xff] }
0x13d4   :  { %v8864_v32 = vsub.f32 %v4592_v7, %v4617_v16  ;;  %4641 = vadd.xlane.f32.xlu1 %v4640_v59  ;;  %v4637_v40 = vsel %vm200_vm1, %v4627_v30, 0.0  ;;  %v6562_v17 = vpack.c.bf16 %v4794_v26, %v4792_v56  ;;  %v4791_v30 = vld [vmem:[%s8957_s16] sm:$0xff]  ;;  %v4796_v59 = vld [vmem:[%s8957_s16 + $0x28] sm:$0xff] }
0x13d5   :  { %4638 = vadd.xlane.f32.xlu0 %v4637_v40  ;;  %v4630_v23 = vmul.f32 %v8861_v51, %v8861_v51 }
0x13d6   :  { %v4629_v57 = vmul.f32 %v8864_v32, %v8864_v32 }
0x13d7   :  { %v4646_v14 = vsel %vm200_vm1, %v4630_v23, 0.0 }
0x13d8   :  { %4647 = vadd.xlane.f32.xlu1 %v4646_v14  ;;  %v4643_v13 = vsel %vm200_vm1, %v4629_v57, 0.0  ;;  %v4795_v57 = vld [vmem:[%s8957_s16 + $0x20] sm:$0xff]  ;;  %v4797_v14 = vld [vmem:[%s8957_s16 + $0x30] sm:$0xff] }
0x13d9   :  { %4644 = vadd.xlane.f32.xlu0 %v4643_v13  ;;  %v6568_v13 = vpack.c.bf16 %v4797_v14, %v4795_v57 }
0x145d   :  { %v4636_v62 = vpop.xlane.xlu1 %4635 }
0x145e   :  { %v4650_v58 = vmul.f32 0.03125, %v4636_v62  ;;  %v4633_v35 = vpop.xlane.xlu0 %4632  ;;  %v4802_v62 = vld [vmem:[%s8957_s16 + $0x58] sm:$0xff] }
0x145f   :  { %v4649_v63 = vmul.f32 0.03125, %v4633_v35 }
0x1460   :  { %v4656_v22 = vadd.f32 1e-06, %v4650_v58  ;;  %v4799_v58 = vld [vmem:[%s8957_s16 + $0x40] sm:$0xff] }
0x1461   :  { %v4655_v34 = vadd.f32 1e-06, %v4649_v63  ;;  %v4642_v37 = vpop.xlane.xlu1 %4641  ;;  %v4801_v63 = vld [vmem:[%s8957_s16 + $0x50] sm:$0xff] }
0x1462   :  { %6879 = vrsqrt.f32 %v4656_v22  ;;  %v4652_v52 = vmul.f32 0.03125, %v4642_v37  ;;  %v4639_v27 = vpop.xlane.xlu0 %4638  ;;  %v6910_v22 = vmov 0  }
0x1463   :  { %6881 = vrsqrt.f32 %v4655_v34  ;;  %v4651_v45 = vmul.f32 0.03125, %v4639_v27  ;;  %6614 = vset.pattern.permute.xlu0 %v6910_v22  ;;  %v4803_v34 = vld [vmem:[%s8959_s17] sm:$0x3] }
0x1464   :  { %v4658_v46 = vadd.f32 1e-06, %v4652_v52  ;;  %4806 = vperm.xlu0 %6614, %v4803_v34   ;;  %v4785_v52 = vld [vmem:[%s8960_s15] sm:$0x3] }
0x1465   :  { %v4657_v2 = vadd.f32 1e-06, %v4651_v45  ;;  %v4648_v8 = vpop.xlane.xlu1 %4647 }
0x1466   :  { %6883 = vrsqrt.f32 %v4658_v46  ;;  %v4654_v9 = vmul.f32 0.03125, %v4648_v8  ;;  %v4645_v6 = vpop.xlane.xlu0 %4644 }
0x1467   :  { %6885 = vrsqrt.f32 %v4657_v2  ;;  %v4653_v33 = vmul.f32 0.03125, %v4645_v6 }
0x1468   :  { %v4660_v10 = vadd.f32 1e-06, %v4654_v9 }
0x1469   :  { %v4659_v1 = vadd.f32 1e-06, %v4653_v33 }
0x146a   :  { %6887 = vrsqrt.f32 %v4660_v10 }
0x146b   :  { %6889 = vrsqrt.f32 %v4659_v1 }
0x146c   :  { %v6880_v43 = vpop.eup %6879 }
0x146d   :  { %v6882_v50 = vpop.eup %6881  ;;  %v4668_v28 = vmul.f32 %v6880_v43, %v8843_v61 }
0x146e   :  { %v4667_v48 = vmul.f32 %v6882_v50, %v8845_v31 }
0x146f   :  { %v4678_v15 = vmul.f32 %v4676_v3, %v4668_v28 }
0x1470   :  { %v6884_v7 = vpop.eup %6883  ;;  %v4677_v20 = vmul.f32 %v4676_v3, %v4667_v48 }
0x1471   :  { %v6886_v44 = vpop.eup %6885  ;;  %v4670_v60 = vmul.f32 %v6884_v7, %v8851_v12  ;;  %v4688_v21 = vadd.f32 %v4686_v55, %v4678_v15 }
0x1472   :  { %v4669_v36 = vmul.f32 %v6886_v44, %v8854_v47  ;;  %v4687_v41 = vadd.f32 %v4686_v55, %v4677_v20 }
0x1473   :  { %v4680_v53 = vmul.f32 %v4676_v3, %v4670_v60 }
0x1474   :  { %v6888_v5 = vpop.eup %6887  ;;  %v4679_v29 = vmul.f32 %v4676_v3, %v4669_v36  ;;  %v6551_v4 = vpack.c.bf16 %v4688_v21, %v4687_v41 }
0x1475   :  { %v6890_v24 = vpop.eup %6889  ;;  %v4672_v49 = vmul.f32 %v6888_v5, %v8861_v51  ;;  %v4690_v0 = vadd.f32 %v4686_v55, %v4680_v53  ;;  %v4793_v51 = vld [vmem:[%s8957_s16 + $0x10] sm:$0xff] }
0x1476   :  { %6553 = vmatpush3.bf16.xpose.msk.msra.mxu0 %vm7276_vm2, %v6551_v4  ;;  %v4671_v61 = vmul.f32 %v6890_v24, %v8864_v32  ;;  %v4689_v31 = vadd.f32 %v4686_v55, %v4679_v29  ;;  %v4798_v32 = vld [vmem:[%s8957_s16 + $0x38] sm:$0xff]  ;;  %v6564_v40 = vpack.c.bf16 %v4793_v51, %v4791_v30 }
0x1477   :  { %6554 = vmatprep.subr.bf16.mxu0 %v6907_v18  ;;  %v4682_v12 = vmul.f32 %v4676_v3, %v4672_v49  ;;  %v6566_v23 = vpack.c.bf16 %v4798_v32, %v4796_v59 }
0x1478   :  { %v4681_v38 = vmul.f32 %v4676_v3, %v4671_v61  ;;  %v6555_v54 = vpack.c.bf16 %v4690_v0, %v4689_v31 }
0x1479   :  { %v4692_v39 = vadd.f32 %v4686_v55, %v4682_v12 }
0x147a   :  { %v4691_v47 = vadd.f32 %v4686_v55, %v4681_v38 }
0x147c   :  { %v6559_v16 = vpack.c.bf16 %v4692_v39, %v4691_v47 }
0x147e   :  { %6557 = vmatpush3.bf16.xpose.msk.msra.mxu0 %vm7276_vm2, %v6555_v54 }
0x147f   :  { %6558 = vmatprep.subr.bf16.mxu0 %v6907_v18  ;;  %v4800_v18 = vld [vmem:[%s8957_s16 + $0x48] sm:$0xff] }
0x1480   :  { %v6570_v35 = vpack.c.bf16 %v4802_v62, %v4800_v18 }
0x1486   :  { %6561 = vmatpush3.bf16.xpose.msk.msra.mxu0 %vm7276_vm2, %v6559_v16 }
0x1487   :  { %6563 = vmatprep.subr.bf16.mxu0 %v6562_v17 }
0x148d   :  { %6152 = vmatmul.mubr.msk.f32.vlgmr.msra.gmra.mrb[78].mxu0 %vm200_vm1, %v4693_v11 }
0x148e   :  { %6565 = vmatpush1.bf16.msra.mxu0 %v6564_v40  ;;  %4876 = vmatprep.mubr.f32.mxu0 %v6909_v19  ;;  %v6572_v19 = vpack.c.bf16 %v4801_v63, %v4799_v58 }
0x148f   :  { %6567 = vmatprep.subr.bf16.mxu0 %v6566_v23 }
0x1492   :  { %6569 = vmatpush1.bf16.msra.mxu0 %v6568_v13 }
0x1493   :  { %6571 = vmatprep.subr.bf16.mxu0 %v6570_v35 }
0x1496   :  { %6573 = vmatpush1.bf16.msra.mxu0 %v6572_v19 }
0x14e3   :  { %v4807_v2 = vpop.permute.xlu0 %4806 }
0x1560   :  { %v4781_v37 = vpop.f32.mrb[78].mxu0 }
0x1561   :  { %v4789_v27 = vrot.slane %v4781_v37, %v7159_v42  ;;  %v6153_v45 = vpop.f32.mrb[79].mxu0 }
0x1563   :  { %v4790_v46 = vmul.f32 %v4789_v27, %v4785_v52 }
0x1565   :  { %5171 = vmatmul.mubr.msk.f32.vlgmr.msra.gmra.mrb[80].mxu0 %vm77_vm0, %v4790_v46 }
0x1638   :  { %v4878_v8 = vpop.f32.mrb[80].mxu0 }
0x1639   :  { %v4879_v9 = vadd.f32 %v4878_v8, %v4807_v2  ;;  %v4880_v6 = vpop.f32.mrb[81].mxu0 }
0x163a   :  { %v4881_v33 = vadd.f32 %v4880_v6, %v4807_v2 }
0x163b   :  { %v5172_v25 = vmul.f32 -1.442695, %v4879_v9 }
0x163c   :  { %v5173_v10 = vmul.f32 -1.442695, %v4881_v33 }
0x163d   :  { %6891 = vpow2.f32 %v5172_v25 }
0x163e   :  { %6893 = vpow2.f32 %v5173_v10 }
0x1647   :  { %v6892_v1 = vpop.eup %6891 }
0x1648   :  { %v6894_v3 = vpop.eup %6893  ;;  %v4889_v43 = vadd.f32 1.0, %v6892_v1 }
0x1649   :  { %v4890_v50 = vadd.f32 1.0, %v6894_v3 }
0x164a   :  { %6895 = vrcp.f32 %v4889_v43 }
0x164b   :  { %6897 = vrcp.f32 %v4890_v50 }
0x1654   :  { %v6896_v42 = vpop.eup %6895 }
0x1655   :  { %v6898_v28 = vpop.eup %6897 }
0x1656   :  { %v4897_v55 = vcombine.low %v6896_v42, %v6898_v28 }
0x1658   :  { %5174 = vst.sshfl [vmem:[%s8961_s18] sm:$0x33 pattern:$0x76325410] %v4897_v55 }

</bundles_post_ra>
